<compile_context>
chip_gen: v6e
topology: v6e:2x2x1
jax: 0.10.0
libtpu: 0.0.40
codegen_flags: <defaults>
</compile_context>

<pallas_src>
import jax
import jax.numpy as jnp
from jax import lax
from jax.experimental import pallas as pl
from jax.experimental.pallas import tpu as pltpu

F32 = jnp.float32
BF16 = jnp.bfloat16
C = 16                        # node hidden channels (CGConv channels)
D_EDGE = 64                   # edge hidden channels fed to CGConv

_VMEM = pl.BlockSpec(memory_space=pltpu.MemorySpace.VMEM)


def _round_up(x, m):
    return ((x + m - 1) // m) * m


def _vmem_limit_bytes():
    # 96 MiB on 128-MiB parts (v5e/v6e), <=48 MiB on v7x (64 MiB physical).
    cap = 64 * 1024 * 1024
    try:
        cap = int(getattr(pltpu.get_tpu_info(), "vmem_capacity_bytes", cap))
    except Exception:
        pass
    return int(min(96 * 1024 * 1024, max(32 * 1024 * 1024, (cap * 3) // 4)))


def _edge_tiles(n_edges, cg_tile=256, mlp_tile=1024):
    """CGConv tile kept small (masks are tile_e x n_max); edge-MLP tile large.

    tile_mlp is always a multiple of tile_cg, so one padded edge count serves
    both grids.  (On v5e a cg_tile of 128 is slightly better; 256 is a good
    all-generation default.)
    """
    n = max(n_edges, 8)
    tile_cg = min(cg_tile, _round_up(n, 8))
    tile_mlp = min(mlp_tile, _round_up(n, tile_cg))
    e_pad = _round_up(n, tile_mlp)
    return tile_mlp, tile_cg, e_pad


def _softplus(x):
    # torch.nn.functional.softplus (beta=1, threshold=20)
    return jnp.where(x > 20.0, x, jnp.log1p(jnp.exp(jnp.minimum(x, 20.0))))


# --------------------------------------------------------------- kernels ----
def _edge_mlp_kernel(x_ref, w1, b1, w2, b2, w3, b3, o_ref):
    """dense_edge_1 + ReLU -> dense_edge_2 + ReLU -> dense_edge_3 (dropout = eval identity)."""
    h = jnp.dot(x_ref[...], w1[...], preferred_element_type=F32) + b1[...]
    h = jnp.maximum(h, 0.0)
    h = jnp.dot(h, w2[...], preferred_element_type=F32) + b2[...]
    h = jnp.maximum(h, 0.0)
    o_ref[...] = jnp.dot(h, w3[...], preferred_element_type=F32) + b3[...]


def _cgconv_pair_kernel(dst_ref, src_ref, e_ref,
                        xu_ref, xi_ref, wu_ref, bu_ref, wi_ref, bi_ref,
                        wdst_ref, wsrc_ref, we_ref, bz_ref,
                        g_ref, beta_ref, rm_ref, rv_ref, invdeg_ref,
                        o_ref,
                        xu_sc, xi_sc, pdst_sc, psrc_sc, acc_sc):
    """Both relations of one hetero CGConv layer, grid = edge tiles (reduction).

    out[:, :C]  = BN(mean_j gate*core) + x_item     (relation 0: user->item)
    out[:, C:]  = BN(mean_j gate*core) + x_user     (relation 1: item->user)
    z = [x_dst, x_src, e] is never formed: the fused gate|core weight is split
    by row blocks; node projections are computed once at k==0 (VMEM scratch),
    only e @ W_e is recomputed per edge tile.  The (dense_user / dense_item)
    input projection is fused into the k==0 prologue (identity for conv2).
    """
    k = pl.program_id(0)
    tile_e = e_ref.shape[0]
    n_max, c2 = o_ref.shape
    c = c2 // 2

    @pl.when(k == 0)
    def _():
        # fused node dense projections (identity weights for conv2)
        xu = jnp.dot(xu_ref[...], wu_ref[...], preferred_element_type=F32) + bu_ref[...]
        xi = jnp.dot(xi_ref[...], wi_ref[...], preferred_element_type=F32) + bi_ref[...]
        xu_sc[...] = xu
        xi_sc[...] = xi
        # per-relation node projections through the dst / src row-blocks of the
        # fused [W_f | W_s] weight; stored bf16 so the one-hot gather matmuls
        # run the MXU in bf16 (gather of bf16-rounded values is exact).
        # relation 0: user->item (dst=item), relation 1: item->user (dst=user)
        pdst_sc[0] = jnp.dot(xi, wdst_ref[0], preferred_element_type=F32).astype(BF16)
        psrc_sc[0] = jnp.dot(xu, wsrc_ref[0], preferred_element_type=F32).astype(BF16)
        pdst_sc[1] = jnp.dot(xu, wdst_ref[1], preferred_element_type=F32).astype(BF16)
        psrc_sc[1] = jnp.dot(xi, wsrc_ref[1], preferred_element_type=F32).astype(BF16)
        acc_sc[...] = jnp.zeros_like(acc_sc)

    e = e_ref[...]                                            # read once, shared by both relations
    col = lax.broadcasted_iota(jnp.int32, (tile_e, n_max), 1)

    scat = []
    for r in range(2):                                        # static unroll over the two relations
        dst = dst_ref[r]                                      # (tile_e, 1) int32, padded edges = -1
        src = src_ref[r]
        mask_d = (col == dst).astype(BF16)                    # exact 0/1 one-hot, bf16
        mask_s = (col == src).astype(BF16)
        # pre = z @ [W_f | W_s] + [b_f | b_s]   -> (tile_e, 2C); gathers on the MXU
        pre = (jnp.dot(mask_d, pdst_sc[r], preferred_element_type=F32)
               + jnp.dot(mask_s, psrc_sc[r], preferred_element_type=F32)
               + jnp.dot(e, we_ref[r], preferred_element_type=F32)
               + bz_ref[r])
        gate = pl.reciprocal(1.0 + jnp.exp(-pre[:, :c]), approx=True)   # sigmoid (EUP)
        core = _softplus(pre[:, c:])
        msg = (gate * core).astype(BF16)                      # (tile_e, C)
        # scatter-sum into destination rows: contract the edge axis directly
        # (no mask transpose); padded (-1) edges have all-zero mask rows.
        scat.append(lax.dot_general(mask_d, msg,
                                    dimension_numbers=(((0,), (0,)), ((), ())),
                                    preferred_element_type=F32))
    acc_sc[...] += jnp.concatenate(scat, axis=-1)             # lanes [0:C]=rel0, [C:2C]=rel1

    @pl.when(k == pl.num_programs(0) - 1)
    def _():
        agg = acc_sc[...] * invdeg_ref[...]                   # mean aggregation (aggr='mean')
        inv = lax.rsqrt(rv_ref[...] + 1e-5)                   # eval-mode BatchNorm1d
        xdst_cat = jnp.concatenate([xi_sc[...], xu_sc[...]], axis=-1)   # [item | user]
        o_ref[...] = (agg - rm_ref[...]) * inv * g_ref[...] + beta_ref[...] + xdst_cat


def _ensembler_kernel(xu_ref, xi_ref, wu_ref, wi_ref, b_ref, o_ref):
    """Linear(cat[xu, xi]) + sigmoid as VPU multiply + lane reduce (no 1-wide matmul)."""
    s = (jnp.sum(xu_ref[...] * wu_ref[...], axis=1, keepdims=True)
         + jnp.sum(xi_ref[...] * wi_ref[...], axis=1, keepdims=True)
         + b_ref[...])
    o_ref[...] = 1.0 / (1.0 + jnp.exp(-s))


# --------------------------------------------------------------- wrappers ---
def edge_mlp(x_pad, p, tile_e, vmem_limit):
    e_pad, d_in = x_pad.shape
    full = lambda a: pl.BlockSpec(a.shape, lambda i: (0,) * a.ndim)
    flops = 2 * e_pad * (d_in * 256 + 256 * 128 + 128 * D_EDGE)
    bytes_accessed = 4 * (e_pad * (d_in + D_EDGE)
                          + d_in * 256 + 256 + 256 * 128 + 128 + 128 * D_EDGE + D_EDGE)
    return pl.pallas_call(
        _edge_mlp_kernel,
        out_shape=jax.ShapeDtypeStruct((e_pad, D_EDGE), F32),
        grid=(e_pad // tile_e,),
        in_specs=[pl.BlockSpec((tile_e, d_in), lambda i: (i, 0)),
                  full(p["w1"]), full(p["b1"]), full(p["w2"]), full(p["b2"]),
                  full(p["w3"]), full(p["b3"])],
        out_specs=pl.BlockSpec((tile_e, D_EDGE), lambda i: (i, 0)),
        compiler_params=pltpu.CompilerParams(
            dimension_semantics=("parallel",),
            vmem_limit_bytes=vmem_limit),
        cost_estimate=pl.CostEstimate(flops=flops, transcendentals=0,
                                      bytes_accessed=bytes_accessed),
    )(x_pad, p["w1"], p["b1"], p["w2"], p["b2"], p["w3"], p["b3"])


def cgconv_pair_layer(dst, src, e, xu_in, xi_in, wu, bu, wi, bi, lp, invdeg_cat,
                      tile_e, vmem_limit):
    """Both relations of one hetero CGConv layer in a single pallas_call."""
    n_max = xu_in.shape[0]
    e_pad = e.shape[0]
    c2 = 2 * C
    fu, fi = xu_in.shape[1], xi_in.shape[1]
    full = lambda a: pl.BlockSpec(a.shape, lambda k: (0,) * a.ndim)

    flops = (2 * (2 * e_pad * n_max * c2 * 2          # gather matmuls (dst + src), both relations
                  + 2 * e_pad * D_EDGE * c2           # e @ W_e
                  + 2 * e_pad * n_max * C)            # scatter matmul
             + 2 * n_max * (fu + fi) * C              # fused node projections
             + 4 * 2 * n_max * C * c2)                # per-relation pdst/psrc projections
    transcendentals = 2 * e_pad * c2
    bytes_accessed = 4 * (4 * e_pad + e_pad * D_EDGE + n_max * (fu + fi)
                          + 2 * n_max * c2
                          + 2 * (2 * C * c2 + D_EDGE * c2) + 8 * c2
                          + (fu + fi + 2) * C)

    return pl.pallas_call(
        _cgconv_pair_kernel,
        out_shape=jax.ShapeDtypeStruct((n_max, c2), F32),
        grid=(e_pad // tile_e,),
        in_specs=[pl.BlockSpec((2, tile_e, 1), lambda k: (0, k, 0)),   # dst idx (both relations)
                  pl.BlockSpec((2, tile_e, 1), lambda k: (0, k, 0)),   # src idx
                  pl.BlockSpec((tile_e, D_EDGE), lambda k: (k, 0)),    # edge feats (shared)
                  full(xu_in), full(xi_in),
                  full(wu), full(bu), full(wi), full(bi),
                  full(lp["w_dst"]), full(lp["w_src"]), full(lp["w_e"]), full(lp["b"]),
                  full(lp["bn_gamma"]), full(lp["bn_beta"]),
                  full(lp["bn_rmean"]), full(lp["bn_rvar"]),
                  full(invdeg_cat)],
        out_specs=pl.BlockSpec((n_max, c2), lambda k: (0, 0)),
        scratch_shapes=[pltpu.VMEM((n_max, C), F32),          # projected x_user
                        pltpu.VMEM((n_max, C), F32),          # projected x_item
                        pltpu.VMEM((2, n_max, c2), BF16),     # x_dst @ W[:C]  (fused gate|core)
                        pltpu.VMEM((2, n_max, c2), BF16),     # x_src @ W[C:2C]
                        pltpu.VMEM((n_max, c2), F32)],        # scatter accumulator [rel0 | rel1]
        compiler_params=pltpu.CompilerParams(
            dimension_semantics=("arbitrary",),               # edge axis is a reduction
            vmem_limit_bytes=vmem_limit),
        cost_estimate=pl.CostEstimate(flops=flops, transcendentals=transcendentals,
                                      bytes_accessed=bytes_accessed),
    )(dst, src, e, xu_in, xi_in, wu, bu, wi, bi,
      lp["w_dst"], lp["w_src"], lp["w_e"], lp["b"],
      lp["bn_gamma"], lp["bn_beta"], lp["bn_rmean"], lp["bn_rvar"], invdeg_cat)


def ensembler(xu_sel, xi_sel, p):
    # TODO(synk): could be folded into the conv2 epilogue to cut one more launch.
    return pl.pallas_call(
        _ensembler_kernel,
        out_shape=jax.ShapeDtypeStruct((xu_sel.shape[0], 1), F32),
        in_specs=[_VMEM] * 5,
        out_specs=_VMEM,
    )(xu_sel, xi_sel, p["wu"], p["wi"], p["b"])


# ---------------------------------------------------------------- params ----
def _lin_params(key, fin, fout):
    kw, kb = jax.random.split(key)
    bound = 1.0 / float(fin) ** 0.5
    w = jax.random.uniform(kw, (fin, fout), F32, -bound, bound)      # stored [in, out]
    b = jax.random.uniform(kb, (1, fout), F32, -bound, bound)
    return w, b


def _cgconv_rel_params(key, channels=C, edge_dim=D_EDGE):
    zdim = 2 * channels + edge_dim
    kf, ks = jax.random.split(key)
    wf, bf = _lin_params(kf, zdim, channels)     # lin_f (gate)
    ws, bs = _lin_params(ks, zdim, channels)     # lin_s (core)
    w = jnp.concatenate([wf, ws], axis=1)        # fused [zdim, 2C] = [W_f | W_s]
    return dict(
        w_dst=w[:channels],                      # rows multiplying x_dst (x_i)
        w_src=w[channels:2 * channels],          # rows multiplying x_src (x_j)
        w_e=w[2 * channels:],                    # rows multiplying edge_attr
        b=jnp.concatenate([bf, bs], axis=1),     # [1, 2C]
        gamma=jnp.ones((1, channels), F32), beta=jnp.zeros((1, channels), F32),
        rmean=jnp.zeros((1, channels), F32), rvar=jnp.ones((1, channels), F32))


def _stack_conv_layer(p_ui, p_iu):
    # relation 0 = user->item (dst=item), relation 1 = item->user (dst=user)
    stack = lambda k: jnp.stack([p_ui[k], p_iu[k]])                  # per-relation weights
    cat = lambda k: jnp.concatenate([p_ui[k], p_iu[k]], axis=-1)     # lane-concat BN params
    return dict(w_dst=stack("w_dst"), w_src=stack("w_src"),
                w_e=stack("w_e"), b=stack("b"),
                bn_gamma=cat("gamma"), bn_beta=cat("beta"),
                bn_rmean=cat("rmean"), bn_rvar=cat("rvar"))


def init_params(key, num_user_feature, num_item_feature, num_edge_feature):
    ks = jax.random.split(key, 10)
    w1, b1 = _lin_params(ks[0], num_edge_feature, 256)
    w2, b2 = _lin_params(ks[1], 256, 128)
    w3, b3 = _lin_params(ks[2], 128, D_EDGE)
    wu, bu = _lin_params(ks[3], num_user_feature, C)
    wi, bi = _lin_params(ks[4], num_item_feature, C)
    wd, bd = _lin_params(ks[9], 2 * C, 1)
    return dict(
        edge_mlp=dict(w1=w1, b1=b1, w2=w2, b2=b2, w3=w3, b3=b3),
        dense_user=dict(w=wu, b=bu),
        dense_item=dict(w=wi, b=bi),
        # to_hetero duplicates the CGConv weights per relation
        conv1=_stack_conv_layer(_cgconv_rel_params(ks[5]), _cgconv_rel_params(ks[6])),
        conv2=_stack_conv_layer(_cgconv_rel_params(ks[7]), _cgconv_rel_params(ks[8])),
        ensembler=dict(wu=wd[:C].T, wi=wd[C:].T, b=bd),
    )


# ---------------------------------------------------------------- forward ---
def model_forward(params, x_user, x_item, edge_attr, edge_index, edge_index_batch):
    n_user, n_item = x_user.shape[0], x_item.shape[0]
    n_edges = edge_attr.shape[0]
    src_u, dst_i = edge_index[0], edge_index[1]

    tile_mlp, tile_cg, e_pad = _edge_tiles(n_edges)
    n_max = _round_up(max(n_user, n_item), 8)
    vmem_limit = _vmem_limit_bytes()

    # --- edge padding (padded rows scatter through all-zero one-hot rows) ---
    ea_pad = jnp.pad(edge_attr, ((0, e_pad - n_edges), (0, 0)))
    pad_idx = lambda idx: jnp.pad(idx.astype(jnp.int32), (0, e_pad - n_edges),
                                  constant_values=-1)
    # relation 0: user->item (dst=item); relation 1: item->user (dst=user)
    dst_stack = jnp.stack([pad_idx(dst_i), pad_idx(src_u)])[:, :, None]   # [2, E_pad, 1]
    src_stack = jnp.stack([pad_idx(src_u), pad_idx(dst_i)])[:, :, None]

    # mean-aggregation inverse degrees, lane-concatenated [item | user] (shared by both convs)
    def inv_degree(idx, n_nodes):
        deg = jnp.zeros((n_nodes,), F32).at[idx].add(1.0)
        inv = 1.0 / jnp.maximum(deg, 1.0)        # deg-0 nodes aggregate to 0 (PyG mean)
        return jnp.pad(inv, (0, n_max - n_nodes), constant_values=1.0)
    invdeg_cat = jnp.concatenate(
        [jnp.broadcast_to(inv_degree(dst_i, n_item)[:, None], (n_max, C)),
         jnp.broadcast_to(inv_degree(src_u, n_user)[:, None], (n_max, C))], axis=-1)

    # --- shared edge MLP (dropouts are eval-mode identities) ---
    e = edge_mlp(ea_pad, params["edge_mlp"], tile_mlp, vmem_limit)   # [E_pad, 64]

    pad_rows = lambda x: jnp.pad(x, ((0, n_max - x.shape[0]), (0, 0)))
    xu0 = pad_rows(x_user)
    xi0 = pad_rows(x_item)

    # conv1: dense_user / dense_item projections fused into the kernel prologue
    out1 = cgconv_pair_layer(dst_stack, src_stack, e, xu0, xi0,
                             params["dense_user"]["w"], params["dense_user"]["b"],
                             params["dense_item"]["w"], params["dense_item"]["b"],
                             params["conv1"], invdeg_cat, tile_cg, vmem_limit)
    xi1, xu1 = out1[:, :C], out1[:, C:]          # lane-concatenated [item | user]

    # conv2: identity "projection" reuses the same fused kernel
    eye_c = jnp.eye(C, dtype=F32)
    zero_b = jnp.zeros((1, C), F32)
    out2 = cgconv_pair_layer(dst_stack, src_stack, e, xu1, xi1,
                             eye_c, zero_b, eye_c, zero_b,
                             params["conv2"], invdeg_cat, tile_cg, vmem_limit)
    xi2, xu2 = out2[:n_item, :C], out2[:n_user, C:]

    # Ensembler on (user, item) pairs of edge_index_batch, sigmoid fused in kernel.
    u_sel = xu2[edge_index_batch[:, 0]]
    i_sel = xi2[edge_index_batch[:, 1]]
    return ensembler(u_sel, i_sel, params["ensembler"])              # [B, 1]


if __name__ == "__main__":
    NUM_USER_FEAT, NUM_ITEM_FEAT, NUM_EDGE_FEAT = 8, 12, 20
    N_USER, N_ITEM, N_EDGE, BATCH = 6, 5, 16, 8

    key = jax.random.PRNGKey(0)
    k_par, k_xu, k_xi, k_ea, k_src, k_dst, k_bu, k_bi = jax.random.split(key, 8)

    params = init_params(k_par, NUM_USER_FEAT, NUM_ITEM_FEAT, NUM_EDGE_FEAT)

    x_user = jax.random.normal(k_xu, (N_USER, NUM_USER_FEAT), F32)
    x_item = jax.random.normal(k_xi, (N_ITEM, NUM_ITEM_FEAT), F32)
    edge_attr = jax.random.normal(k_ea, (N_EDGE, NUM_EDGE_FEAT), F32)
    edge_index = jnp.stack([
        jax.random.randint(k_src, (N_EDGE,), 0, N_USER),
        jax.random.randint(k_dst, (N_EDGE,), 0, N_ITEM)], axis=0)       # [2, E]
    edge_index_batch = jnp.stack([
        jax.random.randint(k_bu, (BATCH,), 0, N_USER),
        jax.random.randint(k_bi, (BATCH,), 0, N_ITEM)], axis=1)         # [B, 2] = (user, item)

    out = jax.jit(model_forward)(params, x_user, x_item, edge_attr,
                                 edge_index, edge_index_batch)
    out = jax.block_until_ready(out)
    assert out.shape == (BATCH, 1)
    assert bool(jnp.all(jnp.isfinite(out)))
    assert bool(jnp.all((out >= 0.0) & (out <= 1.0)))
    print("KERNEL_OK")
</pallas_src>

<mosaic_0001>
module attributes {stable_mosaic.version = 11 : i64} {
  func.func private @main(%arg0: i32) attributes {dimension_semantics = [#tpu.dimension_semantics<core_parallel>], iteration_bounds = array<i64: 2>, tpu.core_type = #tpu.core_type<sc_scalar_subcore>, window_params = []} {
    return
  }
}

module attributes {stable_mosaic.version = 11 : i64} {
  func.func private @main(%arg0: i32) attributes {dimension_semantics = [#tpu.dimension_semantics<core_parallel>], iteration_bounds = array<i64: 2>, tpu.core_type = #tpu.core_type<sc_scalar_subcore>, window_params = []} {
    return
  }
}

module attributes {stable_mosaic.version = 11 : i64} {
  func.func @_edge_mlp_kernel(%arg0: i32, %arg1: memref<16x20xf32, #tpu.memory_space<vmem>>, %arg2: memref<20x256xf32, #tpu.memory_space<vmem>>, %arg3: memref<1x256xf32, #tpu.memory_space<vmem>>, %arg4: memref<256x128xf32, #tpu.memory_space<vmem>>, %arg5: memref<1x128xf32, #tpu.memory_space<vmem>>, %arg6: memref<128x64xf32, #tpu.memory_space<vmem>>, %arg7: memref<1x64xf32, #tpu.memory_space<vmem>>, %arg8: memref<16x64xf32, #tpu.memory_space<vmem>>) attributes {dimension_semantics = [#tpu.dimension_semantics<parallel>], iteration_bounds = array<i64: 1>, scalar_prefetch = 0 : i64, scratch_operands = 0 : i64, tpu.core_type = #tpu.core_type<tc>, window_params = [{transform_indices = @transform_0, window_bounds = array<i64: 16, 20>}, {pipeline_mode = #tpu.pipeline_mode<synchronous>, transform_indices = @transform_1, window_bounds = array<i64: 20, 256>}, {pipeline_mode = #tpu.pipeline_mode<synchronous>, transform_indices = @transform_2, window_bounds = array<i64: 1, 256>}, {pipeline_mode = #tpu.pipeline_mode<synchronous>, transform_indices = @transform_3, window_bounds = array<i64: 256, 128>}, {pipeline_mode = #tpu.pipeline_mode<synchronous>, transform_indices = @transform_4, window_bounds = array<i64: 1, 128>}, {pipeline_mode = #tpu.pipeline_mode<synchronous>, transform_indices = @transform_5, window_bounds = array<i64: 128, 64>}, {pipeline_mode = #tpu.pipeline_mode<synchronous>, transform_indices = @transform_6, window_bounds = array<i64: 1, 64>}, {transform_indices = @transform_7, window_bounds = array<i64: 16, 64>}]} {
    %c0 = arith.constant 0 : index
    %c0_0 = arith.constant 0 : index
    %0 = vector.load %arg1[%c0, %c0_0] : memref<16x20xf32, #tpu.memory_space<vmem>>, vector<16x20xf32>
    %c0_1 = arith.constant 0 : index
    %c0_2 = arith.constant 0 : index
    %1 = vector.load %arg2[%c0_1, %c0_2] : memref<20x256xf32, #tpu.memory_space<vmem>>, vector<20x256xf32>
    %cst = arith.constant dense<0.000000e+00> : vector<16x256xf32>
    %2 = tpu.matmul %0, %1, %cst {dimension_numbers = #tpu.dot_dimension_numbers<[1], [0], [0], [1], [0, 0, 1, 1], [], []>} : vector<16x20xf32>, vector<20x256xf32>, vector<16x256xf32> -> vector<16x256xf32>
    %c0_3 = arith.constant 0 : index
    %c0_4 = arith.constant 0 : index
    %3 = vector.load %arg3[%c0_3, %c0_4] : memref<1x256xf32, #tpu.memory_space<vmem>>, vector<1x256xf32>
    %4 = vector.broadcast %3 : vector<1x256xf32> to vector<16x256xf32>
    %5 = arith.addf %2, %4 : vector<16x256xf32>
    %cst_5 = arith.constant 0.000000e+00 : f32
    %6 = vector.broadcast %cst_5 : f32 to vector<16x256xf32>
    %7 = arith.maximumf %5, %6 : vector<16x256xf32>
    %c0_6 = arith.constant 0 : index
    %c0_7 = arith.constant 0 : index
    %8 = vector.load %arg4[%c0_6, %c0_7] : memref<256x128xf32, #tpu.memory_space<vmem>>, vector<256x128xf32>
    %cst_8 = arith.constant dense<0.000000e+00> : vector<16x128xf32>
    %9 = tpu.matmul %7, %8, %cst_8 {dimension_numbers = #tpu.dot_dimension_numbers<[1], [0], [0], [1], [0, 0, 1, 1], [], []>} : vector<16x256xf32>, vector<256x128xf32>, vector<16x128xf32> -> vector<16x128xf32>
    %c0_9 = arith.constant 0 : index
    %c0_10 = arith.constant 0 : index
    %10 = vector.load %arg5[%c0_9, %c0_10] : memref<1x128xf32, #tpu.memory_space<vmem>>, vector<1x128xf32>
    %11 = vector.broadcast %10 : vector<1x128xf32> to vector<16x128xf32>
    %12 = arith.addf %9, %11 : vector<16x128xf32>
    %cst_11 = arith.constant 0.000000e+00 : f32
    %13 = vector.broadcast %cst_11 : f32 to vector<16x128xf32>
    %14 = arith.maximumf %12, %13 : vector<16x128xf32>
    %c0_12 = arith.constant 0 : index
    %c0_13 = arith.constant 0 : index
    %15 = vector.load %arg6[%c0_12, %c0_13] : memref<128x64xf32, #tpu.memory_space<vmem>>, vector<128x64xf32>
    %cst_14 = arith.constant dense<0.000000e+00> : vector<16x64xf32>
    %16 = tpu.matmul %14, %15, %cst_14 {dimension_numbers = #tpu.dot_dimension_numbers<[1], [0], [0], [1], [0, 0, 1, 1], [], []>} : vector<16x128xf32>, vector<128x64xf32>, vector<16x64xf32> -> vector<16x64xf32>
    %c0_15 = arith.constant 0 : index
    %c0_16 = arith.constant 0 : index
    %17 = vector.load %arg7[%c0_15, %c0_16] : memref<1x64xf32, #tpu.memory_space<vmem>>, vector<1x64xf32>
    %18 = vector.broadcast %17 : vector<1x64xf32> to vector<16x64xf32>
    %19 = arith.addf %16, %18 : vector<16x64xf32>
    %c0_17 = arith.constant 0 : index
    %c0_18 = arith.constant 0 : index
    %20 = vector.load %arg8[%c0_17, %c0_18] : memref<16x64xf32, #tpu.memory_space<vmem>>, vector<16x64xf32>
    tpu.vector_store %arg8[%c0_17, %c0_18], %19 {strides = array<i32>} : memref<16x64xf32, #tpu.memory_space<vmem>>, vector<16x64xf32>,
    return
  }
  func.func @transform_0(%arg0: i32) -> (i32, i32) {
    %c0_i32 = arith.constant 0 : i32
    %c0_i32_0 = arith.constant 0 : i32
    return %arg0, %c0_i32 : i32, i32
  }
  func.func @transform_1(%arg0: i32) -> (i32, i32) {
    %c0_i32 = arith.constant 0 : i32
    %c0_i32_0 = arith.constant 0 : i32
    %c0_i32_1 = arith.constant 0 : i32
    return %c0_i32, %c0_i32_0 : i32, i32
  }
  func.func @transform_2(%arg0: i32) -> (i32, i32) {
    %c0_i32 = arith.constant 0 : i32
    %c0_i32_0 = arith.constant 0 : i32
    %c0_i32_1 = arith.constant 0 : i32
    return %c0_i32, %c0_i32_0 : i32, i32
  }
  func.func @transform_3(%arg0: i32) -> (i32, i32) {
    %c0_i32 = arith.constant 0 : i32
    %c0_i32_0 = arith.constant 0 : i32
    %c0_i32_1 = arith.constant 0 : i32
    return %c0_i32, %c0_i32_0 : i32, i32
  }
  func.func @transform_4(%arg0: i32) -> (i32, i32) {
    %c0_i32 = arith.constant 0 : i32
    %c0_i32_0 = arith.constant 0 : i32
    %c0_i32_1 = arith.constant 0 : i32
    return %c0_i32, %c0_i32_0 : i32, i32
  }
  func.func @transform_5(%arg0: i32) -> (i32, i32) {
    %c0_i32 = arith.constant 0 : i32
    %c0_i32_0 = arith.constant 0 : i32
    %c0_i32_1 = arith.constant 0 : i32
    return %c0_i32, %c0_i32_0 : i32, i32
  }
  func.func @transform_6(%arg0: i32) -> (i32, i32) {
    %c0_i32 = arith.constant 0 : i32
    %c0_i32_0 = arith.constant 0 : i32
    %c0_i32_1 = arith.constant 0 : i32
    return %c0_i32, %c0_i32_0 : i32, i32
  }
  func.func @transform_7(%arg0: i32) -> (i32, i32) {
    %c0_i32 = arith.constant 0 : i32
    %c0_i32_0 = arith.constant 0 : i32
    return %arg0, %c0_i32 : i32, i32
  }
}

module attributes {stable_mosaic.version = 11 : i64} {
  func.func @_cgconv_pair_kernel(%arg0: i32, %arg1: memref<2x16x1xi32, #tpu.memory_space<vmem>>, %arg2: memref<2x16x1xi32, #tpu.memory_space<vmem>>, %arg3: memref<16x64xf32, #tpu.memory_space<vmem>>, %arg4: memref<8x8xf32, #tpu.memory_space<vmem>>, %arg5: memref<8x12xf32, #tpu.memory_space<vmem>>, %arg6: memref<8x16xf32, #tpu.memory_space<vmem>>, %arg7: memref<1x16xf32, #tpu.memory_space<vmem>>, %arg8: memref<12x16xf32, #tpu.memory_space<vmem>>, %arg9: memref<1x16xf32, #tpu.memory_space<vmem>>, %arg10: memref<2x16x32xf32, #tpu.memory_space<vmem>>, %arg11: memref<2x16x32xf32, #tpu.memory_space<vmem>>, %arg12: memref<2x64x32xf32, #tpu.memory_space<vmem>>, %arg13: memref<2x1x32xf32, #tpu.memory_space<vmem>>, %arg14: memref<1x32xf32, #tpu.memory_space<vmem>>, %arg15: memref<1x32xf32, #tpu.memory_space<vmem>>, %arg16: memref<1x32xf32, #tpu.memory_space<vmem>>, %arg17: memref<1x32xf32, #tpu.memory_space<vmem>>, %arg18: memref<8x32xf32, #tpu.memory_space<vmem>>, %arg19: memref<8x32xf32, #tpu.memory_space<vmem>>, %arg20: memref<8x16xf32, #tpu.memory_space<vmem>>, %arg21: memref<8x16xf32, #tpu.memory_space<vmem>>, %arg22: memref<2x8x32xbf16, #tpu.memory_space<vmem>>, %arg23: memref<2x8x32xbf16, #tpu.memory_space<vmem>>, %arg24: memref<8x32xf32, #tpu.memory_space<vmem>>) attributes {dimension_semantics = [#tpu.dimension_semantics<arbitrary>], iteration_bounds = array<i64: 1>, scalar_prefetch = 0 : i64, scratch_operands = 5 : i64, tpu.core_type = #tpu.core_type<tc>, window_params = [{transform_indices = @transform_0, window_bounds = array<i64: 2, 16, 1>}, {transform_indices = @transform_1, window_bounds = array<i64: 2, 16, 1>}, {transform_indices = @transform_2, window_bounds = array<i64: 16, 64>}, {pipeline_mode = #tpu.pipeline_mode<synchronous>, transform_indices = @transform_3, window_bounds = array<i64: 8, 8>}, {pipeline_mode = #tpu.pipeline_mode<synchronous>, transform_indices = @transform_4, window_bounds = array<i64: 8, 12>}, {pipeline_mode = #tpu.pipeline_mode<synchronous>, transform_indices = @transform_5, window_bounds = array<i64: 8, 16>}, {pipeline_mode = #tpu.pipeline_mode<synchronous>, transform_indices = @transform_6, window_bounds = array<i64: 1, 16>}, {pipeline_mode = #tpu.pipeline_mode<synchronous>, transform_indices = @transform_7, window_bounds = array<i64: 12, 16>}, {pipeline_mode = #tpu.pipeline_mode<synchronous>, transform_indices = @transform_8, window_bounds = array<i64: 1, 16>}, {pipeline_mode = #tpu.pipeline_mode<synchronous>, transform_indices = @transform_9, window_bounds = array<i64: 2, 16, 32>}, {pipeline_mode = #tpu.pipeline_mode<synchronous>, transform_indices = @transform_10, window_bounds = array<i64: 2, 16, 32>}, {pipeline_mode = #tpu.pipeline_mode<synchronous>, transform_indices = @transform_11, window_bounds = array<i64: 2, 64, 32>}, {pipeline_mode = #tpu.pipeline_mode<synchronous>, transform_indices = @transform_12, window_bounds = array<i64: 2, 1, 32>}, {pipeline_mode = #tpu.pipeline_mode<synchronous>, transform_indices = @transform_13, window_bounds = array<i64: 1, 32>}, {pipeline_mode = #tpu.pipeline_mode<synchronous>, transform_indices = @transform_14, window_bounds = array<i64: 1, 32>}, {pipeline_mode = #tpu.pipeline_mode<synchronous>, transform_indices = @transform_15, window_bounds = array<i64: 1, 32>}, {pipeline_mode = #tpu.pipeline_mode<synchronous>, transform_indices = @transform_16, window_bounds = array<i64: 1, 32>}, {pipeline_mode = #tpu.pipeline_mode<synchronous>, transform_indices = @transform_17, window_bounds = array<i64: 8, 32>}, {pipeline_mode = #tpu.pipeline_mode<synchronous>, transform_indices = @transform_18, window_bounds = array<i64: 8, 32>}]} {
    %c0_i32 = arith.constant 0 : i32
    %0 = arith.cmpi eq, %arg0, %c0_i32 : i32
    %1 = arith.extui %0 : i1 to i32
    %c0_i32_0 = arith.constant 0 : i32
    %2 = arith.cmpi ne, %1, %c0_i32_0 : i32
    scf.if %2 {
      %c0_58 = arith.constant 0 : index
      %c0_59 = arith.constant 0 : index
      %106 = vector.load %arg4[%c0_58, %c0_59] : memref<8x8xf32, #tpu.memory_space<vmem>>, vector<8x8xf32>
      %c0_60 = arith.constant 0 : index
      %c0_61 = arith.constant 0 : index
      %107 = vector.load %arg6[%c0_60, %c0_61] : memref<8x16xf32, #tpu.memory_space<vmem>>, vector<8x16xf32>
      %cst_62 = arith.constant dense<0.000000e+00> : vector<8x16xf32>
      %108 = tpu.matmul %106, %107, %cst_62 {dimension_numbers = #tpu.dot_dimension_numbers<[1], [0], [0], [1], [0, 0, 1, 1], [], []>} : vector<8x8xf32>, vector<8x16xf32>, vector<8x16xf32> -> vector<8x16xf32>
      %c0_63 = arith.constant 0 : index
      %c0_64 = arith.constant 0 : index
      %109 = vector.load %arg7[%c0_63, %c0_64] : memref<1x16xf32, #tpu.memory_space<vmem>>, vector<1x16xf32>
      %110 = vector.broadcast %109 : vector<1x16xf32> to vector<8x16xf32>
      %111 = arith.addf %108, %110 : vector<8x16xf32>
      %c0_65 = arith.constant 0 : index
      %c0_66 = arith.constant 0 : index
      %112 = vector.load %arg5[%c0_65, %c0_66] : memref<8x12xf32, #tpu.memory_space<vmem>>, vector<8x12xf32>
      %c0_67 = arith.constant 0 : index
      %c0_68 = arith.constant 0 : index
      %113 = vector.load %arg8[%c0_67, %c0_68] : memref<12x16xf32, #tpu.memory_space<vmem>>, vector<12x16xf32>
      %cst_69 = arith.constant dense<0.000000e+00> : vector<8x16xf32>
      %114 = tpu.matmul %112, %113, %cst_69 {dimension_numbers = #tpu.dot_dimension_numbers<[1], [0], [0], [1], [0, 0, 1, 1], [], []>} : vector<8x12xf32>, vector<12x16xf32>, vector<8x16xf32> -> vector<8x16xf32>
      %c0_70 = arith.constant 0 : index
      %c0_71 = arith.constant 0 : index
      %115 = vector.load %arg9[%c0_70, %c0_71] : memref<1x16xf32, #tpu.memory_space<vmem>>, vector<1x16xf32>
      %116 = vector.broadcast %115 : vector<1x16xf32> to vector<8x16xf32>
      %117 = arith.addf %114, %116 : vector<8x16xf32>
      %c0_72 = arith.constant 0 : index
      %c0_73 = arith.constant 0 : index
      %118 = vector.load %arg20[%c0_72, %c0_73] : memref<8x16xf32, #tpu.memory_space<vmem>>, vector<8x16xf32>
      tpu.vector_store %arg20[%c0_72, %c0_73], %111 {strides = array<i32>} : memref<8x16xf32, #tpu.memory_space<vmem>>, vector<8x16xf32>,
      %c0_74 = arith.constant 0 : index
      %c0_75 = arith.constant 0 : index
      %119 = vector.load %arg21[%c0_74, %c0_75] : memref<8x16xf32, #tpu.memory_space<vmem>>, vector<8x16xf32>
      tpu.vector_store %arg21[%c0_74, %c0_75], %117 {strides = array<i32>} : memref<8x16xf32, #tpu.memory_space<vmem>>, vector<8x16xf32>,
      %c0_76 = arith.constant 0 : index
      %c0_77 = arith.constant 0 : index
      %c0_78 = arith.constant 0 : index
      %120 = vector.load %arg10[%c0_76, %c0_77, %c0_78] : memref<2x16x32xf32, #tpu.memory_space<vmem>>, vector<1x16x32xf32>
      %121 = vector.shape_cast %120 : vector<1x16x32xf32> to vector<16x32xf32>
      %cst_79 = arith.constant dense<0.000000e+00> : vector<8x32xf32>
      %122 = tpu.matmul %117, %121, %cst_79 {dimension_numbers = #tpu.dot_dimension_numbers<[1], [0], [0], [1], [0, 0, 1, 1], [], []>} : vector<8x16xf32>, vector<16x32xf32>, vector<8x32xf32> -> vector<8x32xf32>
      %123 = arith.truncf %122 : vector<8x32xf32> to vector<8x32xbf16>
      %c0_80 = arith.constant 0 : index
      %c0_81 = arith.constant 0 : index
      %c0_82 = arith.constant 0 : index
      %124 = vector.load %arg22[%c0_80, %c0_81, %c0_82] : memref<2x8x32xbf16, #tpu.memory_space<vmem>>, vector<1x8x32xbf16>
      %125 = vector.shape_cast %124 : vector<1x8x32xbf16> to vector<8x32xbf16>
      %126 = vector.shape_cast %123 : vector<8x32xbf16> to vector<1x8x32xbf16>
      tpu.vector_store %arg22[%c0_80, %c0_81, %c0_82], %126 {strides = array<i32>} : memref<2x8x32xbf16, #tpu.memory_space<vmem>>, vector<1x8x32xbf16>,
      %c0_83 = arith.constant 0 : index
      %c0_84 = arith.constant 0 : index
      %c0_85 = arith.constant 0 : index
      %127 = vector.load %arg11[%c0_83, %c0_84, %c0_85] : memref<2x16x32xf32, #tpu.memory_space<vmem>>, vector<1x16x32xf32>
      %128 = vector.shape_cast %127 : vector<1x16x32xf32> to vector<16x32xf32>
      %cst_86 = arith.constant dense<0.000000e+00> : vector<8x32xf32>
      %129 = tpu.matmul %111, %128, %cst_86 {dimension_numbers = #tpu.dot_dimension_numbers<[1], [0], [0], [1], [0, 0, 1, 1], [], []>} : vector<8x16xf32>, vector<16x32xf32>, vector<8x32xf32> -> vector<8x32xf32>
      %130 = arith.truncf %129 : vector<8x32xf32> to vector<8x32xbf16>
      %c0_87 = arith.constant 0 : index
      %c0_88 = arith.constant 0 : index
      %c0_89 = arith.constant 0 : index
      %131 = vector.load %arg23[%c0_87, %c0_88, %c0_89] : memref<2x8x32xbf16, #tpu.memory_space<vmem>>, vector<1x8x32xbf16>
      %132 = vector.shape_cast %131 : vector<1x8x32xbf16> to vector<8x32xbf16>
      %133 = vector.shape_cast %130 : vector<8x32xbf16> to vector<1x8x32xbf16>
      tpu.vector_store %arg23[%c0_87, %c0_88, %c0_89], %133 {strides = array<i32>} : memref<2x8x32xbf16, #tpu.memory_space<vmem>>, vector<1x8x32xbf16>,
      %c1_90 = arith.constant 1 : index
      %c0_91 = arith.constant 0 : index
      %c0_92 = arith.constant 0 : index
      %134 = vector.load %arg10[%c1_90, %c0_91, %c0_92] : memref<2x16x32xf32, #tpu.memory_space<vmem>>, vector<1x16x32xf32>
      %135 = vector.shape_cast %134 : vector<1x16x32xf32> to vector<16x32xf32>
      %cst_93 = arith.constant dense<0.000000e+00> : vector<8x32xf32>
      %136 = tpu.matmul %111, %135, %cst_93 {dimension_numbers = #tpu.dot_dimension_numbers<[1], [0], [0], [1], [0, 0, 1, 1], [], []>} : vector<8x16xf32>, vector<16x32xf32>, vector<8x32xf32> -> vector<8x32xf32>
      %137 = arith.truncf %136 : vector<8x32xf32> to vector<8x32xbf16>
      %c1_94 = arith.constant 1 : index
      %c0_95 = arith.constant 0 : index
      %c0_96 = arith.constant 0 : index
      %138 = vector.load %arg22[%c1_94, %c0_95, %c0_96] : memref<2x8x32xbf16, #tpu.memory_space<vmem>>, vector<1x8x32xbf16>
      %139 = vector.shape_cast %138 : vector<1x8x32xbf16> to vector<8x32xbf16>
      %140 = vector.shape_cast %137 : vector<8x32xbf16> to vector<1x8x32xbf16>
      tpu.vector_store %arg22[%c1_94, %c0_95, %c0_96], %140 {strides = array<i32>} : memref<2x8x32xbf16, #tpu.memory_space<vmem>>, vector<1x8x32xbf16>,
      %c1_97 = arith.constant 1 : index
      %c0_98 = arith.constant 0 : index
      %c0_99 = arith.constant 0 : index
      %141 = vector.load %arg11[%c1_97, %c0_98, %c0_99] : memref<2x16x32xf32, #tpu.memory_space<vmem>>, vector<1x16x32xf32>
      %142 = vector.shape_cast %141 : vector<1x16x32xf32> to vector<16x32xf32>
      %cst_100 = arith.constant dense<0.000000e+00> : vector<8x32xf32>
      %143 = tpu.matmul %117, %142, %cst_100 {dimension_numbers = #tpu.dot_dimension_numbers<[1], [0], [0], [1], [0, 0, 1, 1], [], []>} : vector<8x16xf32>, vector<16x32xf32>, vector<8x32xf32> -> vector<8x32xf32>
      %144 = arith.truncf %143 : vector<8x32xf32> to vector<8x32xbf16>
      %c1_101 = arith.constant 1 : index
      %c0_102 = arith.constant 0 : index
      %c0_103 = arith.constant 0 : index
      %145 = vector.load %arg23[%c1_101, %c0_102, %c0_103] : memref<2x8x32xbf16, #tpu.memory_space<vmem>>, vector<1x8x32xbf16>
      %146 = vector.shape_cast %145 : vector<1x8x32xbf16> to vector<8x32xbf16>
      %147 = vector.shape_cast %144 : vector<8x32xbf16> to vector<1x8x32xbf16>
      tpu.vector_store %arg23[%c1_101, %c0_102, %c0_103], %147 {strides = array<i32>} : memref<2x8x32xbf16, #tpu.memory_space<vmem>>, vector<1x8x32xbf16>,
      %cst_104 = arith.constant 0.000000e+00 : f32
      %148 = vector.broadcast %cst_104 : f32 to vector<8x32xf32>
      %c0_105 = arith.constant 0 : index
      %c0_106 = arith.constant 0 : index
      %149 = vector.load %arg24[%c0_105, %c0_106] : memref<8x32xf32, #tpu.memory_space<vmem>>, vector<8x32xf32>
      tpu.vector_store %arg24[%c0_105, %c0_106], %148 {strides = array<i32>} : memref<8x32xf32, #tpu.memory_space<vmem>>, vector<8x32xf32>,
    } else {
    }
    %c0 = arith.constant 0 : index
    %c0_1 = arith.constant 0 : index
    %3 = vector.load %arg3[%c0, %c0_1] : memref<16x64xf32, #tpu.memory_space<vmem>>, vector<16x64xf32>
    %4 = tpu.iota {dimensions = array<i32: 1>} : vector<16x8xi32>
    %c0_2 = arith.constant 0 : index
    %c0_3 = arith.constant 0 : index
    %c0_4 = arith.constant 0 : index
    %5 = vector.load %arg1[%c0_2, %c0_3, %c0_4] : memref<2x16x1xi32, #tpu.memory_space<vmem>>, vector<1x16x1xi32>
    %6 = vector.shape_cast %5 : vector<1x16x1xi32> to vector<16x1xi32>
    %c0_5 = arith.constant 0 : index
    %c0_6 = arith.constant 0 : index
    %c0_7 = arith.constant 0 : index
    %7 = vector.load %arg2[%c0_5, %c0_6, %c0_7] : memref<2x16x1xi32, #tpu.memory_space<vmem>>, vector<1x16x1xi32>
    %8 = vector.shape_cast %7 : vector<1x16x1xi32> to vector<16x1xi32>
    %9 = vector.broadcast %6 : vector<16x1xi32> to vector<16x8xi32>
    %10 = arith.cmpi eq, %4, %9 : vector<16x8xi32>
    %11 = arith.extui %10 : vector<16x8xi1> to vector<16x8xi32>
    %12 = arith.sitofp %11 : vector<16x8xi32> to vector<16x8xf32>
    %13 = arith.truncf %12 : vector<16x8xf32> to vector<16x8xbf16>
    %14 = vector.broadcast %8 : vector<16x1xi32> to vector<16x8xi32>
    %15 = arith.cmpi eq, %4, %14 : vector<16x8xi32>
    %16 = arith.extui %15 : vector<16x8xi1> to vector<16x8xi32>
    %17 = arith.sitofp %16 : vector<16x8xi32> to vector<16x8xf32>
    %18 = arith.truncf %17 : vector<16x8xf32> to vector<16x8xbf16>
    %c0_8 = arith.constant 0 : index
    %c0_9 = arith.constant 0 : index
    %c0_10 = arith.constant 0 : index
    %19 = vector.load %arg22[%c0_8, %c0_9, %c0_10] : memref<2x8x32xbf16, #tpu.memory_space<vmem>>, vector<1x8x32xbf16>
    %20 = vector.shape_cast %19 : vector<1x8x32xbf16> to vector<8x32xbf16>
    %cst = arith.constant dense<0.000000e+00> : vector<16x32xf32>
    %21 = tpu.matmul %13, %20, %cst {dimension_numbers = #tpu.dot_dimension_numbers<[1], [0], [0], [1], [0, 0, 1, 1], [], []>} : vector<16x8xbf16>, vector<8x32xbf16>, vector<16x32xf32> -> vector<16x32xf32>
    %c0_11 = arith.constant 0 : index
    %c0_12 = arith.constant 0 : index
    %c0_13 = arith.constant 0 : index
    %22 = vector.load %arg23[%c0_11, %c0_12, %c0_13] : memref<2x8x32xbf16, #tpu.memory_space<vmem>>, vector<1x8x32xbf16>
    %23 = vector.shape_cast %22 : vector<1x8x32xbf16> to vector<8x32xbf16>
    %cst_14 = arith.constant dense<0.000000e+00> : vector<16x32xf32>
    %24 = tpu.matmul %18, %23, %cst_14 {dimension_numbers = #tpu.dot_dimension_numbers<[1], [0], [0], [1], [0, 0, 1, 1], [], []>} : vector<16x8xbf16>, vector<8x32xbf16>, vector<16x32xf32> -> vector<16x32xf32>
    %25 = arith.addf %21, %24 : vector<16x32xf32>
    %c0_15 = arith.constant 0 : index
    %c0_16 = arith.constant 0 : index
    %c0_17 = arith.constant 0 : index
    %26 = vector.load %arg12[%c0_15, %c0_16, %c0_17] : memref<2x64x32xf32, #tpu.memory_space<vmem>>, vector<1x64x32xf32>
    %27 = vector.shape_cast %26 : vector<1x64x32xf32> to vector<64x32xf32>
    %cst_18 = arith.constant dense<0.000000e+00> : vector<16x32xf32>
    %28 = tpu.matmul %3, %27, %cst_18 {dimension_numbers = #tpu.dot_dimension_numbers<[1], [0], [0], [1], [0, 0, 1, 1], [], []>} : vector<16x64xf32>, vector<64x32xf32>, vector<16x32xf32> -> vector<16x32xf32>
    %29 = arith.addf %25, %28 : vector<16x32xf32>
    %c0_19 = arith.constant 0 : index
    %c0_20 = arith.constant 0 : index
    %c0_21 = arith.constant 0 : index
    %30 = vector.load %arg13[%c0_19, %c0_20, %c0_21] : memref<2x1x32xf32, #tpu.memory_space<vmem>>, vector<1x1x32xf32>
    %31 = vector.shape_cast %30 : vector<1x1x32xf32> to vector<1x32xf32>
    %32 = vector.broadcast %31 : vector<1x32xf32> to vector<16x32xf32>
    %33 = arith.addf %29, %32 : vector<16x32xf32>
    %34 = vector.extract_strided_slice %33 {offsets = [0, 0], sizes = [16, 16], strides = [1, 1]} : vector<16x32xf32> to vector<16x16xf32>
    %cst_22 = arith.constant 0.000000e+00 : f32
    %35 = vector.broadcast %cst_22 : f32 to vector<16x16xf32>
    %36 = arith.subf %35, %34 : vector<16x16xf32>
    %37 = math.exp %36 : vector<16x16xf32>
    %cst_23 = arith.constant 1.000000e+00 : f32
    %38 = vector.broadcast %cst_23 : f32 to vector<16x16xf32>
    %39 = arith.addf %38, %37 : vector<16x16xf32>
    %40 = tpu.reciprocal %39 {approx = true} : vector<16x16xf32> -> vector<16x16xf32>
    %41 = vector.extract_strided_slice %33 {offsets = [0, 16], sizes = [16, 16], strides = [1, 1]} : vector<16x32xf32> to vector<16x16xf32>
    %cst_24 = arith.constant 2.000000e+01 : f32
    %42 = vector.broadcast %cst_24 : f32 to vector<16x16xf32>
    %43 = arith.cmpf ogt, %41, %42 : vector<16x16xf32>
    %cst_25 = arith.constant 2.000000e+01 : f32
    %44 = vector.broadcast %cst_25 : f32 to vector<16x16xf32>
    %45 = arith.minimumf %41, %44 : vector<16x16xf32>
    %46 = math.exp %45 : vector<16x16xf32>
    %47 = math.log1p %46 : vector<16x16xf32>
    %48 = arith.select %43, %41, %47 : vector<16x16xi1>, vector<16x16xf32>
    %49 = arith.mulf %40, %48 : vector<16x16xf32>
    %50 = arith.truncf %49 : vector<16x16xf32> to vector<16x16xbf16>
    %cst_26 = arith.constant dense<0.000000e+00> : vector<8x16xf32>
    %51 = tpu.matmul %13, %50, %cst_26 {dimension_numbers = #tpu.dot_dimension_numbers<[0], [0], [1], [1], [0, 1, 1, 1], [], []>} : vector<16x8xbf16>, vector<16x16xbf16>, vector<8x16xf32> -> vector<8x16xf32>
    %c1 = arith.constant 1 : index
    %c0_27 = arith.constant 0 : index
    %c0_28 = arith.constant 0 : index
    %52 = vector.load %arg1[%c1, %c0_27, %c0_28] : memref<2x16x1xi32, #tpu.memory_space<vmem>>, vector<1x16x1xi32>
    %53 = vector.shape_cast %52 : vector<1x16x1xi32> to vector<16x1xi32>
    %c1_29 = arith.constant 1 : index
    %c0_30 = arith.constant 0 : index
    %c0_31 = arith.constant 0 : index
    %54 = vector.load %arg2[%c1_29, %c0_30, %c0_31] : memref<2x16x1xi32, #tpu.memory_space<vmem>>, vector<1x16x1xi32>
    %55 = vector.shape_cast %54 : vector<1x16x1xi32> to vector<16x1xi32>
    %56 = vector.broadcast %53 : vector<16x1xi32> to vector<16x8xi32>
    %57 = arith.cmpi eq, %4, %56 : vector<16x8xi32>
    %58 = arith.extui %57 : vector<16x8xi1> to vector<16x8xi32>
    %59 = arith.sitofp %58 : vector<16x8xi32> to vector<16x8xf32>
    %60 = arith.truncf %59 : vector<16x8xf32> to vector<16x8xbf16>
    %61 = vector.broadcast %55 : vector<16x1xi32> to vector<16x8xi32>
    %62 = arith.cmpi eq, %4, %61 : vector<16x8xi32>
    %63 = arith.extui %62 : vector<16x8xi1> to vector<16x8xi32>
    %64 = arith.sitofp %63 : vector<16x8xi32> to vector<16x8xf32>
    %65 = arith.truncf %64 : vector<16x8xf32> to vector<16x8xbf16>
    %c1_32 = arith.constant 1 : index
    %c0_33 = arith.constant 0 : index
    %c0_34 = arith.constant 0 : index
    %66 = vector.load %arg22[%c1_32, %c0_33, %c0_34] : memref<2x8x32xbf16, #tpu.memory_space<vmem>>, vector<1x8x32xbf16>
    %67 = vector.shape_cast %66 : vector<1x8x32xbf16> to vector<8x32xbf16>
    %cst_35 = arith.constant dense<0.000000e+00> : vector<16x32xf32>
    %68 = tpu.matmul %60, %67, %cst_35 {dimension_numbers = #tpu.dot_dimension_numbers<[1], [0], [0], [1], [0, 0, 1, 1], [], []>} : vector<16x8xbf16>, vector<8x32xbf16>, vector<16x32xf32> -> vector<16x32xf32>
    %c1_36 = arith.constant 1 : index
    %c0_37 = arith.constant 0 : index
    %c0_38 = arith.constant 0 : index
    %69 = vector.load %arg23[%c1_36, %c0_37, %c0_38] : memref<2x8x32xbf16, #tpu.memory_space<vmem>>, vector<1x8x32xbf16>
    %70 = vector.shape_cast %69 : vector<1x8x32xbf16> to vector<8x32xbf16>
    %cst_39 = arith.constant dense<0.000000e+00> : vector<16x32xf32>
    %71 = tpu.matmul %65, %70, %cst_39 {dimension_numbers = #tpu.dot_dimension_numbers<[1], [0], [0], [1], [0, 0, 1, 1], [], []>} : vector<16x8xbf16>, vector<8x32xbf16>, vector<16x32xf32> -> vector<16x32xf32>
    %72 = arith.addf %68, %71 : vector<16x32xf32>
    %c1_40 = arith.constant 1 : index
    %c0_41 = arith.constant 0 : index
    %c0_42 = arith.constant 0 : index
    %73 = vector.load %arg12[%c1_40, %c0_41, %c0_42] : memref<2x64x32xf32, #tpu.memory_space<vmem>>, vector<1x64x32xf32>
    %74 = vector.shape_cast %73 : vector<1x64x32xf32> to vector<64x32xf32>
    %cst_43 = arith.constant dense<0.000000e+00> : vector<16x32xf32>
    %75 = tpu.matmul %3, %74, %cst_43 {dimension_numbers = #tpu.dot_dimension_numbers<[1], [0], [0], [1], [0, 0, 1, 1], [], []>} : vector<16x64xf32>, vector<64x32xf32>, vector<16x32xf32> -> vector<16x32xf32>
    %76 = arith.addf %72, %75 : vector<16x32xf32>
    %c1_44 = arith.constant 1 : index
    %c0_45 = arith.constant 0 : index
    %c0_46 = arith.constant 0 : index
    %77 = vector.load %arg13[%c1_44, %c0_45, %c0_46] : memref<2x1x32xf32, #tpu.memory_space<vmem>>, vector<1x1x32xf32>
    %78 = vector.shape_cast %77 : vector<1x1x32xf32> to vector<1x32xf32>
    %79 = vector.broadcast %78 : vector<1x32xf32> to vector<16x32xf32>
    %80 = arith.addf %76, %79 : vector<16x32xf32>
    %81 = vector.extract_strided_slice %80 {offsets = [0, 0], sizes = [16, 16], strides = [1, 1]} : vector<16x32xf32> to vector<16x16xf32>
    %cst_47 = arith.constant 0.000000e+00 : f32
    %82 = vector.broadcast %cst_47 : f32 to vector<16x16xf32>
    %83 = arith.subf %82, %81 : vector<16x16xf32>
    %84 = math.exp %83 : vector<16x16xf32>
    %cst_48 = arith.constant 1.000000e+00 : f32
    %85 = vector.broadcast %cst_48 : f32 to vector<16x16xf32>
    %86 = arith.addf %85, %84 : vector<16x16xf32>
    %87 = tpu.reciprocal %86 {approx = true} : vector<16x16xf32> -> vector<16x16xf32>
    %88 = vector.extract_strided_slice %80 {offsets = [0, 16], sizes = [16, 16], strides = [1, 1]} : vector<16x32xf32> to vector<16x16xf32>
    %cst_49 = arith.constant 2.000000e+01 : f32
    %89 = vector.broadcast %cst_49 : f32 to vector<16x16xf32>
    %90 = arith.cmpf ogt, %88, %89 : vector<16x16xf32>
    %cst_50 = arith.constant 2.000000e+01 : f32
    %91 = vector.broadcast %cst_50 : f32 to vector<16x16xf32>
    %92 = arith.minimumf %88, %91 : vector<16x16xf32>
    %93 = math.exp %92 : vector<16x16xf32>
    %94 = math.log1p %93 : vector<16x16xf32>
    %95 = arith.select %90, %88, %94 : vector<16x16xi1>, vector<16x16xf32>
    %96 = arith.mulf %87, %95 : vector<16x16xf32>
    %97 = arith.truncf %96 : vector<16x16xf32> to vector<16x16xbf16>
    %cst_51 = arith.constant dense<0.000000e+00> : vector<8x16xf32>
    %98 = tpu.matmul %60, %97, %cst_51 {dimension_numbers = #tpu.dot_dimension_numbers<[0], [0], [1], [1], [0, 1, 1, 1], [], []>} : vector<16x8xbf16>, vector<16x16xbf16>, vector<8x16xf32> -> vector<8x16xf32>
    %c0_52 = arith.constant 0 : index
    %c0_53 = arith.constant 0 : index
    %99 = vector.load %arg24[%c0_52, %c0_53] : memref<8x32xf32, #tpu.memory_space<vmem>>, vector<8x32xf32>
    %100 = tpu.concatenate %51, %98 in 1 : vector<8x16xf32>, vector<8x16xf32> -> vector<8x32xf32>
    %101 = arith.addf %99, %100 : vector<8x32xf32>
    %c0_54 = arith.constant 0 : index
    %c0_55 = arith.constant 0 : index
    %102 = vector.load %arg24[%c0_54, %c0_55] : memref<8x32xf32, #tpu.memory_space<vmem>>, vector<8x32xf32>
    tpu.vector_store %arg24[%c0_54, %c0_55], %101 {strides = array<i32>} : memref<8x32xf32, #tpu.memory_space<vmem>>, vector<8x32xf32>,
    %c0_i32_56 = arith.constant 0 : i32
    %103 = arith.cmpi eq, %arg0, %c0_i32_56 : i32
    %104 = arith.extui %103 : i1 to i32
    %c0_i32_57 = arith.constant 0 : i32
    %105 = arith.cmpi ne, %104, %c0_i32_57 : i32
    scf.if %105 {
      %c0_58 = arith.constant 0 : index
      %c0_59 = arith.constant 0 : index
      %106 = vector.load %arg24[%c0_58, %c0_59] : memref<8x32xf32, #tpu.memory_space<vmem>>, vector<8x32xf32>
      %c0_60 = arith.constant 0 : index
      %c0_61 = arith.constant 0 : index
      %107 = vector.load %arg18[%c0_60, %c0_61] : memref<8x32xf32, #tpu.memory_space<vmem>>, vector<8x32xf32>
      %108 = arith.mulf %106, %107 : vector<8x32xf32>
      %c0_62 = arith.constant 0 : index
      %c0_63 = arith.constant 0 : index
      %109 = vector.load %arg17[%c0_62, %c0_63] : memref<1x32xf32, #tpu.memory_space<vmem>>, vector<1x32xf32>
      %cst_64 = arith.constant 9.99999974E-6 : f32
      %110 = vector.broadcast %cst_64 : f32 to vector<1x32xf32>
      %111 = arith.addf %109, %110 : vector<1x32xf32>
      %112 = math.rsqrt %111 : vector<1x32xf32>
      %c0_65 = arith.constant 0 : index
      %c0_66 = arith.constant 0 : index
      %113 = vector.load %arg21[%c0_65, %c0_66] : memref<8x16xf32, #tpu.memory_space<vmem>>, vector<8x16xf32>
      %c0_67 = arith.constant 0 : index
      %c0_68 = arith.constant 0 : index
      %114 = vector.load %arg20[%c0_67, %c0_68] : memref<8x16xf32, #tpu.memory_space<vmem>>, vector<8x16xf32>
      %115 = tpu.concatenate %113, %114 in 1 : vector<8x16xf32>, vector<8x16xf32> -> vector<8x32xf32>
      %c0_69 = arith.constant 0 : index
      %c0_70 = arith.constant 0 : index
      %116 = vector.load %arg16[%c0_69, %c0_70] : memref<1x32xf32, #tpu.memory_space<vmem>>, vector<1x32xf32>
      %117 = vector.broadcast %116 : vector<1x32xf32> to vector<8x32xf32>
      %118 = arith.subf %108, %117 : vector<8x32xf32>
      %119 = vector.broadcast %112 : vector<1x32xf32> to vector<8x32xf32>
      %120 = arith.mulf %118, %119 : vector<8x32xf32>
      %c0_71 = arith.constant 0 : index
      %c0_72 = arith.constant 0 : index
      %121 = vector.load %arg14[%c0_71, %c0_72] : memref<1x32xf32, #tpu.memory_space<vmem>>, vector<1x32xf32>
      %122 = vector.broadcast %121 : vector<1x32xf32> to vector<8x32xf32>
      %123 = arith.mulf %120, %122 : vector<8x32xf32>
      %c0_73 = arith.constant 0 : index
      %c0_74 = arith.constant 0 : index
      %124 = vector.load %arg15[%c0_73, %c0_74] : memref<1x32xf32, #tpu.memory_space<vmem>>, vector<1x32xf32>
      %125 = vector.broadcast %124 : vector<1x32xf32> to vector<8x32xf32>
      %126 = arith.addf %123, %125 : vector<8x32xf32>
      %127 = arith.addf %126, %115 : vector<8x32xf32>
      %c0_75 = arith.constant 0 : index
      %c0_76 = arith.constant 0 : index
      %128 = vector.load %arg19[%c0_75, %c0_76] : memref<8x32xf32, #tpu.memory_space<vmem>>, vector<8x32xf32>
      tpu.vector_store %arg19[%c0_75, %c0_76], %127 {strides = array<i32>} : memref<8x32xf32, #tpu.memory_space<vmem>>, vector<8x32xf32>,
    } else {
    }
    return
  }
  func.func @transform_0(%arg0: i32) -> (i32, i32, i32) {
    %c0_i32 = arith.constant 0 : i32
    %c0_i32_0 = arith.constant 0 : i32
    %c0_i32_1 = arith.constant 0 : i32
    return %c0_i32, %arg0, %c0_i32_0 : i32, i32, i32
  }
  func.func @transform_1(%arg0: i32) -> (i32, i32, i32) {
    %c0_i32 = arith.constant 0 : i32
    %c0_i32_0 = arith.constant 0 : i32
    %c0_i32_1 = arith.constant 0 : i32
    return %c0_i32, %arg0, %c0_i32_0 : i32, i32, i32
  }
  func.func @transform_2(%arg0: i32) -> (i32, i32) {
    %c0_i32 = arith.constant 0 : i32
    %c0_i32_0 = arith.constant 0 : i32
    return %arg0, %c0_i32 : i32, i32
  }
  func.func @transform_3(%arg0: i32) -> (i32, i32) {
    %c0_i32 = arith.constant 0 : i32
    %c0_i32_0 = arith.constant 0 : i32
    %c0_i32_1 = arith.constant 0 : i32
    return %c0_i32, %c0_i32_0 : i32, i32
  }
  func.func @transform_4(%arg0: i32) -> (i32, i32) {
    %c0_i32 = arith.constant 0 : i32
    %c0_i32_0 = arith.constant 0 : i32
    %c0_i32_1 = arith.constant 0 : i32
    return %c0_i32, %c0_i32_0 : i32, i32
  }
  func.func @transform_5(%arg0: i32) -> (i32, i32) {
    %c0_i32 = arith.constant 0 : i32
    %c0_i32_0 = arith.constant 0 : i32
    %c0_i32_1 = arith.constant 0 : i32
    return %c0_i32, %c0_i32_0 : i32, i32
  }
  func.func @transform_6(%arg0: i32) -> (i32, i32) {
    %c0_i32 = arith.constant 0 : i32
    %c0_i32_0 = arith.constant 0 : i32
    %c0_i32_1 = arith.constant 0 : i32
    return %c0_i32, %c0_i32_0 : i32, i32
  }
  func.func @transform_7(%arg0: i32) -> (i32, i32) {
    %c0_i32 = arith.constant 0 : i32
    %c0_i32_0 = arith.constant 0 : i32
    %c0_i32_1 = arith.constant 0 : i32
    return %c0_i32, %c0_i32_0 : i32, i32
  }
  func.func @transform_8(%arg0: i32) -> (i32, i32) {
    %c0_i32 = arith.constant 0 : i32
    %c0_i32_0 = arith.constant 0 : i32
    %c0_i32_1 = arith.constant 0 : i32
    return %c0_i32, %c0_i32_0 : i32, i32
  }
  func.func @transform_9(%arg0: i32) -> (i32, i32, i32) {
    %c0_i32 = arith.constant 0 : i32
    %c0_i32_0 = arith.constant 0 : i32
    %c0_i32_1 = arith.constant 0 : i32
    %c0_i32_2 = arith.constant 0 : i32
    return %c0_i32, %c0_i32_0, %c0_i32_1 : i32, i32, i32
  }
  func.func @transform_10(%arg0: i32) -> (i32, i32, i32) {
    %c0_i32 = arith.constant 0 : i32
    %c0_i32_0 = arith.constant 0 : i32
    %c0_i32_1 = arith.constant 0 : i32
    %c0_i32_2 = arith.constant 0 : i32
    return %c0_i32, %c0_i32_0, %c0_i32_1 : i32, i32, i32
  }
  func.func @transform_11(%arg0: i32) -> (i32, i32, i32) {
    %c0_i32 = arith.constant 0 : i32
    %c0_i32_0 = arith.constant 0 : i32
    %c0_i32_1 = arith.constant 0 : i32
    %c0_i32_2 = arith.constant 0 : i32
    return %c0_i32, %c0_i32_0, %c0_i32_1 : i32, i32, i32
  }
  func.func @transform_12(%arg0: i32) -> (i32, i32, i32) {
    %c0_i32 = arith.constant 0 : i32
    %c0_i32_0 = arith.constant 0 : i32
    %c0_i32_1 = arith.constant 0 : i32
    %c0_i32_2 = arith.constant 0 : i32
    return %c0_i32, %c0_i32_0, %c0_i32_1 : i32, i32, i32
  }
  func.func @transform_13(%arg0: i32) -> (i32, i32) {
    %c0_i32 = arith.constant 0 : i32
    %c0_i32_0 = arith.constant 0 : i32
    %c0_i32_1 = arith.constant 0 : i32
    return %c0_i32, %c0_i32_0 : i32, i32
  }
  func.func @transform_14(%arg0: i32) -> (i32, i32) {
    %c0_i32 = arith.constant 0 : i32
    %c0_i32_0 = arith.constant 0 : i32
    %c0_i32_1 = arith.constant 0 : i32
    return %c0_i32, %c0_i32_0 : i32, i32
  }
  func.func @transform_15(%arg0: i32) -> (i32, i32) {
    %c0_i32 = arith.constant 0 : i32
    %c0_i32_0 = arith.constant 0 : i32
    %c0_i32_1 = arith.constant 0 : i32
    return %c0_i32, %c0_i32_0 : i32, i32
  }
  func.func @transform_16(%arg0: i32) -> (i32, i32) {
    %c0_i32 = arith.constant 0 : i32
    %c0_i32_0 = arith.constant 0 : i32
    %c0_i32_1 = arith.constant 0 : i32
    return %c0_i32, %c0_i32_0 : i32, i32
  }
  func.func @transform_17(%arg0: i32) -> (i32, i32) {
    %c0_i32 = arith.constant 0 : i32
    %c0_i32_0 = arith.constant 0 : i32
    %c0_i32_1 = arith.constant 0 : i32
    return %c0_i32, %c0_i32_0 : i32, i32
  }
  func.func @transform_18(%arg0: i32) -> (i32, i32) {
    %c0_i32 = arith.constant 0 : i32
    %c0_i32_0 = arith.constant 0 : i32
    %c0_i32_1 = arith.constant 0 : i32
    return %c0_i32, %c0_i32_0 : i32, i32
  }
}

module attributes {stable_mosaic.version = 11 : i64} {
  func.func @_cgconv_pair_kernel(%arg0: i32, %arg1: memref<2x16x1xi32, #tpu.memory_space<vmem>>, %arg2: memref<2x16x1xi32, #tpu.memory_space<vmem>>, %arg3: memref<16x64xf32, #tpu.memory_space<vmem>>, %arg4: memref<8x16xf32, #tpu.memory_space<vmem>>, %arg5: memref<8x16xf32, #tpu.memory_space<vmem>>, %arg6: memref<16x16xf32, #tpu.memory_space<vmem>>, %arg7: memref<1x16xf32, #tpu.memory_space<vmem>>, %arg8: memref<16x16xf32, #tpu.memory_space<vmem>>, %arg9: memref<1x16xf32, #tpu.memory_space<vmem>>, %arg10: memref<2x16x32xf32, #tpu.memory_space<vmem>>, %arg11: memref<2x16x32xf32, #tpu.memory_space<vmem>>, %arg12: memref<2x64x32xf32, #tpu.memory_space<vmem>>, %arg13: memref<2x1x32xf32, #tpu.memory_space<vmem>>, %arg14: memref<1x32xf32, #tpu.memory_space<vmem>>, %arg15: memref<1x32xf32, #tpu.memory_space<vmem>>, %arg16: memref<1x32xf32, #tpu.memory_space<vmem>>, %arg17: memref<1x32xf32, #tpu.memory_space<vmem>>, %arg18: memref<8x32xf32, #tpu.memory_space<vmem>>, %arg19: memref<8x32xf32, #tpu.memory_space<vmem>>, %arg20: memref<8x16xf32, #tpu.memory_space<vmem>>, %arg21: memref<8x16xf32, #tpu.memory_space<vmem>>, %arg22: memref<2x8x32xbf16, #tpu.memory_space<vmem>>, %arg23: memref<2x8x32xbf16, #tpu.memory_space<vmem>>, %arg24: memref<8x32xf32, #tpu.memory_space<vmem>>) attributes {dimension_semantics = [#tpu.dimension_semantics<arbitrary>], iteration_bounds = array<i64: 1>, scalar_prefetch = 0 : i64, scratch_operands = 5 : i64, tpu.core_type = #tpu.core_type<tc>, window_params = [{transform_indices = @transform_0, window_bounds = array<i64: 2, 16, 1>}, {transform_indices = @transform_1, window_bounds = array<i64: 2, 16, 1>}, {transform_indices = @transform_2, window_bounds = array<i64: 16, 64>}, {pipeline_mode = #tpu.pipeline_mode<synchronous>, transform_indices = @transform_3, window_bounds = array<i64: 8, 16>}, {pipeline_mode = #tpu.pipeline_mode<synchronous>, transform_indices = @transform_4, window_bounds = array<i64: 8, 16>}, {pipeline_mode = #tpu.pipeline_mode<synchronous>, transform_indices = @transform_5, window_bounds = array<i64: 16, 16>}, {pipeline_mode = #tpu.pipeline_mode<synchronous>, transform_indices = @transform_6, window_bounds = array<i64: 1, 16>}, {pipeline_mode = #tpu.pipeline_mode<synchronous>, transform_indices = @transform_7, window_bounds = array<i64: 16, 16>}, {pipeline_mode = #tpu.pipeline_mode<synchronous>, transform_indices = @transform_8, window_bounds = array<i64: 1, 16>}, {pipeline_mode = #tpu.pipeline_mode<synchronous>, transform_indices = @transform_9, window_bounds = array<i64: 2, 16, 32>}, {pipeline_mode = #tpu.pipeline_mode<synchronous>, transform_indices = @transform_10, window_bounds = array<i64: 2, 16, 32>}, {pipeline_mode = #tpu.pipeline_mode<synchronous>, transform_indices = @transform_11, window_bounds = array<i64: 2, 64, 32>}, {pipeline_mode = #tpu.pipeline_mode<synchronous>, transform_indices = @transform_12, window_bounds = array<i64: 2, 1, 32>}, {pipeline_mode = #tpu.pipeline_mode<synchronous>, transform_indices = @transform_13, window_bounds = array<i64: 1, 32>}, {pipeline_mode = #tpu.pipeline_mode<synchronous>, transform_indices = @transform_14, window_bounds = array<i64: 1, 32>}, {pipeline_mode = #tpu.pipeline_mode<synchronous>, transform_indices = @transform_15, window_bounds = array<i64: 1, 32>}, {pipeline_mode = #tpu.pipeline_mode<synchronous>, transform_indices = @transform_16, window_bounds = array<i64: 1, 32>}, {pipeline_mode = #tpu.pipeline_mode<synchronous>, transform_indices = @transform_17, window_bounds = array<i64: 8, 32>}, {pipeline_mode = #tpu.pipeline_mode<synchronous>, transform_indices = @transform_18, window_bounds = array<i64: 8, 32>}]} {
    %c0_i32 = arith.constant 0 : i32
    %0 = arith.cmpi eq, %arg0, %c0_i32 : i32
    %1 = arith.extui %0 : i1 to i32
    %c0_i32_0 = arith.constant 0 : i32
    %2 = arith.cmpi ne, %1, %c0_i32_0 : i32
    scf.if %2 {
      %c0_58 = arith.constant 0 : index
      %c0_59 = arith.constant 0 : index
      %106 = vector.load %arg4[%c0_58, %c0_59] : memref<8x16xf32, #tpu.memory_space<vmem>>, vector<8x16xf32>
      %c0_60 = arith.constant 0 : index
      %c0_61 = arith.constant 0 : index
      %107 = vector.load %arg6[%c0_60, %c0_61] : memref<16x16xf32, #tpu.memory_space<vmem>>, vector<16x16xf32>
      %cst_62 = arith.constant dense<0.000000e+00> : vector<8x16xf32>
      %108 = tpu.matmul %106, %107, %cst_62 {dimension_numbers = #tpu.dot_dimension_numbers<[1], [0], [0], [1], [0, 0, 1, 1], [], []>} : vector<8x16xf32>, vector<16x16xf32>, vector<8x16xf32> -> vector<8x16xf32>
      %c0_63 = arith.constant 0 : index
      %c0_64 = arith.constant 0 : index
      %109 = vector.load %arg7[%c0_63, %c0_64] : memref<1x16xf32, #tpu.memory_space<vmem>>, vector<1x16xf32>
      %110 = vector.broadcast %109 : vector<1x16xf32> to vector<8x16xf32>
      %111 = arith.addf %108, %110 : vector<8x16xf32>
      %c0_65 = arith.constant 0 : index
      %c0_66 = arith.constant 0 : index
      %112 = vector.load %arg5[%c0_65, %c0_66] : memref<8x16xf32, #tpu.memory_space<vmem>>, vector<8x16xf32>
      %c0_67 = arith.constant 0 : index
      %c0_68 = arith.constant 0 : index
      %113 = vector.load %arg8[%c0_67, %c0_68] : memref<16x16xf32, #tpu.memory_space<vmem>>, vector<16x16xf32>
      %cst_69 = arith.constant dense<0.000000e+00> : vector<8x16xf32>
      %114 = tpu.matmul %112, %113, %cst_69 {dimension_numbers = #tpu.dot_dimension_numbers<[1], [0], [0], [1], [0, 0, 1, 1], [], []>} : vector<8x16xf32>, vector<16x16xf32>, vector<8x16xf32> -> vector<8x16xf32>
      %c0_70 = arith.constant 0 : index
      %c0_71 = arith.constant 0 : index
      %115 = vector.load %arg9[%c0_70, %c0_71] : memref<1x16xf32, #tpu.memory_space<vmem>>, vector<1x16xf32>
      %116 = vector.broadcast %115 : vector<1x16xf32> to vector<8x16xf32>
      %117 = arith.addf %114, %116 : vector<8x16xf32>
      %c0_72 = arith.constant 0 : index
      %c0_73 = arith.constant 0 : index
      %118 = vector.load %arg20[%c0_72, %c0_73] : memref<8x16xf32, #tpu.memory_space<vmem>>, vector<8x16xf32>
      tpu.vector_store %arg20[%c0_72, %c0_73], %111 {strides = array<i32>} : memref<8x16xf32, #tpu.memory_space<vmem>>, vector<8x16xf32>,
      %c0_74 = arith.constant 0 : index
      %c0_75 = arith.constant 0 : index
      %119 = vector.load %arg21[%c0_74, %c0_75] : memref<8x16xf32, #tpu.memory_space<vmem>>, vector<8x16xf32>
      tpu.vector_store %arg21[%c0_74, %c0_75], %117 {strides = array<i32>} : memref<8x16xf32, #tpu.memory_space<vmem>>, vector<8x16xf32>,
      %c0_76 = arith.constant 0 : index
      %c0_77 = arith.constant 0 : index
      %c0_78 = arith.constant 0 : index
      %120 = vector.load %arg10[%c0_76, %c0_77, %c0_78] : memref<2x16x32xf32, #tpu.memory_space<vmem>>, vector<1x16x32xf32>
      %121 = vector.shape_cast %120 : vector<1x16x32xf32> to vector<16x32xf32>
      %cst_79 = arith.constant dense<0.000000e+00> : vector<8x32xf32>
      %122 = tpu.matmul %117, %121, %cst_79 {dimension_numbers = #tpu.dot_dimension_numbers<[1], [0], [0], [1], [0, 0, 1, 1], [], []>} : vector<8x16xf32>, vector<16x32xf32>, vector<8x32xf32> -> vector<8x32xf32>
      %123 = arith.truncf %122 : vector<8x32xf32> to vector<8x32xbf16>
      %c0_80 = arith.constant 0 : index
      %c0_81 = arith.constant 0 : index
      %c0_82 = arith.constant 0 : index
      %124 = vector.load %arg22[%c0_80, %c0_81, %c0_82] : memref<2x8x32xbf16, #tpu.memory_space<vmem>>, vector<1x8x32xbf16>
      %125 = vector.shape_cast %124 : vector<1x8x32xbf16> to vector<8x32xbf16>
      %126 = vector.shape_cast %123 : vector<8x32xbf16> to vector<1x8x32xbf16>
      tpu.vector_store %arg22[%c0_80, %c0_81, %c0_82], %126 {strides = array<i32>} : memref<2x8x32xbf16, #tpu.memory_space<vmem>>, vector<1x8x32xbf16>,
      %c0_83 = arith.constant 0 : index
      %c0_84 = arith.constant 0 : index
      %c0_85 = arith.constant 0 : index
      %127 = vector.load %arg11[%c0_83, %c0_84, %c0_85] : memref<2x16x32xf32, #tpu.memory_space<vmem>>, vector<1x16x32xf32>
      %128 = vector.shape_cast %127 : vector<1x16x32xf32> to vector<16x32xf32>
      %cst_86 = arith.constant dense<0.000000e+00> : vector<8x32xf32>
      %129 = tpu.matmul %111, %128, %cst_86 {dimension_numbers = #tpu.dot_dimension_numbers<[1], [0], [0], [1], [0, 0, 1, 1], [], []>} : vector<8x16xf32>, vector<16x32xf32>, vector<8x32xf32> -> vector<8x32xf32>
      %130 = arith.truncf %129 : vector<8x32xf32> to vector<8x32xbf16>
      %c0_87 = arith.constant 0 : index
      %c0_88 = arith.constant 0 : index
      %c0_89 = arith.constant 0 : index
      %131 = vector.load %arg23[%c0_87, %c0_88, %c0_89] : memref<2x8x32xbf16, #tpu.memory_space<vmem>>, vector<1x8x32xbf16>
      %132 = vector.shape_cast %131 : vector<1x8x32xbf16> to vector<8x32xbf16>
      %133 = vector.shape_cast %130 : vector<8x32xbf16> to vector<1x8x32xbf16>
      tpu.vector_store %arg23[%c0_87, %c0_88, %c0_89], %133 {strides = array<i32>} : memref<2x8x32xbf16, #tpu.memory_space<vmem>>, vector<1x8x32xbf16>,
      %c1_90 = arith.constant 1 : index
      %c0_91 = arith.constant 0 : index
      %c0_92 = arith.constant 0 : index
      %134 = vector.load %arg10[%c1_90, %c0_91, %c0_92] : memref<2x16x32xf32, #tpu.memory_space<vmem>>, vector<1x16x32xf32>
      %135 = vector.shape_cast %134 : vector<1x16x32xf32> to vector<16x32xf32>
      %cst_93 = arith.constant dense<0.000000e+00> : vector<8x32xf32>
      %136 = tpu.matmul %111, %135, %cst_93 {dimension_numbers = #tpu.dot_dimension_numbers<[1], [0], [0], [1], [0, 0, 1, 1], [], []>} : vector<8x16xf32>, vector<16x32xf32>, vector<8x32xf32> -> vector<8x32xf32>
      %137 = arith.truncf %136 : vector<8x32xf32> to vector<8x32xbf16>
      %c1_94 = arith.constant 1 : index
      %c0_95 = arith.constant 0 : index
      %c0_96 = arith.constant 0 : index
      %138 = vector.load %arg22[%c1_94, %c0_95, %c0_96] : memref<2x8x32xbf16, #tpu.memory_space<vmem>>, vector<1x8x32xbf16>
      %139 = vector.shape_cast %138 : vector<1x8x32xbf16> to vector<8x32xbf16>
      %140 = vector.shape_cast %137 : vector<8x32xbf16> to vector<1x8x32xbf16>
      tpu.vector_store %arg22[%c1_94, %c0_95, %c0_96], %140 {strides = array<i32>} : memref<2x8x32xbf16, #tpu.memory_space<vmem>>, vector<1x8x32xbf16>,
      %c1_97 = arith.constant 1 : index
      %c0_98 = arith.constant 0 : index
      %c0_99 = arith.constant 0 : index
      %141 = vector.load %arg11[%c1_97, %c0_98, %c0_99] : memref<2x16x32xf32, #tpu.memory_space<vmem>>, vector<1x16x32xf32>
      %142 = vector.shape_cast %141 : vector<1x16x32xf32> to vector<16x32xf32>
      %cst_100 = arith.constant dense<0.000000e+00> : vector<8x32xf32>
      %143 = tpu.matmul %117, %142, %cst_100 {dimension_numbers = #tpu.dot_dimension_numbers<[1], [0], [0], [1], [0, 0, 1, 1], [], []>} : vector<8x16xf32>, vector<16x32xf32>, vector<8x32xf32> -> vector<8x32xf32>
      %144 = arith.truncf %143 : vector<8x32xf32> to vector<8x32xbf16>
      %c1_101 = arith.constant 1 : index
      %c0_102 = arith.constant 0 : index
      %c0_103 = arith.constant 0 : index
      %145 = vector.load %arg23[%c1_101, %c0_102, %c0_103] : memref<2x8x32xbf16, #tpu.memory_space<vmem>>, vector<1x8x32xbf16>
      %146 = vector.shape_cast %145 : vector<1x8x32xbf16> to vector<8x32xbf16>
      %147 = vector.shape_cast %144 : vector<8x32xbf16> to vector<1x8x32xbf16>
      tpu.vector_store %arg23[%c1_101, %c0_102, %c0_103], %147 {strides = array<i32>} : memref<2x8x32xbf16, #tpu.memory_space<vmem>>, vector<1x8x32xbf16>,
      %cst_104 = arith.constant 0.000000e+00 : f32
      %148 = vector.broadcast %cst_104 : f32 to vector<8x32xf32>
      %c0_105 = arith.constant 0 : index
      %c0_106 = arith.constant 0 : index
      %149 = vector.load %arg24[%c0_105, %c0_106] : memref<8x32xf32, #tpu.memory_space<vmem>>, vector<8x32xf32>
      tpu.vector_store %arg24[%c0_105, %c0_106], %148 {strides = array<i32>} : memref<8x32xf32, #tpu.memory_space<vmem>>, vector<8x32xf32>,
    } else {
    }
    %c0 = arith.constant 0 : index
    %c0_1 = arith.constant 0 : index
    %3 = vector.load %arg3[%c0, %c0_1] : memref<16x64xf32, #tpu.memory_space<vmem>>, vector<16x64xf32>
    %4 = tpu.iota {dimensions = array<i32: 1>} : vector<16x8xi32>
    %c0_2 = arith.constant 0 : index
    %c0_3 = arith.constant 0 : index
    %c0_4 = arith.constant 0 : index
    %5 = vector.load %arg1[%c0_2, %c0_3, %c0_4] : memref<2x16x1xi32, #tpu.memory_space<vmem>>, vector<1x16x1xi32>
    %6 = vector.shape_cast %5 : vector<1x16x1xi32> to vector<16x1xi32>
    %c0_5 = arith.constant 0 : index
    %c0_6 = arith.constant 0 : index
    %c0_7 = arith.constant 0 : index
    %7 = vector.load %arg2[%c0_5, %c0_6, %c0_7] : memref<2x16x1xi32, #tpu.memory_space<vmem>>, vector<1x16x1xi32>
    %8 = vector.shape_cast %7 : vector<1x16x1xi32> to vector<16x1xi32>
    %9 = vector.broadcast %6 : vector<16x1xi32> to vector<16x8xi32>
    %10 = arith.cmpi eq, %4, %9 : vector<16x8xi32>
    %11 = arith.extui %10 : vector<16x8xi1> to vector<16x8xi32>
    %12 = arith.sitofp %11 : vector<16x8xi32> to vector<16x8xf32>
    %13 = arith.truncf %12 : vector<16x8xf32> to vector<16x8xbf16>
    %14 = vector.broadcast %8 : vector<16x1xi32> to vector<16x8xi32>
    %15 = arith.cmpi eq, %4, %14 : vector<16x8xi32>
    %16 = arith.extui %15 : vector<16x8xi1> to vector<16x8xi32>
    %17 = arith.sitofp %16 : vector<16x8xi32> to vector<16x8xf32>
    %18 = arith.truncf %17 : vector<16x8xf32> to vector<16x8xbf16>
    %c0_8 = arith.constant 0 : index
    %c0_9 = arith.constant 0 : index
    %c0_10 = arith.constant 0 : index
    %19 = vector.load %arg22[%c0_8, %c0_9, %c0_10] : memref<2x8x32xbf16, #tpu.memory_space<vmem>>, vector<1x8x32xbf16>
    %20 = vector.shape_cast %19 : vector<1x8x32xbf16> to vector<8x32xbf16>
    %cst = arith.constant dense<0.000000e+00> : vector<16x32xf32>
    %21 = tpu.matmul %13, %20, %cst {dimension_numbers = #tpu.dot_dimension_numbers<[1], [0], [0], [1], [0, 0, 1, 1], [], []>} : vector<16x8xbf16>, vector<8x32xbf16>, vector<16x32xf32> -> vector<16x32xf32>
    %c0_11 = arith.constant 0 : index
    %c0_12 = arith.constant 0 : index
    %c0_13 = arith.constant 0 : index
    %22 = vector.load %arg23[%c0_11, %c0_12, %c0_13] : memref<2x8x32xbf16, #tpu.memory_space<vmem>>, vector<1x8x32xbf16>
    %23 = vector.shape_cast %22 : vector<1x8x32xbf16> to vector<8x32xbf16>
    %cst_14 = arith.constant dense<0.000000e+00> : vector<16x32xf32>
    %24 = tpu.matmul %18, %23, %cst_14 {dimension_numbers = #tpu.dot_dimension_numbers<[1], [0], [0], [1], [0, 0, 1, 1], [], []>} : vector<16x8xbf16>, vector<8x32xbf16>, vector<16x32xf32> -> vector<16x32xf32>
    %25 = arith.addf %21, %24 : vector<16x32xf32>
    %c0_15 = arith.constant 0 : index
    %c0_16 = arith.constant 0 : index
    %c0_17 = arith.constant 0 : index
    %26 = vector.load %arg12[%c0_15, %c0_16, %c0_17] : memref<2x64x32xf32, #tpu.memory_space<vmem>>, vector<1x64x32xf32>
    %27 = vector.shape_cast %26 : vector<1x64x32xf32> to vector<64x32xf32>
    %cst_18 = arith.constant dense<0.000000e+00> : vector<16x32xf32>
    %28 = tpu.matmul %3, %27, %cst_18 {dimension_numbers = #tpu.dot_dimension_numbers<[1], [0], [0], [1], [0, 0, 1, 1], [], []>} : vector<16x64xf32>, vector<64x32xf32>, vector<16x32xf32> -> vector<16x32xf32>
    %29 = arith.addf %25, %28 : vector<16x32xf32>
    %c0_19 = arith.constant 0 : index
    %c0_20 = arith.constant 0 : index
    %c0_21 = arith.constant 0 : index
    %30 = vector.load %arg13[%c0_19, %c0_20, %c0_21] : memref<2x1x32xf32, #tpu.memory_space<vmem>>, vector<1x1x32xf32>
    %31 = vector.shape_cast %30 : vector<1x1x32xf32> to vector<1x32xf32>
    %32 = vector.broadcast %31 : vector<1x32xf32> to vector<16x32xf32>
    %33 = arith.addf %29, %32 : vector<16x32xf32>
    %34 = vector.extract_strided_slice %33 {offsets = [0, 0], sizes = [16, 16], strides = [1, 1]} : vector<16x32xf32> to vector<16x16xf32>
    %cst_22 = arith.constant 0.000000e+00 : f32
    %35 = vector.broadcast %cst_22 : f32 to vector<16x16xf32>
    %36 = arith.subf %35, %34 : vector<16x16xf32>
    %37 = math.exp %36 : vector<16x16xf32>
    %cst_23 = arith.constant 1.000000e+00 : f32
    %38 = vector.broadcast %cst_23 : f32 to vector<16x16xf32>
    %39 = arith.addf %38, %37 : vector<16x16xf32>
    %40 = tpu.reciprocal %39 {approx = true} : vector<16x16xf32> -> vector<16x16xf32>
    %41 = vector.extract_strided_slice %33 {offsets = [0, 16], sizes = [16, 16], strides = [1, 1]} : vector<16x32xf32> to vector<16x16xf32>
    %cst_24 = arith.constant 2.000000e+01 : f32
    %42 = vector.broadcast %cst_24 : f32 to vector<16x16xf32>
    %43 = arith.cmpf ogt, %41, %42 : vector<16x16xf32>
    %cst_25 = arith.constant 2.000000e+01 : f32
    %44 = vector.broadcast %cst_25 : f32 to vector<16x16xf32>
    %45 = arith.minimumf %41, %44 : vector<16x16xf32>
    %46 = math.exp %45 : vector<16x16xf32>
    %47 = math.log1p %46 : vector<16x16xf32>
    %48 = arith.select %43, %41, %47 : vector<16x16xi1>, vector<16x16xf32>
    %49 = arith.mulf %40, %48 : vector<16x16xf32>
    %50 = arith.truncf %49 : vector<16x16xf32> to vector<16x16xbf16>
    %cst_26 = arith.constant dense<0.000000e+00> : vector<8x16xf32>
    %51 = tpu.matmul %13, %50, %cst_26 {dimension_numbers = #tpu.dot_dimension_numbers<[0], [0], [1], [1], [0, 1, 1, 1], [], []>} : vector<16x8xbf16>, vector<16x16xbf16>, vector<8x16xf32> -> vector<8x16xf32>
    %c1 = arith.constant 1 : index
    %c0_27 = arith.constant 0 : index
    %c0_28 = arith.constant 0 : index
    %52 = vector.load %arg1[%c1, %c0_27, %c0_28] : memref<2x16x1xi32, #tpu.memory_space<vmem>>, vector<1x16x1xi32>
    %53 = vector.shape_cast %52 : vector<1x16x1xi32> to vector<16x1xi32>
    %c1_29 = arith.constant 1 : index
    %c0_30 = arith.constant 0 : index
    %c0_31 = arith.constant 0 : index
    %54 = vector.load %arg2[%c1_29, %c0_30, %c0_31] : memref<2x16x1xi32, #tpu.memory_space<vmem>>, vector<1x16x1xi32>
    %55 = vector.shape_cast %54 : vector<1x16x1xi32> to vector<16x1xi32>
    %56 = vector.broadcast %53 : vector<16x1xi32> to vector<16x8xi32>
    %57 = arith.cmpi eq, %4, %56 : vector<16x8xi32>
    %58 = arith.extui %57 : vector<16x8xi1> to vector<16x8xi32>
    %59 = arith.sitofp %58 : vector<16x8xi32> to vector<16x8xf32>
    %60 = arith.truncf %59 : vector<16x8xf32> to vector<16x8xbf16>
    %61 = vector.broadcast %55 : vector<16x1xi32> to vector<16x8xi32>
    %62 = arith.cmpi eq, %4, %61 : vector<16x8xi32>
    %63 = arith.extui %62 : vector<16x8xi1> to vector<16x8xi32>
    %64 = arith.sitofp %63 : vector<16x8xi32> to vector<16x8xf32>
    %65 = arith.truncf %64 : vector<16x8xf32> to vector<16x8xbf16>
    %c1_32 = arith.constant 1 : index
    %c0_33 = arith.constant 0 : index
    %c0_34 = arith.constant 0 : index
    %66 = vector.load %arg22[%c1_32, %c0_33, %c0_34] : memref<2x8x32xbf16, #tpu.memory_space<vmem>>, vector<1x8x32xbf16>
    %67 = vector.shape_cast %66 : vector<1x8x32xbf16> to vector<8x32xbf16>
    %cst_35 = arith.constant dense<0.000000e+00> : vector<16x32xf32>
    %68 = tpu.matmul %60, %67, %cst_35 {dimension_numbers = #tpu.dot_dimension_numbers<[1], [0], [0], [1], [0, 0, 1, 1], [], []>} : vector<16x8xbf16>, vector<8x32xbf16>, vector<16x32xf32> -> vector<16x32xf32>
    %c1_36 = arith.constant 1 : index
    %c0_37 = arith.constant 0 : index
    %c0_38 = arith.constant 0 : index
    %69 = vector.load %arg23[%c1_36, %c0_37, %c0_38] : memref<2x8x32xbf16, #tpu.memory_space<vmem>>, vector<1x8x32xbf16>
    %70 = vector.shape_cast %69 : vector<1x8x32xbf16> to vector<8x32xbf16>
    %cst_39 = arith.constant dense<0.000000e+00> : vector<16x32xf32>
    %71 = tpu.matmul %65, %70, %cst_39 {dimension_numbers = #tpu.dot_dimension_numbers<[1], [0], [0], [1], [0, 0, 1, 1], [], []>} : vector<16x8xbf16>, vector<8x32xbf16>, vector<16x32xf32> -> vector<16x32xf32>
    %72 = arith.addf %68, %71 : vector<16x32xf32>
    %c1_40 = arith.constant 1 : index
    %c0_41 = arith.constant 0 : index
    %c0_42 = arith.constant 0 : index
    %73 = vector.load %arg12[%c1_40, %c0_41, %c0_42] : memref<2x64x32xf32, #tpu.memory_space<vmem>>, vector<1x64x32xf32>
    %74 = vector.shape_cast %73 : vector<1x64x32xf32> to vector<64x32xf32>
    %cst_43 = arith.constant dense<0.000000e+00> : vector<16x32xf32>
    %75 = tpu.matmul %3, %74, %cst_43 {dimension_numbers = #tpu.dot_dimension_numbers<[1], [0], [0], [1], [0, 0, 1, 1], [], []>} : vector<16x64xf32>, vector<64x32xf32>, vector<16x32xf32> -> vector<16x32xf32>
    %76 = arith.addf %72, %75 : vector<16x32xf32>
    %c1_44 = arith.constant 1 : index
    %c0_45 = arith.constant 0 : index
    %c0_46 = arith.constant 0 : index
    %77 = vector.load %arg13[%c1_44, %c0_45, %c0_46] : memref<2x1x32xf32, #tpu.memory_space<vmem>>, vector<1x1x32xf32>
    %78 = vector.shape_cast %77 : vector<1x1x32xf32> to vector<1x32xf32>
    %79 = vector.broadcast %78 : vector<1x32xf32> to vector<16x32xf32>
    %80 = arith.addf %76, %79 : vector<16x32xf32>
    %81 = vector.extract_strided_slice %80 {offsets = [0, 0], sizes = [16, 16], strides = [1, 1]} : vector<16x32xf32> to vector<16x16xf32>
    %cst_47 = arith.constant 0.000000e+00 : f32
    %82 = vector.broadcast %cst_47 : f32 to vector<16x16xf32>
    %83 = arith.subf %82, %81 : vector<16x16xf32>
    %84 = math.exp %83 : vector<16x16xf32>
    %cst_48 = arith.constant 1.000000e+00 : f32
    %85 = vector.broadcast %cst_48 : f32 to vector<16x16xf32>
    %86 = arith.addf %85, %84 : vector<16x16xf32>
    %87 = tpu.reciprocal %86 {approx = true} : vector<16x16xf32> -> vector<16x16xf32>
    %88 = vector.extract_strided_slice %80 {offsets = [0, 16], sizes = [16, 16], strides = [1, 1]} : vector<16x32xf32> to vector<16x16xf32>
    %cst_49 = arith.constant 2.000000e+01 : f32
    %89 = vector.broadcast %cst_49 : f32 to vector<16x16xf32>
    %90 = arith.cmpf ogt, %88, %89 : vector<16x16xf32>
    %cst_50 = arith.constant 2.000000e+01 : f32
    %91 = vector.broadcast %cst_50 : f32 to vector<16x16xf32>
    %92 = arith.minimumf %88, %91 : vector<16x16xf32>
    %93 = math.exp %92 : vector<16x16xf32>
    %94 = math.log1p %93 : vector<16x16xf32>
    %95 = arith.select %90, %88, %94 : vector<16x16xi1>, vector<16x16xf32>
    %96 = arith.mulf %87, %95 : vector<16x16xf32>
    %97 = arith.truncf %96 : vector<16x16xf32> to vector<16x16xbf16>
    %cst_51 = arith.constant dense<0.000000e+00> : vector<8x16xf32>
    %98 = tpu.matmul %60, %97, %cst_51 {dimension_numbers = #tpu.dot_dimension_numbers<[0], [0], [1], [1], [0, 1, 1, 1], [], []>} : vector<16x8xbf16>, vector<16x16xbf16>, vector<8x16xf32> -> vector<8x16xf32>
    %c0_52 = arith.constant 0 : index
    %c0_53 = arith.constant 0 : index
    %99 = vector.load %arg24[%c0_52, %c0_53] : memref<8x32xf32, #tpu.memory_space<vmem>>, vector<8x32xf32>
    %100 = tpu.concatenate %51, %98 in 1 : vector<8x16xf32>, vector<8x16xf32> -> vector<8x32xf32>
    %101 = arith.addf %99, %100 : vector<8x32xf32>
    %c0_54 = arith.constant 0 : index
    %c0_55 = arith.constant 0 : index
    %102 = vector.load %arg24[%c0_54, %c0_55] : memref<8x32xf32, #tpu.memory_space<vmem>>, vector<8x32xf32>
    tpu.vector_store %arg24[%c0_54, %c0_55], %101 {strides = array<i32>} : memref<8x32xf32, #tpu.memory_space<vmem>>, vector<8x32xf32>,
    %c0_i32_56 = arith.constant 0 : i32
    %103 = arith.cmpi eq, %arg0, %c0_i32_56 : i32
    %104 = arith.extui %103 : i1 to i32
    %c0_i32_57 = arith.constant 0 : i32
    %105 = arith.cmpi ne, %104, %c0_i32_57 : i32
    scf.if %105 {
      %c0_58 = arith.constant 0 : index
      %c0_59 = arith.constant 0 : index
      %106 = vector.load %arg24[%c0_58, %c0_59] : memref<8x32xf32, #tpu.memory_space<vmem>>, vector<8x32xf32>
      %c0_60 = arith.constant 0 : index
      %c0_61 = arith.constant 0 : index
      %107 = vector.load %arg18[%c0_60, %c0_61] : memref<8x32xf32, #tpu.memory_space<vmem>>, vector<8x32xf32>
      %108 = arith.mulf %106, %107 : vector<8x32xf32>
      %c0_62 = arith.constant 0 : index
      %c0_63 = arith.constant 0 : index
      %109 = vector.load %arg17[%c0_62, %c0_63] : memref<1x32xf32, #tpu.memory_space<vmem>>, vector<1x32xf32>
      %cst_64 = arith.constant 9.99999974E-6 : f32
      %110 = vector.broadcast %cst_64 : f32 to vector<1x32xf32>
      %111 = arith.addf %109, %110 : vector<1x32xf32>
      %112 = math.rsqrt %111 : vector<1x32xf32>
      %c0_65 = arith.constant 0 : index
      %c0_66 = arith.constant 0 : index
      %113 = vector.load %arg21[%c0_65, %c0_66] : memref<8x16xf32, #tpu.memory_space<vmem>>, vector<8x16xf32>
      %c0_67 = arith.constant 0 : index
      %c0_68 = arith.constant 0 : index
      %114 = vector.load %arg20[%c0_67, %c0_68] : memref<8x16xf32, #tpu.memory_space<vmem>>, vector<8x16xf32>
      %115 = tpu.concatenate %113, %114 in 1 : vector<8x16xf32>, vector<8x16xf32> -> vector<8x32xf32>
      %c0_69 = arith.constant 0 : index
      %c0_70 = arith.constant 0 : index
      %116 = vector.load %arg16[%c0_69, %c0_70] : memref<1x32xf32, #tpu.memory_space<vmem>>, vector<1x32xf32>
      %117 = vector.broadcast %116 : vector<1x32xf32> to vector<8x32xf32>
      %118 = arith.subf %108, %117 : vector<8x32xf32>
      %119 = vector.broadcast %112 : vector<1x32xf32> to vector<8x32xf32>
      %120 = arith.mulf %118, %119 : vector<8x32xf32>
      %c0_71 = arith.constant 0 : index
      %c0_72 = arith.constant 0 : index
      %121 = vector.load %arg14[%c0_71, %c0_72] : memref<1x32xf32, #tpu.memory_space<vmem>>, vector<1x32xf32>
      %122 = vector.broadcast %121 : vector<1x32xf32> to vector<8x32xf32>
      %123 = arith.mulf %120, %122 : vector<8x32xf32>
      %c0_73 = arith.constant 0 : index
      %c0_74 = arith.constant 0 : index
      %124 = vector.load %arg15[%c0_73, %c0_74] : memref<1x32xf32, #tpu.memory_space<vmem>>, vector<1x32xf32>
      %125 = vector.broadcast %124 : vector<1x32xf32> to vector<8x32xf32>
      %126 = arith.addf %123, %125 : vector<8x32xf32>
      %127 = arith.addf %126, %115 : vector<8x32xf32>
      %c0_75 = arith.constant 0 : index
      %c0_76 = arith.constant 0 : index
      %128 = vector.load %arg19[%c0_75, %c0_76] : memref<8x32xf32, #tpu.memory_space<vmem>>, vector<8x32xf32>
      tpu.vector_store %arg19[%c0_75, %c0_76], %127 {strides = array<i32>} : memref<8x32xf32, #tpu.memory_space<vmem>>, vector<8x32xf32>,
    } else {
    }
    return
  }
  func.func @transform_0(%arg0: i32) -> (i32, i32, i32) {
    %c0_i32 = arith.constant 0 : i32
    %c0_i32_0 = arith.constant 0 : i32
    %c0_i32_1 = arith.constant 0 : i32
    return %c0_i32, %arg0, %c0_i32_0 : i32, i32, i32
  }
  func.func @transform_1(%arg0: i32) -> (i32, i32, i32) {
    %c0_i32 = arith.constant 0 : i32
    %c0_i32_0 = arith.constant 0 : i32
    %c0_i32_1 = arith.constant 0 : i32
    return %c0_i32, %arg0, %c0_i32_0 : i32, i32, i32
  }
  func.func @transform_2(%arg0: i32) -> (i32, i32) {
    %c0_i32 = arith.constant 0 : i32
    %c0_i32_0 = arith.constant 0 : i32
    return %arg0, %c0_i32 : i32, i32
  }
  func.func @transform_3(%arg0: i32) -> (i32, i32) {
    %c0_i32 = arith.constant 0 : i32
    %c0_i32_0 = arith.constant 0 : i32
    %c0_i32_1 = arith.constant 0 : i32
    return %c0_i32, %c0_i32_0 : i32, i32
  }
  func.func @transform_4(%arg0: i32) -> (i32, i32) {
    %c0_i32 = arith.constant 0 : i32
    %c0_i32_0 = arith.constant 0 : i32
    %c0_i32_1 = arith.constant 0 : i32
    return %c0_i32, %c0_i32_0 : i32, i32
  }
  func.func @transform_5(%arg0: i32) -> (i32, i32) {
    %c0_i32 = arith.constant 0 : i32
    %c0_i32_0 = arith.constant 0 : i32
    %c0_i32_1 = arith.constant 0 : i32
    return %c0_i32, %c0_i32_0 : i32, i32
  }
  func.func @transform_6(%arg0: i32) -> (i32, i32) {
    %c0_i32 = arith.constant 0 : i32
    %c0_i32_0 = arith.constant 0 : i32
    %c0_i32_1 = arith.constant 0 : i32
    return %c0_i32, %c0_i32_0 : i32, i32
  }
  func.func @transform_7(%arg0: i32) -> (i32, i32) {
    %c0_i32 = arith.constant 0 : i32
    %c0_i32_0 = arith.constant 0 : i32
    %c0_i32_1 = arith.constant 0 : i32
    return %c0_i32, %c0_i32_0 : i32, i32
  }
  func.func @transform_8(%arg0: i32) -> (i32, i32) {
    %c0_i32 = arith.constant 0 : i32
    %c0_i32_0 = arith.constant 0 : i32
    %c0_i32_1 = arith.constant 0 : i32
    return %c0_i32, %c0_i32_0 : i32, i32
  }
  func.func @transform_9(%arg0: i32) -> (i32, i32, i32) {
    %c0_i32 = arith.constant 0 : i32
    %c0_i32_0 = arith.constant 0 : i32
    %c0_i32_1 = arith.constant 0 : i32
    %c0_i32_2 = arith.constant 0 : i32
    return %c0_i32, %c0_i32_0, %c0_i32_1 : i32, i32, i32
  }
  func.func @transform_10(%arg0: i32) -> (i32, i32, i32) {
    %c0_i32 = arith.constant 0 : i32
    %c0_i32_0 = arith.constant 0 : i32
    %c0_i32_1 = arith.constant 0 : i32
    %c0_i32_2 = arith.constant 0 : i32
    return %c0_i32, %c0_i32_0, %c0_i32_1 : i32, i32, i32
  }
  func.func @transform_11(%arg0: i32) -> (i32, i32, i32) {
    %c0_i32 = arith.constant 0 : i32
    %c0_i32_0 = arith.constant 0 : i32
    %c0_i32_1 = arith.constant 0 : i32
    %c0_i32_2 = arith.constant 0 : i32
    return %c0_i32, %c0_i32_0, %c0_i32_1 : i32, i32, i32
  }
  func.func @transform_12(%arg0: i32) -> (i32, i32, i32) {
    %c0_i32 = arith.constant 0 : i32
    %c0_i32_0 = arith.constant 0 : i32
    %c0_i32_1 = arith.constant 0 : i32
    %c0_i32_2 = arith.constant 0 : i32
    return %c0_i32, %c0_i32_0, %c0_i32_1 : i32, i32, i32
  }
  func.func @transform_13(%arg0: i32) -> (i32, i32) {
    %c0_i32 = arith.constant 0 : i32
    %c0_i32_0 = arith.constant 0 : i32
    %c0_i32_1 = arith.constant 0 : i32
    return %c0_i32, %c0_i32_0 : i32, i32
  }
  func.func @transform_14(%arg0: i32) -> (i32, i32) {
    %c0_i32 = arith.constant 0 : i32
    %c0_i32_0 = arith.constant 0 : i32
    %c0_i32_1 = arith.constant 0 : i32
    return %c0_i32, %c0_i32_0 : i32, i32
  }
  func.func @transform_15(%arg0: i32) -> (i32, i32) {
    %c0_i32 = arith.constant 0 : i32
    %c0_i32_0 = arith.constant 0 : i32
    %c0_i32_1 = arith.constant 0 : i32
    return %c0_i32, %c0_i32_0 : i32, i32
  }
  func.func @transform_16(%arg0: i32) -> (i32, i32) {
    %c0_i32 = arith.constant 0 : i32
    %c0_i32_0 = arith.constant 0 : i32
    %c0_i32_1 = arith.constant 0 : i32
    return %c0_i32, %c0_i32_0 : i32, i32
  }
  func.func @transform_17(%arg0: i32) -> (i32, i32) {
    %c0_i32 = arith.constant 0 : i32
    %c0_i32_0 = arith.constant 0 : i32
    %c0_i32_1 = arith.constant 0 : i32
    return %c0_i32, %c0_i32_0 : i32, i32
  }
  func.func @transform_18(%arg0: i32) -> (i32, i32) {
    %c0_i32 = arith.constant 0 : i32
    %c0_i32_0 = arith.constant 0 : i32
    %c0_i32_1 = arith.constant 0 : i32
    return %c0_i32, %c0_i32_0 : i32, i32
  }
}

module attributes {stable_mosaic.version = 11 : i64} {
  func.func @_ensembler_kernel(%arg0: memref<8x16xf32, #tpu.memory_space<vmem>>, %arg1: memref<8x16xf32, #tpu.memory_space<vmem>>, %arg2: memref<1x16xf32, #tpu.memory_space<vmem>>, %arg3: memref<1x16xf32, #tpu.memory_space<vmem>>, %arg4: memref<1x1xf32, #tpu.memory_space<vmem>>, %arg5: memref<8x1xf32, #tpu.memory_space<vmem>>) attributes {dimension_semantics = [], scalar_prefetch = 0 : i64, scratch_operands = 0 : i64, tpu.core_type = #tpu.core_type<tc>} {
    %c0 = arith.constant 0 : index
    %c0_0 = arith.constant 0 : index
    %0 = vector.load %arg0[%c0, %c0_0] : memref<8x16xf32, #tpu.memory_space<vmem>>, vector<8x16xf32>
    %c0_1 = arith.constant 0 : index
    %c0_2 = arith.constant 0 : index
    %1 = vector.load %arg2[%c0_1, %c0_2] : memref<1x16xf32, #tpu.memory_space<vmem>>, vector<1x16xf32>
    %2 = vector.broadcast %1 : vector<1x16xf32> to vector<8x16xf32>
    %3 = arith.mulf %0, %2 : vector<8x16xf32>
    %cst = arith.constant dense<0.000000e+00> : vector<8xf32>
    %4 = vector.multi_reduction <add>, %3, %cst [1] : vector<8x16xf32> to vector<8xf32>
    %5 = vector.shape_cast %4 : vector<8xf32> to vector<8x1xf32>
    %c0_3 = arith.constant 0 : index
    %c0_4 = arith.constant 0 : index
    %6 = vector.load %arg1[%c0_3, %c0_4] : memref<8x16xf32, #tpu.memory_space<vmem>>, vector<8x16xf32>
    %c0_5 = arith.constant 0 : index
    %c0_6 = arith.constant 0 : index
    %7 = vector.load %arg3[%c0_5, %c0_6] : memref<1x16xf32, #tpu.memory_space<vmem>>, vector<1x16xf32>
    %8 = vector.broadcast %7 : vector<1x16xf32> to vector<8x16xf32>
    %9 = arith.mulf %6, %8 : vector<8x16xf32>
    %cst_7 = arith.constant dense<0.000000e+00> : vector<8xf32>
    %10 = vector.multi_reduction <add>, %9, %cst_7 [1] : vector<8x16xf32> to vector<8xf32>
    %11 = vector.shape_cast %10 : vector<8xf32> to vector<8x1xf32>
    %12 = arith.addf %5, %11 : vector<8x1xf32>
    %c0_8 = arith.constant 0 : index
    %c0_9 = arith.constant 0 : index
    %13 = vector.load %arg4[%c0_8, %c0_9] : memref<1x1xf32, #tpu.memory_space<vmem>>, vector<1x1xf32>
    %14 = vector.broadcast %13 : vector<1x1xf32> to vector<8x1xf32>
    %15 = arith.addf %12, %14 : vector<8x1xf32>
    %cst_10 = arith.constant 0.000000e+00 : f32
    %16 = vector.broadcast %cst_10 : f32 to vector<8x1xf32>
    %17 = arith.subf %16, %15 : vector<8x1xf32>
    %18 = math.exp %17 : vector<8x1xf32>
    %cst_11 = arith.constant 1.000000e+00 : f32
    %19 = vector.broadcast %cst_11 : f32 to vector<8x1xf32>
    %20 = arith.addf %19, %18 : vector<8x1xf32>
    %cst_12 = arith.constant 1.000000e+00 : f32
    %21 = vector.broadcast %cst_12 : f32 to vector<8x1xf32>
    %22 = arith.divf %21, %20 : vector<8x1xf32>
    %c0_13 = arith.constant 0 : index
    %c0_14 = arith.constant 0 : index
    %23 = vector.load %arg5[%c0_13, %c0_14] : memref<8x1xf32, #tpu.memory_space<vmem>>, vector<8x1xf32>
    tpu.vector_store %arg5[%c0_13, %c0_14], %22 {strides = array<i32>} : memref<8x1xf32, #tpu.memory_space<vmem>>, vector<8x1xf32>,
    return
  }
}

</mosaic_0001>

<bundles_post_ra>
// kernel: model_forward.4
= control target key start
LH: loop header
LB: loop body
LE: loop exit
PB: predicated region body
PF: predicated region fallthrough
CT: control target
= control target key end

     0   :  { %vm53_vm0 = vcmask 1043456   ;;  %v460_v3 = vmov 0.0   ;;  %vm46_vm1 = vcmask 162816   ;;  %v36_v51 = vlaneseq  ;;  %s686_s1 = inlined_call_operand.vmem [shape: f32[20,256], index: 1, kind: input, shape index: {}]   ;;  %s687_s3 = inlined_call_operand.vmem [shape: f32[256,128], index: 3, kind: input, shape index: {}]   ;;  %s688_s0 = inlined_call_operand.vmem [shape: f32[16,20], index: 0, kind: input, shape index: {}]   ;;  %s689_s5 = inlined_call_operand.vmem [shape: f32[128,64], index: 5, kind: input, shape index: {}]   ;;  %s690_s2 = inlined_call_operand.vmem [shape: f32[1,256], index: 2, kind: input, shape index: {}]   ;;  %s691_s4 = inlined_call_operand.vmem [shape: f32[1,128], index: 4, kind: input, shape index: {}]   ;;  %s692_s6 = inlined_call_operand.vmem [shape: f32[1,64], index: 6, kind: input, shape index: {}]   ;;  %s693_s7 = inlined_call_operand.vmem [shape: f32[16,64], index: 7, kind: output, shape index: {}]  }
   0x1   :  { %v33_v0 = vld [vmem:[%s686_s1 + $0x28] sm:$0xf]  ;;  %v32_v1 = vld [vmem:[%s686_s1 + $0x20] sm:$0xf]  ;;  %v31_v2 = vld [vmem:[%s686_s1 + $0x18] sm:$0xff]  ;;  %124 = vmatprep.mubr.f32.mxu0 %v460_v3  ;;  %vm355_vm2 = vcmask 523264  }
   0x2   :  { %362 = vmatprep.subr.msk.mxu0 %vm53_vm0, %v33_v0  ;;  %v30_v4 = vld [vmem:[%s686_s1 + $0x10] sm:$0xff]  ;;  %v29_v5 = vld [vmem:[%s686_s1 + $0x8] sm:$0xff]  ;;  %v28_v6 = vld [vmem:[%s686_s1] sm:$0xff]  ;;  %v37_v52 = vshrl.u32 %v36_v51, 7 }
   0x3   :  { %363 = vmatpush1.msk.msra.mxu0 %vm53_vm0, %v32_v1  ;;  %v172_v7 = vld [vmem:[%s687_s3 + $0xf8] sm:$0xff]  ;;  %v171_v9 = vld [vmem:[%s687_s3 + $0xf0] sm:$0xff]  ;;  %v26_v11 = vld [vmem:[%s688_s0] sm:$0xff] }
   0x4   :  { %88 = vmatprep.subr.mxu0 %v31_v2  ;;  %368 = vmatprep.subr.mxu1 %v172_v7  ;;  %v156_v8 = vld [vmem:[%s687_s3 + $0x78] sm:$0xff]  ;;  %v155_v10 = vld [vmem:[%s687_s3 + $0x70] sm:$0xff]  ;;  %v170_v12 = vld [vmem:[%s687_s3 + $0xe8] sm:$0xff]  ;;  %v38_v53 = vsub.s32 0, %v37_v52  ;;  %v42_v55 = vsub.s32 1, %v37_v52 }
   0x5   :  { %89 = vmatpush1.msra.mxu0 %v30_v4  ;;  %369 = vmatpush3.msra.mxu1 %v156_v8  ;;  %v154_v13 = vld [vmem:[%s687_s3 + $0x68] sm:$0xff]  ;;  %v169_v14 = vld [vmem:[%s687_s3 + $0xe0] sm:$0xff]  ;;  %v168_v17 = vld [vmem:[%s687_s3 + $0xd8] sm:$0xff] }
   0x6   :  { %90 = vmatprep.subr.mxu0 %v29_v5  ;;  %370 = vmatprep.subr.mxu1 %v171_v9  ;;  %v153_v15 = vld [vmem:[%s687_s3 + $0x60] sm:$0xff]  ;;  %v27_v16 = vld [vmem:[%s688_s0 + $0x8] sm:$0xff]  ;;  %v152_v18 = vld [vmem:[%s687_s3 + $0x58] sm:$0xff] }
   0x7   :  { %91 = vmatpush1.msra.mxu0 %v28_v6  ;;  %371 = vmatpush3.msra.mxu1 %v155_v10  ;;  %v167_v19 = vld [vmem:[%s687_s3 + $0xd0] sm:$0xff]  ;;  %v166_v21 = vld [vmem:[%s687_s3 + $0xc8] sm:$0xff]  ;;  %v165_v23 = vld [vmem:[%s687_s3 + $0xc0] sm:$0xff] }
   0x8   :  { %364 = vmatmul.mubr.msk.f32.vlgmr.msra.gmra.mxu0 %vm46_vm1, %v26_v11  ;;  %372 = vmatprep.subr.mxu1 %v170_v12  ;;  %v151_v20 = vld [vmem:[%s687_s3 + $0x50] sm:$0xff]  ;;  %v150_v22 = vld [vmem:[%s687_s3 + $0x48] sm:$0xff]  ;;  %v149_v24 = vld [vmem:[%s687_s3 + $0x40] sm:$0xff] }
   0x9   :  { %130 = vmatprep.mubr.f32.mxu0 %v460_v3  ;;  %373 = vmatpush3.msra.mxu1 %v154_v13  ;;  %v164_v25 = vld [vmem:[%s687_s3 + $0xb8] sm:$0xff]  ;;  %v163_v27 = vld [vmem:[%s687_s3 + $0xb0] sm:$0xff]  ;;  %v162_v29 = vld [vmem:[%s687_s3 + $0xa8] sm:$0xff] }
   0xa   :  { %374 = vmatprep.subr.mxu1 %v169_v14  ;;  %v148_v26 = vld [vmem:[%s687_s3 + $0x38] sm:$0xff]  ;;  %v147_v28 = vld [vmem:[%s687_s3 + $0x30] sm:$0xff]  ;;  %v146_v30 = vld [vmem:[%s687_s3 + $0x28] sm:$0xff] }
   0xb   :  { %375 = vmatpush3.msra.mxu1 %v153_v15  ;;  %v161_v31 = vld [vmem:[%s687_s3 + $0xa0] sm:$0xff]  ;;  %v160_v33 = vld [vmem:[%s687_s3 + $0x98] sm:$0xff]  ;;  %v159_v35 = vld [vmem:[%s687_s3 + $0x90] sm:$0xff] }
   0xc   :  { %365 = vmatmul.mubr.msk.f32.gmra.mxu0 %vm46_vm1, %v27_v16  ;;  %376 = vmatprep.subr.mxu1 %v168_v17  ;;  %v145_v32 = vld [vmem:[%s687_s3 + $0x20] sm:$0xff]  ;;  %v144_v34 = vld [vmem:[%s687_s3 + $0x18] sm:$0xff]  ;;  %v143_v36 = vld [vmem:[%s687_s3 + $0x10] sm:$0xff] }
   0xd   :  { %377 = vmatpush3.msra.mxu1 %v152_v18  ;;  %v158_v37 = vld [vmem:[%s687_s3 + $0x88] sm:$0xff]  ;;  %v157_v39 = vld [vmem:[%s687_s3 + $0x80] sm:$0xff]  ;;  %v272_v41 = vld [vmem:[%s689_s5 + $0x78] sm:$0xff] }
   0xe   :  { %378 = vmatprep.subr.mxu1 %v167_v19  ;;  %v142_v38 = vld [vmem:[%s687_s3 + $0x8] sm:$0xff]  ;;  %v141_v40 = vld [vmem:[%s687_s3] sm:$0xff]  ;;  %v271_v42 = vld [vmem:[%s689_s5 + $0x70] sm:$0xff]  ;;  %424 = vmatprep.subr.mxu0 %v272_v41 }
   0xf   :  { %379 = vmatpush3.msra.mxu1 %v151_v20  ;;  %425 = vmatpush3.msra.mxu0 %v272_v41  ;;  %v270_v43 = vld [vmem:[%s689_s5 + $0x68] sm:$0xff]  ;;  %v269_v44 = vld [vmem:[%s689_s5 + $0x60] sm:$0xff]  ;;  %v268_v45 = vld [vmem:[%s689_s5 + $0x58] sm:$0xff] }
  0x10   :  { %380 = vmatprep.subr.mxu1 %v166_v21  ;;  %426 = vmatprep.subr.mxu0 %v271_v42  ;;  %v267_v46 = vld [vmem:[%s689_s5 + $0x50] sm:$0xff]  ;;  %v266_v47 = vld [vmem:[%s689_s5 + $0x48] sm:$0xff]  ;;  %v265_v48 = vld [vmem:[%s689_s5 + $0x40] sm:$0xff] }
  0x11   :  { %381 = vmatpush3.msra.mxu1 %v150_v22  ;;  %427 = vmatpush3.msra.mxu0 %v271_v42  ;;  %v264_v49 = vld [vmem:[%s689_s5 + $0x38] sm:$0xff]  ;;  %v263_v50 = vld [vmem:[%s689_s5 + $0x30] sm:$0xff]  ;;  %v34_v54 = vld [vmem:[%s690_s2] sm:$0x3] }
  0x12   :  { %382 = vmatprep.subr.mxu1 %v165_v23  ;;  %428 = vmatprep.subr.mxu0 %v270_v43  ;;  %v39_v56 = vrot.slane %v34_v54, %v38_v53  ;;  %v43_v57 = vrot.slane %v34_v54, %v42_v55  ;;  %v262_v6 = vld [vmem:[%s689_s5 + $0x28] sm:$0xff]  ;;  %v261_v7 = vld [vmem:[%s689_s5 + $0x20] sm:$0xff]  ;;  %v260_v8 = vld [vmem:[%s689_s5 + $0x18] sm:$0xff] }
  0x13   :  { %383 = vmatpush3.msra.mxu1 %v149_v24  ;;  %429 = vmatpush3.msra.mxu0 %v270_v43  ;;  %v259_v9 = vld [vmem:[%s689_s5 + $0x10] sm:$0xff]  ;;  %v258_v10 = vld [vmem:[%s689_s5 + $0x8] sm:$0xff]  ;;  %v257_v11 = vld [vmem:[%s689_s5] sm:$0xff] }
  0x14   :  { %384 = vmatprep.subr.mxu1 %v164_v25  ;;  %430 = vmatprep.subr.mxu0 %v269_v44  ;;  %v366_v13 = vld [vmem:[%s691_s4] ss:$0 sm:$0xff] }
  0x15   :  { %385 = vmatpush3.msra.mxu1 %v148_v26  ;;  %431 = vmatpush3.msra.mxu0 %v269_v44  ;;  %v367_v23 = vld [vmem:[%s692_s6] ss:$0 sm:$0xff] }
  0x16   :  { %386 = vmatprep.subr.mxu1 %v163_v27  ;;  %432 = vmatprep.subr.mxu0 %v268_v45 }
  0x17   :  { %387 = vmatpush3.msra.mxu1 %v147_v28  ;;  %433 = vmatpush3.msra.mxu0 %v268_v45 }
  0x18   :  { %388 = vmatprep.subr.mxu1 %v162_v29  ;;  %434 = vmatprep.subr.mxu0 %v267_v46 }
  0x19   :  { %389 = vmatpush3.msra.mxu1 %v146_v30  ;;  %435 = vmatpush3.msra.mxu0 %v267_v46 }
  0x1a   :  { %390 = vmatprep.subr.mxu1 %v161_v31  ;;  %436 = vmatprep.subr.mxu0 %v266_v47 }
  0x1b   :  { %391 = vmatpush3.msra.mxu1 %v145_v32  ;;  %437 = vmatpush3.msra.mxu0 %v266_v47 }
  0x1c   :  { %392 = vmatprep.subr.mxu1 %v160_v33  ;;  %438 = vmatprep.subr.mxu0 %v265_v48 }
  0x1d   :  { %393 = vmatpush3.msra.mxu1 %v144_v34  ;;  %439 = vmatpush3.msra.mxu0 %v265_v48 }
  0x1e   :  { %394 = vmatprep.subr.mxu1 %v159_v35  ;;  %440 = vmatprep.subr.mxu0 %v264_v49 }
  0x1f   :  { %395 = vmatpush3.msra.mxu1 %v143_v36  ;;  %441 = vmatpush3.msra.mxu0 %v264_v49 }
  0x20   :  { %396 = vmatprep.subr.mxu1 %v158_v37  ;;  %442 = vmatprep.subr.mxu0 %v263_v50 }
  0x21   :  { %397 = vmatpush3.msra.mxu1 %v142_v38  ;;  %443 = vmatpush3.msra.mxu0 %v263_v50 }
  0x22   :  { %398 = vmatprep.subr.mxu1 %v157_v39  ;;  %444 = vmatprep.subr.mxu0 %v262_v6 }
  0x23   :  { %399 = vmatpush3.msra.mxu1 %v141_v40  ;;  %445 = vmatpush3.msra.mxu0 %v262_v6 }
  0x24   :  { %446 = vmatprep.subr.mxu0 %v261_v7 }
  0x25   :  { %447 = vmatpush3.msra.mxu0 %v261_v7 }
  0x26   :  { %448 = vmatprep.subr.mxu0 %v260_v8 }
  0x27   :  { %449 = vmatpush3.msra.mxu0 %v260_v8 }
  0x28   :  { %450 = vmatprep.subr.mxu0 %v259_v9 }
  0x29   :  { %451 = vmatpush3.msra.mxu0 %v259_v9 }
  0x2a   :  { %452 = vmatprep.subr.mxu0 %v258_v10 }
  0x2b   :  { %453 = vmatpush3.msra.mxu0 %v258_v10 }
  0x2c   :  { %454 = vmatprep.subr.mxu0 %v257_v11 }
  0x2d   :  { %455 = vmatpush3.msra.mxu0 %v257_v11 }
  0xc8   :  { %v126_v58 = vpop.f32.mrf.mxu0 }
  0xc9   :  { %v127_v59 = vadd.f32 %v126_v58, %v39_v56 }
  0xca   :  { %v128_v60 = vpop.f32.mrf.mxu0 }
  0xcb   :  { %v129_v61 = vadd.f32 %v128_v60, %v43_v57  ;;  %v137_v0 = vmax.f32 %v127_v59, 0.0 }
  0xcc   :  { %v132_v62 = vpop.f32.mrf.mxu0 }
  0xcd   :  { %v138_v63 = vmax.f32 %v129_v61, 0.0  ;;  %v133_v1 = vadd.f32 %v132_v62, %v39_v56 }
  0xce   :  { %v134_v2 = vpop.f32.mrf.mxu0 }
  0xcf   :  { %v135_v3 = vadd.f32 %v134_v2, %v43_v57  ;;  %244 = vmatprep.mubr.f32.mxu1 %v138_v63  ;;  %v139_v5 = vmax.f32 %v133_v1, 0.0 }
  0xd0   :  { %245 = vmatmul.mubr.f32.vlgmr.msra.gmra.mxu1 %v137_v0 }
  0xd1   :  { %v140_v4 = vmax.f32 %v135_v3, 0.0 }
  0xd3   :  { %249 = vmatprep.mubr.f32.mxu1 %v140_v4 }
  0xd4   :  { %250 = vmatmul.mubr.f32.gmra.mxu1 %v139_v5 }
 0x190   :  { %v400_v12 = vpop.f32.mrf.mxu1 }
 0x192   :  { %v401_v14 = vpop.f32.mrf.mxu1 }
 0x193   :  { %v402_v15 = vadd.f32 %v401_v14, %v400_v12 }
 0x194   :  { %v403_v16 = vpop.f32.mrf.mxu1 }
 0x195   :  { %v247_v17 = vadd.f32 %v402_v15, %v366_v13 }
 0x196   :  { %v404_v18 = vpop.f32.mrf.mxu1 }
 0x197   :  { %v255_v19 = vmax.f32 %v247_v17, 0.0  ;;  %v405_v20 = vadd.f32 %v404_v18, %v403_v16 }
 0x199   :  { %v252_v21 = vadd.f32 %v405_v20, %v366_v13  ;;  %456 = vmatprep.mubr.f32.mxu0 %v255_v19 }
 0x19b   :  { %v256_v22 = vmax.f32 %v252_v21, 0.0 }
 0x19d   :  { %457 = vmatmul.mubr.f32.vlgmr.msra.gmra.mxu0 %v256_v22 }
 0x25d   :  { %v458_v24 = vpop.f32.mrf.mxu0 }
 0x25e   :  { %v352_v25 = vadd.f32 %v458_v24, %v367_v23 }
 0x25f   :  { %v346_v26 = vpop.f32.mrf.mxu0 }
 0x260   :  { %357 = vst.msk [vmem:[%s693_s7 + $0x8] sm:$0xff] %vm355_vm2, %v352_v25  ;;  %v347_v27 = vadd.f32 %v367_v23, %v346_v26 }
 0x262   :  { %356 = vst.msk [vmem:[%s693_s7] sm:$0xff] %vm355_vm2, %v347_v27 }

// kernel: model_forward.7
= control target key start
LH: loop header
LB: loop body
LE: loop exit
PB: predicated region body
PF: predicated region fallthrough
CT: control target
= control target key end

     0   :  { %vm31_vm0 = vcmask 130048   ;;  %vm62_vm1 = vcmask 7168   ;;  %s123_s0 = inlined_call_operand.vmem [shape: f32[8,16], index: 0, kind: input, shape index: {}]   ;;  %s124_s2 = inlined_call_operand.vmem [shape: f32[1,16], index: 2, kind: input, shape index: {}]   ;;  %s125_s1 = inlined_call_operand.vmem [shape: f32[8,16], index: 1, kind: input, shape index: {}]   ;;  %s126_s3 = inlined_call_operand.vmem [shape: f32[1,16], index: 3, kind: input, shape index: {}]   ;;  %s127_s4 = inlined_call_operand.<no memory space> [shape: f32[1,1], index: 4, kind: input, shape index: {}]   ;;  %s128_s5 = inlined_call_operand.vmem [shape: f32[8,1], index: 5, kind: output, shape index: {}]  }
   0x1   :  { %v22_v0 = vld [vmem:[%s123_s0] sm:$0xff]  ;;  %v10_v8 = vstv %s127_s4 }
   0x2   :  { %v68_v1 = vld [vmem:[%s124_s2] ss:$0 sm:$0xff]  ;;  %11 = vst [vmem:[#allocation2] sm:$0x1] %v10_v8 }
   0x3   :  { %v35_v2 = vld [vmem:[%s125_s1] sm:$0xff]  ;;  %v30_v3 = vmul.f32 %v68_v1, %v22_v0 }
   0x4   :  { %v69_v4 = vld [vmem:[%s126_s3] ss:$0 sm:$0xff] }
   0x5   :  { %v43_v5 = vmul.f32 %v69_v4, %v35_v2  ;;  %v32_v6 = vsel %vm31_vm0, %v30_v3, 0.0 }
   0x6   :  { %33 = vadd.xlane.f32.xlu0 %v32_v6 }
   0x7   :  { %v44_v7 = vsel %vm31_vm0, %v43_v5, 0.0 }
   0x9   :  { %v70_v10 = vld [vmem:[#allocation2] ss:$0 sm:$0xff] }
   0xa   :  { %45 = vadd.xlane.f32.xlu0 %v44_v7 }
  0x8f   :  { %v34_v9 = vpop.xlane.xlu0 %33 }
  0x93   :  { %v46_v11 = vpop.xlane.xlu0 %45 }
  0x94   :  { %v47_v12 = vadd.f32 %v46_v11, %v34_v9 }
  0x96   :  { %v55_v13 = vadd.f32 %v70_v10, %v47_v12 }
  0x98   :  { %v56_v14 = vsub.f32 0.0, %v55_v13 }
  0x9a   :  { %v57_v15 = vmul.f32 1.442695, %v56_v14 }
  0x9c   :  { %71 = vpow2.f32 %v57_v15 }
  0xa9   :  { %v72_v16 = vpop.eup %71 }
  0xaa   :  { %v59_v17 = vadd.f32 1.0, %v72_v16 }
  0xac   :  { %73 = vrcp.f32 %v59_v17 }
  0xb9   :  { %v74_v18 = vpop.eup %73 }
  0xba   :  { %63 = vst.msk [vmem:[%s128_s5] sm:$0xff] %vm62_vm1, %v74_v18 }

// kernel: model_forward.5
= control target key start
LH: loop header
LB: loop body
LE: loop exit
PB: predicated region body
PF: predicated region fallthrough
CT: control target
= control target key end

     0   :  { %vm161_vm0 = vcmask 1043456   ;;  %vm73_vm1 = vcmask 64512   ;;  %v1538_v0 = vmov 0.0   ;;  %vm1539_vm2 = vmmov 0   ;;  %s1901_s5 = inlined_call_operand.vmem [shape: f32[8,16], index: 5, kind: input, shape index: {}]   ;;  %s1902_s7 = inlined_call_operand.vmem [shape: f32[12,16], index: 7, kind: input, shape index: {}]   ;;  %s1903_s3 = inlined_call_operand.vmem [shape: f32[8,8], index: 3, kind: input, shape index: {}]   ;;  %s1904_s4 = inlined_call_operand.vmem [shape: f32[8,12], index: 4, kind: input, shape index: {}]   ;;  %s1905_s10 = inlined_call_operand.vmem [shape: f32[2,16,32], index: 10, kind: input, shape index: {}]   ;;  %s1906_s9 = inlined_call_operand.vmem [shape: f32[2,16,32], index: 9, kind: input, shape index: {}]   ;;  %s1907_s1 = inlined_call_operand.vmem [shape: s32[2,16,1], index: 1, kind: input, shape index: {}]   ;;  %s1908_s0 = inlined_call_operand.vmem [shape: s32[2,16,1], index: 0, kind: input, shape index: {}]   ;;  %s1909_s6 = inlined_call_operand.vmem [shape: f32[1,16], index: 6, kind: input, shape index: {}]   ;;  %s1910_s8 = inlined_call_operand.vmem [shape: f32[1,16], index: 8, kind: input, shape index: {}]   ;;  %s1911_s11 = inlined_call_operand.vmem [shape: f32[2,64,32], index: 11, kind: input, shape index: {}]   ;;  %s1912_s2 = inlined_call_operand.vmem [shape: f32[16,64], index: 2, kind: input, shape index: {}]   ;;  %s1913_s12 = inlined_call_operand.vmem [shape: f32[2,1,32], index: 12, kind: input, shape index: {}]   ;;  %s1914_s16 = inlined_call_operand.vmem [shape: f32[1,32], index: 16, kind: input, shape index: {}]   ;;  %s1915_s17 = inlined_call_operand.vmem [shape: f32[8,32], index: 17, kind: input, shape index: {}]   ;;  %s1916_s15 = inlined_call_operand.vmem [shape: f32[1,32], index: 15, kind: input, shape index: {}]   ;;  %s1917_s13 = inlined_call_operand.vmem [shape: f32[1,32], index: 13, kind: input, shape index: {}]   ;;  %s1918_s14 = inlined_call_operand.vmem [shape: f32[1,32], index: 14, kind: input, shape index: {}]   ;;  %s1919_s18 = inlined_call_operand.vmem [shape: f32[8,32], index: 18, kind: output, shape index: {}]  }
   0x1   :  { %1921 = sst [smem:[#allocation7_spill]] %s1901_s5  ;;  %1383 = vmatprep.subr.mxu0 %v1538_v0  ;;  %1388 = vmatprep.subr.mxu1 %v1538_v0  ;;  %v147_v5 = vld [vmem:[%s1904_s4] sm:$0xff]  ;;  %vm157_vm3 = vcmask 97280   ;;  %v317_v6 = vld [vmem:[%s1905_s10 + $0x8] sm:$0xff]  ;;  %v1540_v10 = vmov 0   ;;  %v1310_v15 = vld [vmem:[%s1907_s1 + $0x10] sm:$0xff]  ;;  %v549_v30 = vlaneseq }
   0x2   :  { %1922 = sst [smem:[#allocation8_spill]] %s1902_s7  ;;  %1385 = vmatprep.mubr.msk.f32.mxu0 %vm1539_vm2, %v1538_v0  ;;  %1392 = vmatprep.mubr.msk.f32.mxu1 %vm1539_vm2, %v1538_v0  ;;  %v316_v7 = vld [vmem:[%s1905_s10] sm:$0xff]  ;;  %v239_v8 = vld [vmem:[%s1906_s9 + $0x8] sm:$0xff]  ;;  %v1308_v16 = vld [vmem:[%s1908_s0 + $0x10] sm:$0xff]  ;;  %vm235_vm4 = vcmask 130048   ;;  %vm314_vm5 = vcmask 257024  }
   0x3   :  { %1923 = sst [smem:[#allocation9_spill]] %s1903_s3  ;;  %v238_v9 = vld [vmem:[%s1906_s9] sm:$0xff]  ;;  %1502 = vset.pattern.permute.xlu0 %v1540_v10  ;;  %1503 = vset.pattern.permute.xlu1 %v1540_v10  ;;  %v554_v13 = vld [vmem:[%s1907_s1 + $0x8] sm:$0xff]  ;;  %v1296_v21 = vld [vmem:[%s1905_s10 + $0x18] sm:$0xff]  ;;  %v1739_v35 = vand.u32 127, %v549_v30  ;;  %vm687_vm10 = vcmask 523264  }
   0x4   :  { %s1924_s29 = sld [smem:[#allocation7_spill]]  ;;  %v553_v11 = vld [vmem:[%s1907_s1] sm:$0xff]  ;;  %v552_v14 = vld [vmem:[%s1908_s0 + $0x8] sm:$0xff]  ;;  %v1295_v24 = vld [vmem:[%s1905_s10 + $0x10] sm:$0xff]  ;;  %s1541_s10 = smov 112  }
   0x5   :  { %s1925_s19 = sld [smem:[#allocation8_spill]]  ;;  %569 = vperm.xlu0 %1502, %v553_v11   ;;  %v551_v12 = vld [vmem:[%s1908_s0] sm:$0xff]  ;;  %v1293_v26 = vld [vmem:[%s1906_s9 + $0x18] sm:$0xff]  ;;  %v1292_v28 = vld [vmem:[%s1906_s9 + $0x10] sm:$0xff] }
   0x6   :  { %s1926_s21 = sld [smem:[#allocation9_spill]]  ;;  %556 = vperm.xlu1 %1503, %v551_v12   ;;  %v1285_v17 = vld [vmem:[%s1909_s6] ss:$0 sm:$0xff]  ;;  %v686_v50 = vld [vmem:[%s1911_s11 + $0x38] sm:$0xff]  ;;  %v685_v59 = vld [vmem:[%s1911_s11 + $0x30] sm:$0xff] }
   0x7   :  { %v1287_v20 = vld [vmem:[%s1910_s8] ss:$0 sm:$0xff]  ;;  %v684_v60 = vld [vmem:[%s1911_s11 + $0x28] sm:$0xff]  ;;  %v682_v62 = vld [vmem:[%s1911_s11 + $0x18] sm:$0xff] }
   0x8   :  { %v1760_v56 = vld [vmem:[%s1912_s2] sm:$0xff]  ;;  %v681_v63 = vld [vmem:[%s1911_s11 + $0x10] sm:$0xff] }
   0x9   :  { %572 = vperm.xlu0 %1502, %v554_v13   ;;  %v683_v61 = vld [vmem:[%s1911_s11 + $0x20] sm:$0xff] }
   0xa   :  { %v65_v1 = vld [vmem:[%s1924_s29] sm:$0xff]  ;;  %559 = vperm.xlu1 %1503, %v552_v14  }
   0xb   :  { %v149_v2 = vld [vmem:[%s1925_s19 + $0x8] sm:$0xf]  ;;  %1384 = vmatpush3.msra.mxu0 %v65_v1  ;;  %v148_v4 = vld [vmem:[%s1925_s19] sm:$0xff] }
   0xc   :  { %v64_v3 = vld [vmem:[%s1926_s21] sm:$0xff]  ;;  %1389 = vmatpush3.msk.msra.mxu1 %vm161_vm0, %v149_v2  ;;  %1395 = vmatprep.subr.mxu0 %v1538_v0  ;;  %v680_v1 = vld [vmem:[%s1911_s11 + $0x8] sm:$0xff] }
   0xd   :  { %1386 = vmatmul.mubr.msk.f32.vlgmr.msra.gmra.mxu0 %vm73_vm1, %v64_v3  ;;  %1390 = vmatprep.subr.mxu1 %v1538_v0  ;;  %v679_v2 = vld [vmem:[%s1911_s11] sm:$0xff]  ;;  %v1797_v3 = vld [vmem:[%s1912_s2 + $0x8] sm:$0xff] }
   0xe   :  { %1391 = vmatpush3.msra.mxu1 %v148_v4  ;;  %1399 = vmatprep.mubr.msk.f32.mxu0 %vm1539_vm2, %v1538_v0 }
   0xf   :  { %1393 = vmatmul.mubr.msk.f32.vlgmr.msra.gmra.mxu1 %vm157_vm3, %v147_v5  ;;  %1402 = vmatprep.subr.mxu1 %v1538_v0 }
  0x10   :  { %1403 = vmatpush3.msra.mxu1 %v317_v6  ;;  %1406 = vmatprep.mubr.msk.f32.mxu1 %vm1539_vm2, %v1538_v0 }
  0x11   :  { %1404 = vmatprep.subr.mxu1 %v1538_v0  ;;  %1396 = vmatpush3.msra.mxu0 %v239_v8 }
  0x12   :  { %1405 = vmatpush3.msra.mxu1 %v316_v7  ;;  %1397 = vmatprep.subr.mxu0 %v1538_v0 }
  0x13   :  { %1416 = vmatprep.subr.mxu1 %v1538_v0  ;;  %1398 = vmatpush3.msra.mxu0 %v238_v9 }
  0x14   :  { %1409 = vmatprep.subr.mxu0 %v1538_v0  ;;  %909 = vperm.xlu0 %1502, %v1310_v15  }
  0x18   :  { %896 = vperm.xlu0 %1502, %v1308_v16   ;;  %v1306_v16 = vld [vmem:[%s1913_s12] ss:$0 sm:$0xff] }
  0x80   :  { %v570_v31 = vpop.permute.xlu0 %569 }
  0x81   :  { %v557_v29 = vpop.permute.xlu1 %556  ;;  %vm574_vm6 = vcmp.eq.s32.totalorder %v1739_v35, %v570_v31 }
  0x82   :  { %vm561_vm8 = vcmp.eq.s32.totalorder %v1739_v35, %v557_v29  ;;  %v1300_v47 = vsel %vm574_vm6, 1.0, %v1538_v0 }
  0x83   :  { %v1298_v51 = vsel %vm561_vm8, 1.0, %v1538_v0  ;;  %vm545_vm8 = vcmask 261120  }
  0x84   :  { %v573_v41 = vpop.permute.xlu0 %572  ;;  %546 = vst.msk [vmem:[#allocation6] sm:$0xff] %vm545_vm8, %v1538_v0 }
  0x85   :  { %v560_v38 = vpop.permute.xlu1 %559  ;;  %vm575_vm7 = vcmp.eq.s32.totalorder %v1739_v35, %v573_v41 }
  0x86   :  { %vm562_vm9 = vcmp.eq.s32.totalorder %v1739_v35, %v560_v38  ;;  %v1301_v48 = vsel %vm575_vm7, 1.0, %v1538_v0 }
  0x87   :  { %v1299_v53 = vsel %vm562_vm9, 1.0, %v1538_v0  ;;  %v580_v54 = vpack.c.bf16 %v1301_v48, %v1300_v47 }
  0x88   :  { %v1762_v57 = vpack.c.bf16 %v1299_v53, %v1298_v51 }
  0xcd   :  { %v143_v18 = vpop.f32.mrf.mxu0 }
  0xce   :  { %v144_v19 = vadd.f32 %v1285_v17, %v143_v18 }
  0xcf   :  { %v1387_v22 = vpop.f32.mrf.mxu0  ;;  %v231_v23 = vpop.f32.mrf.mxu1 }
  0xd0   :  { %236 = vst.msk [vmem:[#allocation2] sm:$0xff] %vm235_vm4, %v144_v19  ;;  %1407 = vmatmul.mubr.msk.f32.vlgmr.msra.gmra.mxu1 %vm235_vm4, %v144_v19  ;;  %v232_v25 = vadd.f32 %v1287_v20, %v231_v23 }
  0xd1   :  { %1417 = vmatpush3.msra.mxu1 %v1296_v21  ;;  %1420 = vmatprep.mubr.msk.f32.mxu1 %vm1539_vm2, %v1538_v0  ;;  %v1394_v27 = vpop.f32.mrf.mxu1 }
  0xd2   :  { %1418 = vmatprep.subr.mxu1 %v1538_v0  ;;  %237 = vst.msk [vmem:[#allocation3] sm:$0xff] %vm235_vm4, %v232_v25  ;;  %1400 = vmatmul.mubr.msk.f32.vlgmr.msra.gmra.mxu0 %vm235_vm4, %v232_v25 }
  0xd3   :  { %1419 = vmatpush3.msra.mxu1 %v1295_v24  ;;  %1410 = vmatpush3.msra.mxu0 %v1293_v26 }
  0xd4   :  { %1413 = vmatprep.mubr.msk.f32.mxu0 %vm1539_vm2, %v1538_v0  ;;  %1411 = vmatprep.subr.mxu0 %v1538_v0 }
  0xd5   :  { %1421 = vmatmul.mubr.msk.f32.vlgmr.msra.gmra.mxu1 %vm235_vm4, %v232_v25  ;;  %1412 = vmatpush3.msra.mxu0 %v1292_v28 }
  0xd6   :  { %1429 = vmatprep.subr.bf16.mxu1 %v1538_v0  ;;  %1414 = vmatmul.mubr.msk.f32.vlgmr.msra.gmra.mxu0 %vm235_vm4, %v144_v19 }
  0xd7   :  { %1423 = vmatprep.subr.bf16.mxu0 %v1538_v0  ;;  %1425 = vmatprep.mubr.msk.bf16.mxu0 %vm1539_vm2, %v1538_v0 }
  0xd8   :  { %1431 = vmatprep.mubr.msk.bf16.mxu1 %vm1539_vm2, %v1538_v0 }
 0x190   :  { %v387_v32 = vpop.f32.mrf.mxu1 }
 0x191   :  { %v391_v33 = vpack.c.bf16 %v387_v32, %v387_v32 }
 0x192   :  { %v1408_v34 = vpop.f32.mrf.mxu1  ;;  %v309_v36 = vpop.f32.mrf.mxu0 }
 0x193   :  { %392 = vst.msk [vmem:[#allocation5] sm:$0xf] %vm314_vm5, %v391_v33  ;;  %v313_v37 = vpack.c.bf16 %v309_v36, %v309_v36 }
 0x194   :  { %v1401_v39 = vpop.f32.mrf.mxu0 }
 0x195   :  { %v538_v40 = vpop.f32.mrf.mxu1  ;;  %315 = vst.msk [vmem:[#allocation4] sm:$0xf] %vm314_vm5, %v313_v37 }
 0x196   :  { %v542_v42 = vpack.c.bf16 %v538_v40, %v538_v40  ;;  %v462_v43 = vpop.f32.mrf.mxu0 }
 0x197   :  { %v1422_v44 = vpop.f32.mrf.mxu1  ;;  %v466_v45 = vpack.c.bf16 %v462_v43, %v462_v43 }
 0x198   :  { %544 = vst.msk [vmem:[#allocation5 + $0x4] sm:$0xf] %vm314_vm5, %v542_v42  ;;  %v1415_v46 = vpop.f32.mrf.mxu0 }
 0x199   :  { %468 = vst.msk [vmem:[#allocation4 + $0x4] sm:$0xf] %vm314_vm5, %v466_v45 }
 0x19a   :  { %v582_v49 = vld [vmem:[#allocation5] sm:$0xf] }
 0x19b   :  { %v589_v52 = vsel %vm161_vm0, %v582_v49, 0  ;;  %v1311_v49 = vld [vmem:[%s1907_s1 + $0x18] sm:$0xff] }
 0x19c   :  { %1424 = vmatpush3.bf16.msra.mxu0 %v589_v52  ;;  %v581_v55 = vld [vmem:[#allocation4] sm:$0xf] }
 0x19d   :  { %1435 = vmatprep.subr.mxu0 %v686_v50  ;;  %v636_v58 = vsel %vm161_vm0, %v581_v55, 0 }
 0x19e   :  { %1430 = vmatpush3.bf16.msra.mxu1 %v636_v58 }
 0x19f   :  { %1426 = vmatmul.mubr.msk.bf16.vlgmr.msra.gmra.mxu0 %vm73_vm1, %v580_v54  ;;  %1454 = vmatprep.subr.bf16.mxu1 %v1538_v0 }
 0x1a0   :  { %1436 = vmatpush3.msra.mxu0 %v686_v50  ;;  %1451 = vmatprep.mubr.msk.f32.mxu0 %vm687_vm10, %v1760_v56  ;;  %v922_v4 = vld [vmem:[#allocation4 + $0x4] sm:$0xf]  ;;  %v1309_v50 = vld [vmem:[%s1908_s0 + $0x18] sm:$0xff] }
 0x1a1   :  { %1437 = vmatprep.subr.mxu0 %v685_v59  ;;  %1432 = vmatmul.mubr.msk.bf16.vlgmr.msra.gmra.mxu1 %vm73_vm1, %v1762_v57  ;;  %v976_v5 = vsel %vm161_vm0, %v922_v4, 0 }
 0x1a2   :  { %1438 = vmatpush3.msra.mxu0 %v685_v59  ;;  %1456 = vmatprep.mubr.msk.bf16.mxu1 %vm1539_vm2, %v1538_v0 }
 0x1a3   :  { %1439 = vmatprep.subr.mxu0 %v684_v60 }
 0x1a4   :  { %1440 = vmatpush3.msra.mxu0 %v684_v60 }
 0x1a5   :  { %1441 = vmatprep.subr.mxu0 %v683_v61 }
 0x1a6   :  { %1442 = vmatpush3.msra.mxu0 %v683_v61  ;;  %v910_v61 = vpop.permute.xlu0 %909 }
 0x1a7   :  { %1443 = vmatprep.subr.mxu0 %v682_v62  ;;  %vm914_vm6 = vcmp.eq.s32.totalorder %v1739_v35, %v910_v61 }
 0x1a8   :  { %1444 = vmatpush3.msra.mxu0 %v682_v62 }
 0x1a9   :  { %1445 = vmatprep.subr.mxu0 %v681_v63 }
 0x1aa   :  { %1446 = vmatpush3.msra.mxu0 %v681_v63  ;;  %v897_v62 = vpop.permute.xlu0 %896 }
 0x1ab   :  { %1447 = vmatprep.subr.mxu0 %v680_v1  ;;  %vm901_vm15 = vcmp.eq.s32.totalorder %v1739_v35, %v897_v62 }
 0x1ac   :  { %1448 = vmatpush3.msra.mxu0 %v680_v1 }
 0x1ad   :  { %1449 = vmatprep.subr.mxu0 %v679_v2 }
 0x1ae   :  { %1450 = vmatpush3.msra.mxu0 %v679_v2 }
 0x1af   :  { %1452 = vmatmul.mubr.msk.f32.vlgmr.msra.gmra.mxu0 %vm687_vm10, %v1797_v3  ;;  %1466 = vmatprep.subr.bf16.mxu0 %v1538_v0 }
 0x1b0   :  { %1467 = vmatpush3.bf16.msra.mxu0 %v976_v5  ;;  %1468 = vmatprep.mubr.msk.bf16.mxu0 %vm1539_vm2, %v1538_v0 }
 0x1b1   :  { %1491 = vmatprep.subr.bf16.mxu0 %v1538_v0 }
 0x25f   :  { %v625_v6 = vpop.f32.mrf.mxu0 }
 0x261   :  { %v1427_v7 = vpop.f32.mrf.mxu0  ;;  %v672_v8 = vpop.f32.mrf.mxu1 }
 0x262   :  { %v673_v17 = vadd.f32 %v672_v8, %v625_v6  ;;  %v924_v8 = vld [vmem:[#allocation5 + $0x4] sm:$0xf] }
 0x263   :  { %v628_v9 = vpop.f32.mrf.mxu0  ;;  %v1433_v10 = vpop.f32.mrf.mxu1 }
 0x264   :  { %v1325_v10 = vld [vmem:[%s1911_s11 + $0x78] sm:$0xff] }
 0x265   :  { %v1428_v11 = vpop.f32.mrf.mxu0  ;;  %v675_v12 = vpop.f32.mrf.mxu1 }
 0x266   :  { %v676_v14 = vadd.f32 %v675_v12, %v628_v9  ;;  %v929_v12 = vsel %vm161_vm0, %v924_v8, 0 }
 0x267   :  { %v1434_v13 = vpop.f32.mrf.mxu1 }
 0x268   :  { %v1312_v13 = vsel %vm901_vm15, 1.0, %v1538_v0 }
 0x26f   :  { %v1453_v15 = vpop.f32.mrf.mxu0 }
 0x270   :  { %v770_v18 = vadd.f32 %v1453_v15, %v676_v14 }
 0x271   :  { %v760_v19 = vpop.f32.mrf.mxu0 }
 0x272   :  { %v779_v20 = vadd.f32 %v1306_v16, %v770_v18  ;;  %v769_v21 = vadd.f32 %v760_v19, %v673_v17  ;;  %v1314_v17 = vsel %vm914_vm6, 1.0, %v1538_v0  ;;  %v1323_v19 = vld [vmem:[%s1911_s11 + $0x68] sm:$0xff] }
 0x274   :  { %v793_v22 = vmin.f32 %v779_v20, 20.0  ;;  %v778_v23 = vadd.f32 %v1306_v16, %v769_v21  ;;  %vm791_vm12 = vcmp.gt.f32.partialorder %v779_v20, 20.0  ;;  %v781_v51 = vsub.f32 0.0, %v779_v20  ;;  %v1321_v21 = vld [vmem:[%s1911_s11 + $0x58] sm:$0xff] }
 0x276   :  { %v796_v24 = vmul.f32 1.442695, %v793_v22  ;;  %v792_v25 = vmin.f32 %v778_v23, 20.0  ;;  %vm790_vm14 = vcmp.gt.f32.partialorder %v778_v23, 20.0  ;;  %v780_v52 = vsub.f32 0.0, %v778_v23  ;;  %v1320_v22 = vld [vmem:[%s1911_s11 + $0x50] sm:$0xff] }
 0x277   :  { %v784_v53 = vmul.f32 1.442695, %v781_v51 }
 0x278   :  { %v794_v26 = vmul.f32 1.442695, %v792_v25  ;;  %1504 = vpow2.f32 %v796_v24  ;;  %v782_v54 = vmul.f32 1.442695, %v780_v52 }
 0x27a   :  { %1506 = vpow2.f32 %v794_v26 }
 0x285   :  { %v1505_v27 = vpop.eup %1504 }
 0x286   :  { %v807_v28 = vadd.f32 1.0, %v1505_v27  ;;  %v810_v32 = vmul.f32 -0.5, %v1505_v27  ;;  %v813_v36 = vand.u32 2147483647, %v1505_v27 }
 0x287   :  { %v1507_v29 = vpop.eup %1506 }
 0x288   :  { %1508 = vlog2.f32 %v807_v28  ;;  %v798_v31 = vadd.f32 1.0, %v1507_v29  ;;  %v801_v33 = vmul.f32 -0.5, %v1507_v29  ;;  %v811_v34 = vadd.f32 1.0, %v810_v32 }
 0x289   :  { %v804_v39 = vand.u32 2147483647, %v1507_v29  ;;  %vm814_vm11 = vcmp.lt.f32.partialorder %v813_v36, 0.0004427343 }
 0x28a   :  { %1510 = vlog2.f32 %v798_v31  ;;  %v802_v37 = vadd.f32 1.0, %v801_v33  ;;  %v812_v41 = vmul.f32 %v1505_v27, %v811_v34 }
 0x28b   :  { %vm805_vm13 = vcmp.lt.f32.partialorder %v804_v39, 0.0004427343  ;;  %1512 = vpow2.f32 %v784_v53 }
 0x28c   :  { %v803_v45 = vmul.f32 %v1507_v29, %v802_v37  ;;  %1514 = vpow2.f32 %v782_v54 }
 0x295   :  { %v1509_v38 = vpop.eup %1508 }
 0x296   :  { %v809_v40 = vmul.f32 0.6931472, %v1509_v38 }
 0x297   :  { %v1511_v42 = vpop.eup %1510 }
 0x298   :  { %v815_v43 = vsel %vm814_vm11, %v812_v41, %v809_v40  ;;  %v800_v44 = vmul.f32 0.6931472, %v1511_v42  ;;  %v1513_v55 = vpop.eup %1512  ;;  %v1329_v40 = vld [vmem:[%s1913_s12 + $0x1] ss:$0 sm:$0xff]  ;;  %s1542_s12 = smov 16  }
 0x299   :  { %v817_v46 = vsel %vm791_vm12, %v779_v20, %v815_v43  ;;  %v1515_v58 = vpop.eup %1514  ;;  %v787_v59 = vadd.f32 1.0, %v1513_v55  ;;  %v1322_v20 = vld [vmem:[%s1911_s11 + $0x60] sm:$0xff] }
 0x29a   :  { %822 = vrot.lane.b32.xlu1 %v817_v46, %s1541_s10  ;;  %v806_v47 = vsel %vm805_vm13, %v803_v45, %v800_v44  ;;  %v786_v60 = vadd.f32 1.0, %v1515_v58 }
 0x29b   :  { %v816_v48 = vsel %vm790_vm14, %v778_v23, %v806_v47  ;;  %1516 = vrcp.f32 %v787_v59  ;;  %v1318_v23 = vld [vmem:[%s1911_s11 + $0x40] sm:$0xff] }
 0x29c   :  { %820 = vrot.lane.b32.xlu0 %v816_v48, %s1541_s10  ;;  %1518 = vrcp.f32 %v786_v60 }
 0x29e   :  { %912 = vperm.xlu1 %1503, %v1311_v49  }
 0x2a2   :  { %899 = vperm.xlu1 %1503, %v1309_v50  }
 0x2a8   :  { %v1517_v1 = vpop.eup %1516 }
 0x2a9   :  { %v1519_v2 = vpop.eup %1518 }
 0x2ba   :  { %829 = vxpose.xlu0.c.b16.start.end [1/1] (short) (narrow) %v1762_v57, 16 }
 0x30c   :  { %v823_v63 = vpop.permute.xlu1 %822 }
 0x30d   :  { %v827_v5 = vmul.f32 %v1517_v1, %v823_v63 }
 0x30e   :  { %v821_v4 = vpop.permute.xlu0 %820 }
 0x30f   :  { %v826_v57 = vmul.f32 %v1519_v2, %v821_v4 }
 0x311   :  { %v828_v6 = vpack.c.bf16 %v827_v5, %v826_v57 }
 0x313   :  { %1455 = vmatpush3.bf16.msra.mxu1 %v828_v6 }
 0x314   :  { %1460 = vmatprep.subr.bf16.mxu1 %v1538_v0 }
 0x319   :  { %v913_v7 = vpop.permute.xlu1 %912 }
 0x31a   :  { %vm915_vm3 = vcmp.eq.s32.totalorder %v1739_v35, %v913_v7 }
 0x31b   :  { %v1315_v15 = vsel %vm915_vm3, 1.0, %v1538_v0 }
 0x31c   :  { %v837_v9 = vpop.trf.xlu0  ;;  %v920_v18 = vpack.c.bf16 %v1315_v15, %v1314_v17 }
 0x31d   :  { %v900_v11 = vpop.permute.xlu1 %899  ;;  %1457 = vmatmul.mubr.msk.bf16.vlgmr.msra.gmra.mxu1 %vm235_vm4, %v837_v9 }
 0x31e   :  { %vm902_vm5 = vcmp.eq.s32.totalorder %v1739_v35, %v900_v11  ;;  %1461 = vmatpush3.bf16.msra.mxu1 %v929_v12  ;;  %1462 = vmatprep.mubr.msk.bf16.mxu1 %vm1539_vm2, %v1538_v0  ;;  %v1324_v35 = vld [vmem:[%s1911_s11 + $0x70] sm:$0xff] }
 0x31f   :  { %v1313_v14 = vsel %vm902_vm5, 1.0, %v1538_v0  ;;  %1472 = vmatprep.subr.mxu1 %v1325_v10 }
 0x320   :  { %v1833_v16 = vpack.c.bf16 %v1313_v14, %v1312_v13 }
 0x322   :  { %1469 = vmatmul.mubr.msk.bf16.vlgmr.msra.gmra.mxu0 %vm73_vm1, %v1833_v16 }
 0x323   :  { %1493 = vmatprep.mubr.msk.bf16.mxu0 %vm1539_vm2, %v1538_v0 }
 0x325   :  { %1463 = vmatmul.mubr.msk.bf16.vlgmr.msra.gmra.mxu1 %vm73_vm1, %v920_v18 }
 0x326   :  { %1473 = vmatpush3.msra.mxu1 %v1325_v10  ;;  %1488 = vmatprep.mubr.msk.f32.mxu1 %vm687_vm10, %v1760_v56  ;;  %v1319_v56 = vld [vmem:[%s1911_s11 + $0x48] sm:$0xff] }
 0x327   :  { %1474 = vmatprep.subr.mxu1 %v1324_v35 }
 0x328   :  { %1475 = vmatpush3.msra.mxu1 %v1324_v35 }
 0x329   :  { %1476 = vmatprep.subr.mxu1 %v1323_v19 }
 0x32a   :  { %1477 = vmatpush3.msra.mxu1 %v1323_v19 }
 0x32b   :  { %1478 = vmatprep.subr.mxu1 %v1322_v20 }
 0x32c   :  { %1479 = vmatpush3.msra.mxu1 %v1322_v20 }
 0x32d   :  { %1480 = vmatprep.subr.mxu1 %v1321_v21 }
 0x32e   :  { %1481 = vmatpush3.msra.mxu1 %v1321_v21 }
 0x32f   :  { %1482 = vmatprep.subr.mxu1 %v1320_v22 }
 0x330   :  { %1483 = vmatpush3.msra.mxu1 %v1320_v22 }
 0x331   :  { %1484 = vmatprep.subr.mxu1 %v1319_v56 }
 0x332   :  { %1485 = vmatpush3.msra.mxu1 %v1319_v56 }
 0x333   :  { %1486 = vmatprep.subr.mxu1 %v1318_v23 }
 0x334   :  { %1487 = vmatpush3.msra.mxu1 %v1318_v23 }
 0x335   :  { %1489 = vmatmul.mubr.msk.f32.vlgmr.msra.gmra.mxu1 %vm687_vm10, %v1797_v3 }
 0x3dd   :  { %v1866_v24 = vpop.f32.mrf.mxu1 }
 0x3df   :  { %v1458_v25 = vpop.f32.mrf.mxu1 }
 0x3e1   :  { %v886_v26 = vpop.f32.mrf.mxu1 }
 0x3e2   :  { %v1012_v27 = vpop.f32.mrf.mxu0 }
 0x3e3   :  { %v1459_v28 = vpop.f32.mrf.mxu1 }
 0x3e4   :  { %v1470_v29 = vpop.f32.mrf.mxu0 }
 0x3e5   :  { %v965_v31 = vpop.f32.mrf.mxu1  ;;  %v1238_v29 = vld [vmem:[%s1914_s16] sm:$0x1] }
 0x3e6   :  { %v1015_v32 = vpop.f32.mrf.mxu0  ;;  %v1013_v3 = vadd.f32 %v1012_v27, %v965_v31  ;;  %v1242_v27 = vld [vmem:[#allocation2] sm:$0xff]  ;;  %v1239_v31 = vadd.f32 1e-05, %v1238_v29 }
 0x3e7   :  { %v1464_v33 = vpop.f32.mrf.mxu1 }
 0x3e8   :  { %v1471_v34 = vpop.f32.mrf.mxu0 }
 0x3e9   :  { %v968_v36 = vpop.f32.mrf.mxu1 }
 0x3ea   :  { %v1016_v38 = vadd.f32 %v1015_v32, %v968_v36  ;;  %v1223_v32 = vld [vmem:[#allocation6] sm:$0xff]  ;;  %v1258_v36 = vshrl.u32 %v549_v30, 7 }
 0x3eb   :  { %v1465_v37 = vpop.f32.mrf.mxu1  ;;  %v1333_v30 = vld [vmem:[%s1918_s14] ss:$0 sm:$0xff] }
 0x3ec   :  { %v1259_v37 = vsub.s32 0, %v1258_v36 }
 0x3f5   :  { %v1490_v39 = vpop.f32.mrf.mxu1 }
 0x3f6   :  { %v1104_v41 = vadd.f32 %v1490_v39, %v1016_v38  ;;  %v1236_v39 = vld [vmem:[%s1915_s17] sm:$0xff] }
 0x3f7   :  { %v1094_v42 = vpop.f32.mrf.mxu1 }
 0x3f8   :  { %v1114_v43 = vadd.f32 %v1329_v40, %v1104_v41  ;;  %v1103_v44 = vadd.f32 %v1094_v42, %v1013_v3  ;;  %v1331_v3 = vld [vmem:[%s1916_s15] ss:$0 sm:$0xff] }
 0x3fa   :  { %v1128_v45 = vmin.f32 %v1114_v43, 20.0  ;;  %v1113_v46 = vadd.f32 %v1329_v40, %v1103_v44  ;;  %vm1126_vm1 = vcmp.gt.f32.partialorder %v1114_v43, 20.0  ;;  %v1116_v9 = vsub.f32 0.0, %v1114_v43 }
 0x3fc   :  { %v1131_v47 = vmul.f32 1.442695, %v1128_v45  ;;  %v1127_v48 = vmin.f32 %v1113_v46, 20.0  ;;  %vm1125_vm7 = vcmp.gt.f32.partialorder %v1113_v46, 20.0  ;;  %v1115_v10 = vsub.f32 0.0, %v1113_v46 }
 0x3fd   :  { %v1119_v11 = vmul.f32 1.442695, %v1116_v9 }
 0x3fe   :  { %v1129_v49 = vmul.f32 1.442695, %v1127_v48  ;;  %1520 = vpow2.f32 %v1131_v47  ;;  %v1117_v12 = vmul.f32 1.442695, %v1115_v10  ;;  %v1241_v47 = vld [vmem:[#allocation3] sm:$0xff] }
 0x400   :  { %1522 = vpow2.f32 %v1129_v49 }
 0x40b   :  { %v1521_v50 = vpop.eup %1520 }
 0x40c   :  { %v1142_v51 = vadd.f32 1.0, %v1521_v50  ;;  %v1145_v54 = vmul.f32 -0.5, %v1521_v50  ;;  %v1148_v59 = vand.u32 2147483647, %v1521_v50 }
 0x40d   :  { %v1523_v52 = vpop.eup %1522 }
 0x40e   :  { %1524 = vlog2.f32 %v1142_v51  ;;  %v1133_v53 = vadd.f32 1.0, %v1523_v52  ;;  %v1136_v55 = vmul.f32 -0.5, %v1523_v52  ;;  %v1146_v58 = vadd.f32 1.0, %v1145_v54 }
 0x40f   :  { %v1139_v62 = vand.u32 2147483647, %v1523_v52  ;;  %vm1149_vm0 = vcmp.lt.f32.partialorder %v1148_v59, 0.0004427343 }
 0x410   :  { %1526 = vlog2.f32 %v1133_v53  ;;  %v1137_v60 = vadd.f32 1.0, %v1136_v55  ;;  %v1147_v1 = vmul.f32 %v1521_v50, %v1146_v58 }
 0x411   :  { %vm1140_vm2 = vcmp.lt.f32.partialorder %v1139_v62, 0.0004427343  ;;  %1528 = vpow2.f32 %v1119_v11 }
 0x412   :  { %v1138_v57 = vmul.f32 %v1523_v52, %v1137_v60  ;;  %1530 = vpow2.f32 %v1117_v12 }
 0x41b   :  { %v1525_v61 = vpop.eup %1524 }
 0x41c   :  { %v1144_v63 = vmul.f32 0.6931472, %v1525_v61 }
 0x41d   :  { %v1527_v2 = vpop.eup %1526 }
 0x41e   :  { %v1150_v4 = vsel %vm1149_vm0, %v1147_v1, %v1144_v63  ;;  %v1135_v5 = vmul.f32 0.6931472, %v1527_v2  ;;  %v1529_v13 = vpop.eup %1528 }
 0x41f   :  { %v1152_v6 = vsel %vm1126_vm1, %v1114_v43, %v1150_v4  ;;  %v1531_v14 = vpop.eup %1530  ;;  %v1122_v15 = vadd.f32 1.0, %v1529_v13 }
 0x420   :  { %1157 = vrot.lane.b32.xlu1 %v1152_v6, %s1541_s10  ;;  %v1141_v7 = vsel %vm1140_vm2, %v1138_v57, %v1135_v5  ;;  %v1121_v17 = vadd.f32 1.0, %v1531_v14 }
 0x421   :  { %v1151_v8 = vsel %vm1125_vm7, %v1113_v46, %v1141_v7  ;;  %1532 = vrcp.f32 %v1122_v15 }
 0x422   :  { %1534 = vrcp.f32 %v1121_v17 }
 0x423   :  { %1536 = vrsqrt.f32 %v1239_v31 }
 0x424   :  { %1155 = vrot.lane.b32.xlu1 %v1151_v8, %s1541_s10 }
 0x42e   :  { %v1533_v35 = vpop.eup %1532 }
 0x42f   :  { %v1535_v19 = vpop.eup %1534 }
 0x430   :  { %v1537_v38 = vpop.eup %1536 }
 0x431   :  { %v1260_v42 = vrot.slane %v1537_v38, %v1259_v37 }
 0x447   :  { %1164 = vxpose.xlu1.c.b16.start.end [1/1] (short) (narrow) %v1833_v16, 16 }
 0x492   :  { %v1158_v18 = vpop.permute.xlu1 %1157 }
 0x493   :  { %v1162_v21 = vmul.f32 %v1533_v35, %v1158_v18 }
 0x496   :  { %v1156_v20 = vpop.permute.xlu1 %1155 }
 0x497   :  { %v1161_v22 = vmul.f32 %v1535_v19, %v1156_v20 }
 0x499   :  { %v1163_v56 = vpack.c.bf16 %v1162_v21, %v1161_v22 }
 0x49b   :  { %1492 = vmatpush3.bf16.msra.mxu0 %v1163_v56 }
 0x4a9   :  { %v1172_v16 = vpop.trf.xlu1 }
 0x4aa   :  { %1494 = vmatmul.mubr.msk.bf16.vlgmr.msra.gmra.mxu0 %vm235_vm4, %v1172_v16 }
 0x56a   :  { %v1217_v23 = vpop.f32.mrf.mxu0 }
 0x56b   :  { %1225 = vrot.lane.b32.xlu0 %v1217_v23, %s1542_s12 }
 0x56c   :  { %v1495_v25 = vpop.f32.mrf.mxu0 }
 0x56e   :  { %v1220_v26 = vpop.f32.mrf.mxu0 }
 0x56f   :  { %1244 = vrot.lane.b32.xlu0 %v1242_v27, %s1542_s12 }
 0x570   :  { %v1496_v28 = vpop.f32.mrf.mxu0 }
 0x5dd   :  { %v1226_v33 = vpop.permute.xlu0 %1225 }
 0x5de   :  { %v1228_v34 = vsel %vm235_vm4, %v1866_v24, %v1226_v33  ;;  %v1332_v24 = vld [vmem:[%s1917_s13] ss:$0 sm:$0xff] }
 0x5df   :  { %v1229_v0 = vadd.f32 %v1228_v34, %v1223_v32 }
 0x5e1   :  { %1231 = vst.msk [vmem:[#allocation6] sm:$0xff] %vm545_vm8, %v1229_v0  ;;  %v1245_v46 = vpop.permute.xlu0 %1244 }
 0x5e2   :  { %v1247_v49 = vsel %vm235_vm4, %v1241_v47, %v1245_v46 }
 0x5e8   :  { %v1235_v40 = vld [vmem:[#allocation6] sm:$0xff] }
 0x5e9   :  { %v1237_v41 = vmul.f32 %v1236_v39, %v1235_v40 }
 0x5eb   :  { %v1255_v43 = vsub.f32 %v1237_v41, %v1331_v3 }
 0x5ed   :  { %v1262_v44 = vmul.f32 %v1260_v42, %v1255_v43 }
 0x5ef   :  { %v1270_v45 = vmul.f32 %v1332_v24, %v1262_v44 }
 0x5f1   :  { %v1278_v48 = vadd.f32 %v1333_v30, %v1270_v45 }
 0x5f3   :  { %v1279_v50 = vadd.f32 %v1278_v48, %v1247_v49 }
 0x5f5   :  { %1280 = vst.msk [vmem:[%s1919_s18] sm:$0xff] %vm545_vm8, %v1279_v50 }

// kernel: model_forward.6
= control target key start
LH: loop header
LB: loop body
LE: loop exit
PB: predicated region body
PF: predicated region fallthrough
CT: control target
= control target key end

     0   :  { %v1535_v0 = vmov 0.0   ;;  %vm74_vm0 = vcmask 130048   ;;  %vm1536_vm1 = vmmov 0   ;;  %v1537_v11 = vmov 0   ;;  %s1902_s5 = inlined_call_operand.vmem [shape: f32[16,16], index: 5, kind: input, shape index: {}, may-alias: {5,7}]   ;;  %s1903_s7 = inlined_call_operand.vmem [shape: f32[16,16], index: 7, kind: input, shape index: {}, may-alias: {5,7}]   ;;  %s1904_s3 = inlined_call_operand.vmem [shape: f32[8,16], index: 3, kind: input, shape index: {}]   ;;  %s1905_s4 = inlined_call_operand.vmem [shape: f32[8,16], index: 4, kind: input, shape index: {}]   ;;  %s1906_s10 = inlined_call_operand.vmem [shape: f32[2,16,32], index: 10, kind: input, shape index: {}]   ;;  %s1907_s9 = inlined_call_operand.vmem [shape: f32[2,16,32], index: 9, kind: input, shape index: {}]   ;;  %s1908_s1 = inlined_call_operand.vmem [shape: s32[2,16,1], index: 1, kind: input, shape index: {}]   ;;  %s1909_s0 = inlined_call_operand.vmem [shape: s32[2,16,1], index: 0, kind: input, shape index: {}]   ;;  %s1910_s6 = inlined_call_operand.vmem [shape: f32[1,16], index: 6, kind: input, shape index: {}, may-alias: {6,8}]   ;;  %s1911_s8 = inlined_call_operand.vmem [shape: f32[1,16], index: 8, kind: input, shape index: {}, may-alias: {6,8}]   ;;  %s1912_s11 = inlined_call_operand.vmem [shape: f32[2,64,32], index: 11, kind: input, shape index: {}]   ;;  %s1913_s2 = inlined_call_operand.vmem [shape: f32[16,64], index: 2, kind: input, shape index: {}]   ;;  %s1914_s12 = inlined_call_operand.vmem [shape: f32[2,1,32], index: 12, kind: input, shape index: {}]   ;;  %s1915_s16 = inlined_call_operand.vmem [shape: f32[1,32], index: 16, kind: input, shape index: {}]   ;;  %s1916_s17 = inlined_call_operand.vmem [shape: f32[8,32], index: 17, kind: input, shape index: {}]   ;;  %s1917_s15 = inlined_call_operand.vmem [shape: f32[1,32], index: 15, kind: input, shape index: {}]   ;;  %s1918_s13 = inlined_call_operand.vmem [shape: f32[1,32], index: 13, kind: input, shape index: {}]   ;;  %s1919_s14 = inlined_call_operand.vmem [shape: f32[1,32], index: 14, kind: input, shape index: {}]   ;;  %s1920_s18 = inlined_call_operand.vmem [shape: f32[8,32], index: 18, kind: output, shape index: {}]  }
   0x1   :  { %1923 = sst [smem:[#allocation7_spill]] %s1902_s5  ;;  %1378 = vmatprep.subr.mxu0 %v1535_v0  ;;  %1385 = vmatprep.subr.mxu1 %v1535_v0  ;;  %v148_v6 = vld [vmem:[%s1905_s4] sm:$0xff]  ;;  %v312_v7 = vld [vmem:[%s1906_s10 + $0x8] sm:$0xff]  ;;  %v1304_v16 = vld [vmem:[%s1908_s1 + $0x10] sm:$0xff]  ;;  %v544_v31 = vlaneseq  ;;  %vm309_vm2 = vcmask 257024   ;;  %vm582_vm7 = vcmask 1043456  }
   0x2   :  { %1924 = sst [smem:[#allocation8_spill]] %s1903_s7  ;;  %1382 = vmatprep.mubr.msk.f32.mxu0 %vm1536_vm1, %v1535_v0  ;;  %1389 = vmatprep.mubr.msk.f32.mxu1 %vm1536_vm1, %v1535_v0  ;;  %v234_v8 = vld [vmem:[%s1907_s9 + $0x8] sm:$0xff]  ;;  %v311_v9 = vld [vmem:[%s1906_s10] sm:$0xff]  ;;  %v1302_v17 = vld [vmem:[%s1909_s0 + $0x10] sm:$0xff]  ;;  %vm578_vm8 = vcmask 64512   ;;  %vm682_vm9 = vcmask 523264  }
   0x3   :  { %1925 = sst [smem:[#allocation9_spill]] %s1904_s3  ;;  %v233_v10 = vld [vmem:[%s1907_s9] sm:$0xff]  ;;  %1499 = vset.pattern.permute.xlu0 %v1537_v11  ;;  %1500 = vset.pattern.permute.xlu1 %v1537_v11  ;;  %v549_v14 = vld [vmem:[%s1908_s1 + $0x8] sm:$0xff]  ;;  %v1287_v24 = vld [vmem:[%s1907_s9 + $0x18] sm:$0xff]  ;;  %v1740_v38 = vand.u32 127, %v544_v31 }
   0x4   :  { %s1926_s29 = sld [smem:[#allocation7_spill]]  ;;  %v548_v12 = vld [vmem:[%s1908_s1] sm:$0xff]  ;;  %v547_v15 = vld [vmem:[%s1909_s0 + $0x8] sm:$0xff]  ;;  %v1290_v26 = vld [vmem:[%s1906_s10 + $0x18] sm:$0xff] }
   0x5   :  { %s1927_s19 = sld [smem:[#allocation8_spill]]  ;;  %564 = vperm.xlu0 %1499, %v548_v12   ;;  %v546_v13 = vld [vmem:[%s1909_s0] sm:$0xff]  ;;  %v1286_v28 = vld [vmem:[%s1907_s9 + $0x10] sm:$0xff]  ;;  %v681_v54 = vld [vmem:[%s1912_s11 + $0x38] sm:$0xff] }
   0x6   :  { %s1928_s24 = sld [smem:[#allocation9_spill]]  ;;  %551 = vperm.xlu1 %1500, %v546_v13   ;;  %v1280_v18 = vld [vmem:[%s1910_s6] ss:$0 sm:$0xff]  ;;  %v1289_v29 = vld [vmem:[%s1906_s10 + $0x10] sm:$0xff]  ;;  %v679_v61 = vld [vmem:[%s1912_s11 + $0x28] sm:$0xff]  ;;  %s1538_s10 = smov 112  }
   0x7   :  { %v1282_v19 = vld [vmem:[%s1911_s8] ss:$0 sm:$0xff]  ;;  %v680_v60 = vld [vmem:[%s1912_s11 + $0x30] sm:$0xff]  ;;  %v677_v63 = vld [vmem:[%s1912_s11 + $0x18] sm:$0xff] }
   0x8   :  { %v1764_v59 = vld [vmem:[%s1913_s2] sm:$0xff] }
   0x9   :  { %567 = vperm.xlu0 %1499, %v549_v14   ;;  %v678_v62 = vld [vmem:[%s1912_s11 + $0x20] sm:$0xff] }
   0xa   :  { %v66_v1 = vld [vmem:[%s1926_s29 + $0x8] sm:$0xff]  ;;  %v65_v3 = vld [vmem:[%s1926_s29] sm:$0xff]  ;;  %554 = vperm.xlu1 %1500, %v547_v15  }
   0xb   :  { %v150_v2 = vld [vmem:[%s1927_s19 + $0x8] sm:$0xff]  ;;  %1379 = vmatpush3.msra.mxu0 %v66_v1  ;;  %v149_v4 = vld [vmem:[%s1927_s19] sm:$0xff]  ;;  %v676_v1 = vld [vmem:[%s1912_s11 + $0x10] sm:$0xff] }
   0xc   :  { %1386 = vmatpush3.msra.mxu1 %v150_v2  ;;  %1380 = vmatprep.subr.mxu0 %v1535_v0  ;;  %v64_v5 = vld [vmem:[%s1928_s24] sm:$0xff]  ;;  %v675_v2 = vld [vmem:[%s1912_s11 + $0x8] sm:$0xff] }
   0xd   :  { %1387 = vmatprep.subr.mxu1 %v1535_v0  ;;  %1381 = vmatpush3.msra.mxu0 %v65_v3  ;;  %v674_v3 = vld [vmem:[%s1912_s11] sm:$0xff] }
   0xe   :  { %1388 = vmatpush3.msra.mxu1 %v149_v4  ;;  %1383 = vmatmul.mubr.msk.f32.vlgmr.msra.gmra.mxu0 %vm74_vm0, %v64_v5  ;;  %v1798_v4 = vld [vmem:[%s1913_s2 + $0x8] sm:$0xff] }
   0xf   :  { %1390 = vmatmul.mubr.msk.f32.vlgmr.msra.gmra.mxu1 %vm74_vm0, %v148_v6  ;;  %1399 = vmatprep.subr.mxu1 %v1535_v0 }
  0x10   :  { %1392 = vmatprep.subr.mxu0 %v1535_v0  ;;  %1400 = vmatpush3.msra.mxu1 %v312_v7 }
  0x11   :  { %1396 = vmatprep.mubr.msk.f32.mxu0 %vm1536_vm1, %v1535_v0  ;;  %1401 = vmatprep.subr.mxu1 %v1535_v0 }
  0x12   :  { %1403 = vmatprep.mubr.msk.f32.mxu1 %vm1536_vm1, %v1535_v0  ;;  %1393 = vmatpush3.msra.mxu0 %v234_v8 }
  0x13   :  { %1394 = vmatprep.subr.mxu0 %v1535_v0  ;;  %1402 = vmatpush3.msra.mxu1 %v311_v9 }
  0x14   :  { %1395 = vmatpush3.msra.mxu0 %v233_v10  ;;  %1413 = vmatprep.subr.mxu1 %v1535_v0 }
  0x15   :  { %1406 = vmatprep.subr.mxu0 %v1535_v0  ;;  %904 = vperm.xlu0 %1499, %v1304_v16  }
  0x19   :  { %891 = vperm.xlu0 %1499, %v1302_v17   ;;  %v1300_v17 = vld [vmem:[%s1914_s12] ss:$0 sm:$0xff] }
  0x80   :  { %v565_v32 = vpop.permute.xlu0 %564 }
  0x81   :  { %v552_v30 = vpop.permute.xlu1 %551  ;;  %vm569_vm5 = vcmp.eq.s32.totalorder %v1740_v38, %v565_v32 }
  0x82   :  { %vm556_vm3 = vcmp.eq.s32.totalorder %v1740_v38, %v552_v30  ;;  %v1294_v50 = vsel %vm569_vm5, 1.0, %v1535_v0 }
  0x83   :  { %v1292_v47 = vsel %vm556_vm3, 1.0, %v1535_v0 }
  0x84   :  { %v568_v42 = vpop.permute.xlu0 %567 }
  0x85   :  { %v555_v37 = vpop.permute.xlu1 %554  ;;  %vm570_vm6 = vcmp.eq.s32.totalorder %v1740_v38, %v568_v42 }
  0x86   :  { %vm557_vm4 = vcmp.eq.s32.totalorder %v1740_v38, %v555_v37  ;;  %v1295_v51 = vsel %vm570_vm6, 1.0, %v1535_v0 }
  0x87   :  { %v1293_v48 = vsel %vm557_vm4, 1.0, %v1535_v0  ;;  %v575_v58 = vpack.c.bf16 %v1295_v51, %v1294_v50  ;;  %v1305_v50 = vld [vmem:[%s1908_s1 + $0x18] sm:$0xff] }
  0x88   :  { %v1757_v55 = vpack.c.bf16 %v1293_v48, %v1292_v47  ;;  %v1303_v51 = vld [vmem:[%s1909_s0 + $0x18] sm:$0xff] }
  0xce   :  { %v144_v20 = vpop.f32.mrf.mxu0 }
  0xcf   :  { %v227_v21 = vpop.f32.mrf.mxu1  ;;  %v145_v22 = vadd.f32 %v1280_v18, %v144_v20 }
  0xd0   :  { %v228_v23 = vadd.f32 %v1282_v19, %v227_v21  ;;  %v1384_v25 = vpop.f32.mrf.mxu0 }
  0xd1   :  { %v1391_v27 = vpop.f32.mrf.mxu1  ;;  %231 = vst.msk [vmem:[#allocation2] sm:$0xff] %vm74_vm0, %v145_v22  ;;  %1404 = vmatmul.mubr.msk.f32.vlgmr.msra.gmra.mxu1 %vm74_vm0, %v145_v22 }
  0xd2   :  { %232 = vst.msk [vmem:[#allocation3] sm:$0xff] %vm74_vm0, %v228_v23  ;;  %1397 = vmatmul.mubr.msk.f32.vlgmr.msra.gmra.mxu0 %vm74_vm0, %v228_v23  ;;  %1414 = vmatpush3.msra.mxu1 %v1290_v26 }
  0xd3   :  { %1407 = vmatpush3.msra.mxu0 %v1287_v24  ;;  %1410 = vmatprep.mubr.msk.f32.mxu0 %vm1536_vm1, %v1535_v0 }
  0xd4   :  { %1408 = vmatprep.subr.mxu0 %v1535_v0  ;;  %1415 = vmatprep.subr.mxu1 %v1535_v0 }
  0xd5   :  { %1409 = vmatpush3.msra.mxu0 %v1286_v28  ;;  %1416 = vmatpush3.msra.mxu1 %v1289_v29 }
  0xd6   :  { %1411 = vmatmul.mubr.msk.f32.vlgmr.msra.gmra.mxu0 %vm74_vm0, %v145_v22  ;;  %1417 = vmatprep.mubr.msk.f32.mxu1 %vm1536_vm1, %v1535_v0 }
  0xd7   :  { %1420 = vmatprep.subr.bf16.mxu0 %v1535_v0  ;;  %1418 = vmatmul.mubr.msk.f32.vlgmr.msra.gmra.mxu1 %vm74_vm0, %v228_v23 }
  0xd8   :  { %1426 = vmatprep.subr.bf16.mxu1 %v1535_v0  ;;  %1422 = vmatprep.mubr.msk.bf16.mxu0 %vm1536_vm1, %v1535_v0 }
  0xd9   :  { %1428 = vmatprep.mubr.msk.bf16.mxu1 %vm1536_vm1, %v1535_v0 }
 0x191   :  { %v382_v34 = vpop.f32.mrf.mxu1 }
 0x192   :  { %v304_v33 = vpop.f32.mrf.mxu0  ;;  %v386_v36 = vpack.c.bf16 %v382_v34, %v382_v34 }
 0x193   :  { %v308_v35 = vpack.c.bf16 %v304_v33, %v304_v33  ;;  %v1405_v40 = vpop.f32.mrf.mxu1 }
 0x194   :  { %v1398_v39 = vpop.f32.mrf.mxu0  ;;  %387 = vst.msk [vmem:[#allocation5] sm:$0xf] %vm309_vm2, %v386_v36 }
 0x195   :  { %310 = vst.msk [vmem:[#allocation4] sm:$0xf] %vm309_vm2, %v308_v35 }
 0x196   :  { %v457_v41 = vpop.f32.mrf.mxu0 }
 0x197   :  { %v461_v43 = vpack.c.bf16 %v457_v41, %v457_v41  ;;  %v533_v45 = vpop.f32.mrf.mxu1 }
 0x198   :  { %v1412_v44 = vpop.f32.mrf.mxu0  ;;  %v537_v46 = vpack.c.bf16 %v533_v45, %v533_v45 }
 0x199   :  { %463 = vst.msk [vmem:[#allocation4 + $0x4] sm:$0xf] %vm309_vm2, %v461_v43  ;;  %v1419_v49 = vpop.f32.mrf.mxu1 }
 0x19a   :  { %539 = vst.msk [vmem:[#allocation5 + $0x4] sm:$0xf] %vm309_vm2, %v537_v46 }
 0x19b   :  { %v577_v52 = vld [vmem:[#allocation5] sm:$0xf] }
 0x19c   :  { %v576_v53 = vld [vmem:[#allocation4] sm:$0xf]  ;;  %v584_v56 = vsel %vm582_vm7, %v577_v52, 0 }
 0x19d   :  { %v631_v57 = vsel %vm582_vm7, %v576_v53, 0  ;;  %1421 = vmatpush3.bf16.msra.mxu0 %v584_v56 }
 0x19e   :  { %1427 = vmatpush3.bf16.msra.mxu1 %v631_v57  ;;  %1432 = vmatprep.subr.mxu0 %v681_v54 }
 0x19f   :  { %1451 = vmatprep.subr.bf16.mxu1 %v1535_v0 }
 0x1a0   :  { %1423 = vmatmul.mubr.msk.bf16.vlgmr.msra.gmra.mxu0 %vm578_vm8, %v575_v58  ;;  %v917_v5 = vld [vmem:[#allocation4 + $0x4] sm:$0xf] }
 0x1a1   :  { %1429 = vmatmul.mubr.msk.bf16.vlgmr.msra.gmra.mxu1 %vm578_vm8, %v1757_v55  ;;  %1433 = vmatpush3.msra.mxu0 %v681_v54  ;;  %v971_v6 = vsel %vm582_vm7, %v917_v5, 0 }
 0x1a2   :  { %1448 = vmatprep.mubr.msk.f32.mxu0 %vm682_vm9, %v1764_v59  ;;  %1434 = vmatprep.subr.mxu0 %v680_v60 }
 0x1a3   :  { %1453 = vmatprep.mubr.msk.bf16.mxu1 %vm1536_vm1, %v1535_v0  ;;  %1435 = vmatpush3.msra.mxu0 %v680_v60 }
 0x1a4   :  { %1436 = vmatprep.subr.mxu0 %v679_v61 }
 0x1a5   :  { %1437 = vmatpush3.msra.mxu0 %v679_v61 }
 0x1a6   :  { %1438 = vmatprep.subr.mxu0 %v678_v62 }
 0x1a7   :  { %1439 = vmatpush3.msra.mxu0 %v678_v62  ;;  %v905_v62 = vpop.permute.xlu0 %904 }
 0x1a8   :  { %1440 = vmatprep.subr.mxu0 %v677_v63  ;;  %vm909_vm3 = vcmp.eq.s32.totalorder %v1740_v38, %v905_v62 }
 0x1a9   :  { %1441 = vmatpush3.msra.mxu0 %v677_v63 }
 0x1aa   :  { %1442 = vmatprep.subr.mxu0 %v676_v1 }
 0x1ab   :  { %1443 = vmatpush3.msra.mxu0 %v676_v1  ;;  %v892_v63 = vpop.permute.xlu0 %891 }
 0x1ac   :  { %1444 = vmatprep.subr.mxu0 %v675_v2  ;;  %vm896_vm14 = vcmp.eq.s32.totalorder %v1740_v38, %v892_v63 }
 0x1ad   :  { %1445 = vmatpush3.msra.mxu0 %v675_v2 }
 0x1ae   :  { %1446 = vmatprep.subr.mxu0 %v674_v3 }
 0x1af   :  { %1447 = vmatpush3.msra.mxu0 %v674_v3 }
 0x1b0   :  { %1449 = vmatmul.mubr.msk.f32.vlgmr.msra.gmra.mxu0 %vm682_vm9, %v1798_v4  ;;  %1463 = vmatprep.subr.bf16.mxu0 %v1535_v0 }
 0x1b1   :  { %1464 = vmatpush3.bf16.msra.mxu0 %v971_v6  ;;  %1465 = vmatprep.mubr.msk.bf16.mxu0 %vm1536_vm1, %v1535_v0 }
 0x1b2   :  { %1488 = vmatprep.subr.bf16.mxu0 %v1535_v0 }
 0x260   :  { %v620_v7 = vpop.f32.mrf.mxu0 }
 0x261   :  { %v667_v8 = vpop.f32.mrf.mxu1 }
 0x262   :  { %v1424_v9 = vpop.f32.mrf.mxu0  ;;  %v668_v18 = vadd.f32 %v667_v8, %v620_v7 }
 0x263   :  { %v1430_v10 = vpop.f32.mrf.mxu1  ;;  %v919_v9 = vld [vmem:[#allocation5 + $0x4] sm:$0xf] }
 0x264   :  { %v623_v11 = vpop.f32.mrf.mxu0 }
 0x265   :  { %v670_v12 = vpop.f32.mrf.mxu1 }
 0x266   :  { %v1425_v13 = vpop.f32.mrf.mxu0  ;;  %v671_v15 = vadd.f32 %v670_v12, %v623_v11  ;;  %v1319_v11 = vld [vmem:[%s1912_s11 + $0x78] sm:$0xff] }
 0x267   :  { %v1431_v14 = vpop.f32.mrf.mxu1  ;;  %v924_v13 = vsel %vm582_vm7, %v919_v9, 0  ;;  %vm540_vm7 = vcmask 261120  }
 0x268   :  { %v1306_v14 = vsel %vm896_vm14, 1.0, %v1535_v0  ;;  %541 = vst.msk [vmem:[#allocation6] sm:$0xff] %vm540_vm7, %v1535_v0 }
 0x270   :  { %v1450_v16 = vpop.f32.mrf.mxu0 }
 0x271   :  { %v765_v19 = vadd.f32 %v1450_v16, %v671_v15 }
 0x272   :  { %v755_v20 = vpop.f32.mrf.mxu0 }
 0x273   :  { %v774_v21 = vadd.f32 %v1300_v17, %v765_v19  ;;  %v764_v22 = vadd.f32 %v755_v20, %v668_v18  ;;  %v1308_v18 = vsel %vm909_vm3, 1.0, %v1535_v0  ;;  %v1317_v20 = vld [vmem:[%s1912_s11 + $0x68] sm:$0xff] }
 0x275   :  { %v788_v23 = vmin.f32 %v774_v21, 20.0  ;;  %v773_v24 = vadd.f32 %v1300_v17, %v764_v22  ;;  %vm786_vm11 = vcmp.gt.f32.partialorder %v774_v21, 20.0  ;;  %v776_v52 = vsub.f32 0.0, %v774_v21  ;;  %v1315_v22 = vld [vmem:[%s1912_s11 + $0x58] sm:$0xff] }
 0x277   :  { %v791_v25 = vmul.f32 1.442695, %v788_v23  ;;  %v787_v26 = vmin.f32 %v773_v24, 20.0  ;;  %vm785_vm13 = vcmp.gt.f32.partialorder %v773_v24, 20.0  ;;  %v775_v53 = vsub.f32 0.0, %v773_v24  ;;  %v1314_v23 = vld [vmem:[%s1912_s11 + $0x50] sm:$0xff] }
 0x278   :  { %v779_v54 = vmul.f32 1.442695, %v776_v52 }
 0x279   :  { %v789_v27 = vmul.f32 1.442695, %v787_v26  ;;  %1501 = vpow2.f32 %v791_v25  ;;  %v777_v56 = vmul.f32 1.442695, %v775_v53 }
 0x27b   :  { %1503 = vpow2.f32 %v789_v27 }
 0x286   :  { %v1502_v28 = vpop.eup %1501 }
 0x287   :  { %v802_v29 = vadd.f32 1.0, %v1502_v28  ;;  %v805_v33 = vmul.f32 -0.5, %v1502_v28  ;;  %v808_v36 = vand.u32 2147483647, %v1502_v28 }
 0x288   :  { %v1504_v30 = vpop.eup %1503 }
 0x289   :  { %1505 = vlog2.f32 %v802_v29  ;;  %v793_v32 = vadd.f32 1.0, %v1504_v30  ;;  %v796_v34 = vmul.f32 -0.5, %v1504_v30  ;;  %v806_v35 = vadd.f32 1.0, %v805_v33 }
 0x28a   :  { %v799_v40 = vand.u32 2147483647, %v1504_v30  ;;  %vm809_vm10 = vcmp.lt.f32.partialorder %v808_v36, 0.0004427343 }
 0x28b   :  { %1507 = vlog2.f32 %v793_v32  ;;  %v797_v37 = vadd.f32 1.0, %v796_v34  ;;  %v807_v42 = vmul.f32 %v1502_v28, %v806_v35 }
 0x28c   :  { %vm800_vm12 = vcmp.lt.f32.partialorder %v799_v40, 0.0004427343  ;;  %1509 = vpow2.f32 %v779_v54 }
 0x28d   :  { %v798_v46 = vmul.f32 %v1504_v30, %v797_v37  ;;  %1511 = vpow2.f32 %v777_v56 }
 0x296   :  { %v1506_v39 = vpop.eup %1505 }
 0x297   :  { %v804_v41 = vmul.f32 0.6931472, %v1506_v39 }
 0x298   :  { %v1508_v43 = vpop.eup %1507 }
 0x299   :  { %v810_v44 = vsel %vm809_vm10, %v807_v42, %v804_v41  ;;  %v795_v45 = vmul.f32 0.6931472, %v1508_v43  ;;  %v1510_v57 = vpop.eup %1509  ;;  %v1323_v41 = vld [vmem:[%s1914_s12 + $0x1] ss:$0 sm:$0xff]  ;;  %s1539_s12 = smov 16  }
 0x29a   :  { %v812_v47 = vsel %vm786_vm11, %v774_v21, %v810_v44  ;;  %v1512_v58 = vpop.eup %1511  ;;  %v782_v60 = vadd.f32 1.0, %v1510_v57  ;;  %v1316_v21 = vld [vmem:[%s1912_s11 + $0x60] sm:$0xff] }
 0x29b   :  { %817 = vrot.lane.b32.xlu1 %v812_v47, %s1538_s10  ;;  %v801_v48 = vsel %vm800_vm12, %v798_v46, %v795_v45  ;;  %v781_v61 = vadd.f32 1.0, %v1512_v58 }
 0x29c   :  { %v811_v49 = vsel %vm785_vm13, %v773_v24, %v801_v48  ;;  %1513 = vrcp.f32 %v782_v60  ;;  %v1312_v24 = vld [vmem:[%s1912_s11 + $0x40] sm:$0xff] }
 0x29d   :  { %815 = vrot.lane.b32.xlu0 %v811_v49, %s1538_s10  ;;  %1515 = vrcp.f32 %v781_v61 }
 0x29f   :  { %907 = vperm.xlu1 %1500, %v1305_v50  }
 0x2a3   :  { %894 = vperm.xlu1 %1500, %v1303_v51  }
 0x2a9   :  { %v1514_v2 = vpop.eup %1513 }
 0x2aa   :  { %v1516_v3 = vpop.eup %1515 }
 0x2bb   :  { %824 = vxpose.xlu0.c.b16.start.end [1/1] (short) (narrow) %v1757_v55, 16 }
 0x30d   :  { %v818_v1 = vpop.permute.xlu1 %817 }
 0x30e   :  { %v822_v6 = vmul.f32 %v1514_v2, %v818_v1 }
 0x30f   :  { %v816_v5 = vpop.permute.xlu0 %815 }
 0x310   :  { %v821_v55 = vmul.f32 %v1516_v3, %v816_v5 }
 0x312   :  { %v823_v7 = vpack.c.bf16 %v822_v6, %v821_v55 }
 0x314   :  { %1452 = vmatpush3.bf16.msra.mxu1 %v823_v7 }
 0x315   :  { %1457 = vmatprep.subr.bf16.mxu1 %v1535_v0 }
 0x31a   :  { %v908_v8 = vpop.permute.xlu1 %907 }
 0x31b   :  { %vm910_vm15 = vcmp.eq.s32.totalorder %v1740_v38, %v908_v8 }
 0x31c   :  { %v1309_v16 = vsel %vm910_vm15, 1.0, %v1535_v0 }
 0x31d   :  { %v832_v10 = vpop.trf.xlu0  ;;  %v915_v19 = vpack.c.bf16 %v1309_v16, %v1308_v18 }
 0x31e   :  { %v895_v12 = vpop.permute.xlu1 %894  ;;  %1454 = vmatmul.mubr.msk.bf16.vlgmr.msra.gmra.mxu1 %vm74_vm0, %v832_v10 }
 0x31f   :  { %vm897_vm2 = vcmp.eq.s32.totalorder %v1740_v38, %v895_v12  ;;  %1458 = vmatpush3.bf16.msra.mxu1 %v924_v13  ;;  %1459 = vmatprep.mubr.msk.bf16.mxu1 %vm1536_vm1, %v1535_v0  ;;  %v1318_v38 = vld [vmem:[%s1912_s11 + $0x70] sm:$0xff] }
 0x320   :  { %v1307_v15 = vsel %vm897_vm2, 1.0, %v1535_v0  ;;  %1469 = vmatprep.subr.mxu1 %v1319_v11 }
 0x321   :  { %v1834_v17 = vpack.c.bf16 %v1307_v15, %v1306_v14 }
 0x323   :  { %1466 = vmatmul.mubr.msk.bf16.vlgmr.msra.gmra.mxu0 %vm578_vm8, %v1834_v17 }
 0x324   :  { %1490 = vmatprep.mubr.msk.bf16.mxu0 %vm1536_vm1, %v1535_v0 }
 0x326   :  { %1460 = vmatmul.mubr.msk.bf16.vlgmr.msra.gmra.mxu1 %vm578_vm8, %v915_v19 }
 0x327   :  { %1470 = vmatpush3.msra.mxu1 %v1319_v11  ;;  %1485 = vmatprep.mubr.msk.f32.mxu1 %vm682_vm9, %v1764_v59  ;;  %v1313_v59 = vld [vmem:[%s1912_s11 + $0x48] sm:$0xff] }
 0x328   :  { %1471 = vmatprep.subr.mxu1 %v1318_v38 }
 0x329   :  { %1472 = vmatpush3.msra.mxu1 %v1318_v38 }
 0x32a   :  { %1473 = vmatprep.subr.mxu1 %v1317_v20 }
 0x32b   :  { %1474 = vmatpush3.msra.mxu1 %v1317_v20 }
 0x32c   :  { %1475 = vmatprep.subr.mxu1 %v1316_v21 }
 0x32d   :  { %1476 = vmatpush3.msra.mxu1 %v1316_v21 }
 0x32e   :  { %1477 = vmatprep.subr.mxu1 %v1315_v22 }
 0x32f   :  { %1478 = vmatpush3.msra.mxu1 %v1315_v22 }
 0x330   :  { %1479 = vmatprep.subr.mxu1 %v1314_v23 }
 0x331   :  { %1480 = vmatpush3.msra.mxu1 %v1314_v23 }
 0x332   :  { %1481 = vmatprep.subr.mxu1 %v1313_v59 }
 0x333   :  { %1482 = vmatpush3.msra.mxu1 %v1313_v59 }
 0x334   :  { %1483 = vmatprep.subr.mxu1 %v1312_v24 }
 0x335   :  { %1484 = vmatpush3.msra.mxu1 %v1312_v24 }
 0x336   :  { %1486 = vmatmul.mubr.msk.f32.vlgmr.msra.gmra.mxu1 %vm682_vm9, %v1798_v4 }
 0x3de   :  { %v1867_v25 = vpop.f32.mrf.mxu1 }
 0x3e0   :  { %v1455_v26 = vpop.f32.mrf.mxu1 }
 0x3e2   :  { %v881_v27 = vpop.f32.mrf.mxu1 }
 0x3e3   :  { %v1007_v28 = vpop.f32.mrf.mxu0 }
 0x3e4   :  { %v1456_v29 = vpop.f32.mrf.mxu1 }
 0x3e5   :  { %v1467_v30 = vpop.f32.mrf.mxu0 }
 0x3e6   :  { %v960_v32 = vpop.f32.mrf.mxu1  ;;  %v1233_v30 = vld [vmem:[%s1915_s16] sm:$0x1] }
 0x3e7   :  { %v1010_v33 = vpop.f32.mrf.mxu0  ;;  %v1008_v4 = vadd.f32 %v1007_v28, %v960_v32  ;;  %v1237_v28 = vld [vmem:[#allocation2] sm:$0xff]  ;;  %v1234_v32 = vadd.f32 1e-05, %v1233_v30 }
 0x3e8   :  { %v1461_v34 = vpop.f32.mrf.mxu1 }
 0x3e9   :  { %v1468_v35 = vpop.f32.mrf.mxu0 }
 0x3ea   :  { %v963_v36 = vpop.f32.mrf.mxu1 }
 0x3eb   :  { %v1011_v39 = vadd.f32 %v1010_v33, %v963_v36  ;;  %v1218_v33 = vld [vmem:[#allocation6] sm:$0xff]  ;;  %v1253_v36 = vshrl.u32 %v544_v31, 7 }
 0x3ec   :  { %v1462_v37 = vpop.f32.mrf.mxu1  ;;  %v1327_v31 = vld [vmem:[%s1919_s14] ss:$0 sm:$0xff] }
 0x3ed   :  { %v1254_v37 = vsub.s32 0, %v1253_v36 }
 0x3f6   :  { %v1487_v40 = vpop.f32.mrf.mxu1 }
 0x3f7   :  { %v1099_v42 = vadd.f32 %v1487_v40, %v1011_v39  ;;  %v1231_v40 = vld [vmem:[%s1916_s17] sm:$0xff] }
 0x3f8   :  { %v1089_v43 = vpop.f32.mrf.mxu1 }
 0x3f9   :  { %v1109_v44 = vadd.f32 %v1323_v41, %v1099_v42  ;;  %v1098_v45 = vadd.f32 %v1089_v43, %v1008_v4  ;;  %v1325_v4 = vld [vmem:[%s1917_s15] ss:$0 sm:$0xff] }
 0x3fb   :  { %v1123_v46 = vmin.f32 %v1109_v44, 20.0  ;;  %v1108_v47 = vadd.f32 %v1323_v41, %v1098_v45  ;;  %vm1121_vm4 = vcmp.gt.f32.partialorder %v1109_v44, 20.0  ;;  %v1111_v10 = vsub.f32 0.0, %v1109_v44 }
 0x3fd   :  { %v1126_v48 = vmul.f32 1.442695, %v1123_v46  ;;  %v1122_v49 = vmin.f32 %v1108_v47, 20.0  ;;  %vm1120_vm6 = vcmp.gt.f32.partialorder %v1108_v47, 20.0  ;;  %v1110_v11 = vsub.f32 0.0, %v1108_v47 }
 0x3fe   :  { %v1114_v12 = vmul.f32 1.442695, %v1111_v10 }
 0x3ff   :  { %v1124_v50 = vmul.f32 1.442695, %v1122_v49  ;;  %1517 = vpow2.f32 %v1126_v48  ;;  %v1112_v13 = vmul.f32 1.442695, %v1110_v11  ;;  %v1236_v48 = vld [vmem:[#allocation3] sm:$0xff] }
 0x401   :  { %1519 = vpow2.f32 %v1124_v50 }
 0x40c   :  { %v1518_v51 = vpop.eup %1517 }
 0x40d   :  { %v1137_v52 = vadd.f32 1.0, %v1518_v51  ;;  %v1140_v56 = vmul.f32 -0.5, %v1518_v51  ;;  %v1143_v60 = vand.u32 2147483647, %v1518_v51 }
 0x40e   :  { %v1520_v53 = vpop.eup %1519 }
 0x40f   :  { %1521 = vlog2.f32 %v1137_v52  ;;  %v1128_v54 = vadd.f32 1.0, %v1520_v53  ;;  %v1131_v57 = vmul.f32 -0.5, %v1520_v53  ;;  %v1141_v58 = vadd.f32 1.0, %v1140_v56 }
 0x410   :  { %v1134_v63 = vand.u32 2147483647, %v1520_v53  ;;  %vm1144_vm1 = vcmp.lt.f32.partialorder %v1143_v60, 0.0004427343 }
 0x411   :  { %1523 = vlog2.f32 %v1128_v54  ;;  %v1132_v61 = vadd.f32 1.0, %v1131_v57  ;;  %v1142_v2 = vmul.f32 %v1518_v51, %v1141_v58 }
 0x412   :  { %vm1135_vm5 = vcmp.lt.f32.partialorder %v1134_v63, 0.0004427343  ;;  %1525 = vpow2.f32 %v1114_v12 }
 0x413   :  { %v1133_v55 = vmul.f32 %v1520_v53, %v1132_v61  ;;  %1527 = vpow2.f32 %v1112_v13 }
 0x41c   :  { %v1522_v62 = vpop.eup %1521 }
 0x41d   :  { %v1139_v1 = vmul.f32 0.6931472, %v1522_v62 }
 0x41e   :  { %v1524_v3 = vpop.eup %1523 }
 0x41f   :  { %v1145_v5 = vsel %vm1144_vm1, %v1142_v2, %v1139_v1  ;;  %v1130_v6 = vmul.f32 0.6931472, %v1524_v3  ;;  %v1526_v14 = vpop.eup %1525 }
 0x420   :  { %v1147_v7 = vsel %vm1121_vm4, %v1109_v44, %v1145_v5  ;;  %v1528_v15 = vpop.eup %1527  ;;  %v1117_v16 = vadd.f32 1.0, %v1526_v14 }
 0x421   :  { %1152 = vrot.lane.b32.xlu1 %v1147_v7, %s1538_s10  ;;  %v1136_v8 = vsel %vm1135_vm5, %v1133_v55, %v1130_v6  ;;  %v1116_v18 = vadd.f32 1.0, %v1528_v15 }
 0x422   :  { %v1146_v9 = vsel %vm1120_vm6, %v1108_v47, %v1136_v8  ;;  %1529 = vrcp.f32 %v1117_v16 }
 0x423   :  { %1531 = vrcp.f32 %v1116_v18 }
 0x424   :  { %1533 = vrsqrt.f32 %v1234_v32 }
 0x425   :  { %1150 = vrot.lane.b32.xlu1 %v1146_v9, %s1538_s10 }
 0x42f   :  { %v1530_v38 = vpop.eup %1529 }
 0x430   :  { %v1532_v20 = vpop.eup %1531 }
 0x431   :  { %v1534_v39 = vpop.eup %1533 }
 0x432   :  { %v1255_v43 = vrot.slane %v1534_v39, %v1254_v37 }
 0x448   :  { %1159 = vxpose.xlu1.c.b16.start.end [1/1] (short) (narrow) %v1834_v17, 16 }
 0x493   :  { %v1153_v19 = vpop.permute.xlu1 %1152 }
 0x494   :  { %v1157_v22 = vmul.f32 %v1530_v38, %v1153_v19 }
 0x497   :  { %v1151_v21 = vpop.permute.xlu1 %1150 }
 0x498   :  { %v1156_v23 = vmul.f32 %v1532_v20, %v1151_v21 }
 0x49a   :  { %v1158_v59 = vpack.c.bf16 %v1157_v22, %v1156_v23 }
 0x49c   :  { %1489 = vmatpush3.bf16.msra.mxu0 %v1158_v59 }
 0x4aa   :  { %v1167_v17 = vpop.trf.xlu1 }
 0x4ab   :  { %1491 = vmatmul.mubr.msk.bf16.vlgmr.msra.gmra.mxu0 %vm74_vm0, %v1167_v17 }
 0x56b   :  { %v1212_v24 = vpop.f32.mrf.mxu0 }
 0x56c   :  { %1220 = vrot.lane.b32.xlu0 %v1212_v24, %s1539_s12 }
 0x56d   :  { %v1492_v26 = vpop.f32.mrf.mxu0 }
 0x56f   :  { %v1215_v27 = vpop.f32.mrf.mxu0 }
 0x570   :  { %1239 = vrot.lane.b32.xlu0 %v1237_v28, %s1539_s12 }
 0x571   :  { %v1493_v29 = vpop.f32.mrf.mxu0 }
 0x5de   :  { %v1221_v34 = vpop.permute.xlu0 %1220 }
 0x5df   :  { %v1223_v35 = vsel %vm74_vm0, %v1867_v25, %v1221_v34  ;;  %v1326_v25 = vld [vmem:[%s1918_s13] ss:$0 sm:$0xff] }
 0x5e0   :  { %v1224_v0 = vadd.f32 %v1223_v35, %v1218_v33 }
 0x5e2   :  { %1226 = vst.msk [vmem:[#allocation6] sm:$0xff] %vm540_vm7, %v1224_v0  ;;  %v1240_v47 = vpop.permute.xlu0 %1239 }
 0x5e3   :  { %v1242_v50 = vsel %vm74_vm0, %v1236_v48, %v1240_v47 }
 0x5e9   :  { %v1230_v41 = vld [vmem:[#allocation6] sm:$0xff] }
 0x5ea   :  { %v1232_v42 = vmul.f32 %v1231_v40, %v1230_v41 }
 0x5ec   :  { %v1250_v44 = vsub.f32 %v1232_v42, %v1325_v4 }
 0x5ee   :  { %v1257_v45 = vmul.f32 %v1255_v43, %v1250_v44 }
 0x5f0   :  { %v1265_v46 = vmul.f32 %v1326_v25, %v1257_v45 }
 0x5f2   :  { %v1273_v49 = vadd.f32 %v1327_v31, %v1265_v46 }
 0x5f4   :  { %v1274_v51 = vadd.f32 %v1273_v49, %v1242_v50 }
 0x5f6   :  { %1275 = vst.msk [vmem:[%s1920_s18] sm:$0xff] %vm540_vm7, %v1274_v51 }

</bundles_post_ra>
